<compile_context>
chip_gen: v6e
topology: v6e:2x2x1
jax: 0.10.0
libtpu: 0.0.40
codegen_flags: <defaults>
</compile_context>

<pallas_src>
import functools

import jax
import jax.numpy as jnp
from jax.experimental import pallas as pl
from jax.experimental.pallas import tpu as pltpu

IN_DIM = 28 * 28      # 784
HID = 128
ENC = 32
NOISE_FACTOR = 0.5


def dae_kernel(x_ref, noise_ref,
               w1_ref, b1_ref, w2_ref, b2_ref,
               w3_ref, b3_ref, w4_ref, b4_ref,
               out_ref):
    # --- add_noise: x + noise_factor * randn_like(x)  (noise streamed as bf16) ---
    x = x_ref[...].astype(jnp.float32)
    n = noise_ref[...].astype(jnp.float32)
    x_noisy = (x + NOISE_FACTOR * n).astype(jnp.bfloat16)

    # --- encoder: Linear(784,128) + ReLU, Linear(128,32) ---
    h1 = jnp.dot(x_noisy, w1_ref[...], preferred_element_type=jnp.float32) + b1_ref[...]
    h1 = jnp.maximum(h1, 0.0).astype(jnp.bfloat16)
    enc = jnp.dot(h1, w2_ref[...], preferred_element_type=jnp.float32) + b2_ref[...]

    # --- decoder: Linear(32,128) + ReLU, Linear(128,784) + Sigmoid ---
    h2 = jnp.dot(enc.astype(jnp.bfloat16), w3_ref[...],
                 preferred_element_type=jnp.float32) + b3_ref[...]
    h2 = jnp.maximum(h2, 0.0).astype(jnp.bfloat16)
    logits = jnp.dot(h2, w4_ref[...], preferred_element_type=jnp.float32) + b4_ref[...]
    out_ref[...] = jax.nn.sigmoid(logits)


@functools.partial(jax.jit, static_argnames=("bm",))
def denoising_autoencoder_fwd(x, noise, params, *, bm=256):
    """x, noise: (B, 1, 28, 28) float32.  Returns (B, 1, 28, 28) float32."""
    B = x.shape[0]

    # Flatten NCHW -> (B, 784); stream activations as bf16 to cut HBM traffic.
    x2 = x.reshape(B, IN_DIM).astype(jnp.bfloat16)
    n2 = noise.reshape(B, IN_DIM).astype(jnp.bfloat16)

    # cdiv grid + zero-padded tail: arbitrary batch sizes keep the big tile.
    num_tiles = pl.cdiv(B, bm)
    B_pad = num_tiles * bm
    if B_pad != B:
        pad = ((0, B_pad - B), (0, 0))
        x2 = jnp.pad(x2, pad)
        n2 = jnp.pad(n2, pad)

    w1, b1, w2, b2, w3, b3, w4, b4 = params
    # bf16 weights feed the MXU natively; biases stay f32 (added to f32 accumulators).
    w1, w2, w3, w4 = (w.astype(jnp.bfloat16) for w in (w1, w2, w3, w4))

    batch_spec = pl.BlockSpec((bm, IN_DIM), lambda i: (i, 0))

    def full(shape):
        # whole-array block, resident in VMEM across the batch grid
        return pl.BlockSpec(shape, lambda i: (0, 0))

    out = pl.pallas_call(
        dae_kernel,
        out_shape=jax.ShapeDtypeStruct((B_pad, IN_DIM), jnp.float32),
        grid_spec=pltpu.PrefetchScalarGridSpec(
            num_scalar_prefetch=0,
            grid=(num_tiles,),
            in_specs=[
                batch_spec,                # x (flattened, bf16)
                batch_spec,                # noise (flattened, bf16)
                full((IN_DIM, HID)), full((1, HID)),     # encoder layer 1
                full((HID, ENC)),    full((1, ENC)),     # encoder layer 2
                full((ENC, HID)),    full((1, HID)),     # decoder layer 1
                full((HID, IN_DIM)), full((1, IN_DIM)),  # decoder layer 2
            ],
            out_specs=batch_spec,
        ),
        compiler_params=pltpu.CompilerParams(
            dimension_semantics=("parallel",),
            vmem_limit_bytes=32 * 1024 * 1024,
        ),
    )(x2, n2, w1, b1, w2, b2, w3, b3, w4, b4)

    if B_pad != B:
        out = out[:B]
    return out.reshape(B, 1, 28, 28)


def init_params(key):
    """Deterministic init matching nn.Linear shapes: U(-1/sqrt(fan_in), 1/sqrt(fan_in))."""
    def linear(k, fan_in, fan_out):
        kw, kb = jax.random.split(k)
        bound = 1.0 / jnp.sqrt(fan_in)
        w = jax.random.uniform(kw, (fan_in, fan_out), jnp.float32, -bound, bound)
        b = jax.random.uniform(kb, (1, fan_out), jnp.float32, -bound, bound)
        return w, b

    k1, k2, k3, k4 = jax.random.split(key, 4)
    w1, b1 = linear(k1, IN_DIM, HID)   # Linear(784, 128)
    w2, b2 = linear(k2, HID, ENC)      # Linear(128, 32)
    w3, b3 = linear(k3, ENC, HID)      # Linear(32, 128)
    w4, b4 = linear(k4, HID, IN_DIM)   # Linear(128, 784)
    return (w1, b1, w2, b2, w3, b3, w4, b4)


if __name__ == "__main__":
    key = jax.random.PRNGKey(0)
    k_param, k_x, k_noise = jax.random.split(key, 3)

    params = init_params(k_param)

    B = 8
    x = jax.random.uniform(k_x, (B, 1, 28, 28), jnp.float32)         # image-like input in [0,1)
    noise = jax.random.normal(k_noise, (B, 1, 28, 28), jnp.float32)  # ~ torch.randn_like(x)

    # B=8 < bm=256 exercises the cdiv/padding path (tail tile is zero-padded).
    out = denoising_autoencoder_fwd(x, noise, params)
    out = jax.block_until_ready(out)

    assert out.shape == (B, 1, 28, 28)
    assert jnp.all(jnp.isfinite(out))
    assert jnp.all((out >= 0.0) & (out <= 1.0))  # sigmoid output range

    print("KERNEL_OK")
</pallas_src>

<mosaic_0001>
module attributes {stable_mosaic.version = 11 : i64} {
  func.func @dae_kernel(%arg0: i32, %arg1: memref<256x784xbf16, #tpu.memory_space<vmem>>, %arg2: memref<256x784xbf16, #tpu.memory_space<vmem>>, %arg3: memref<784x128xbf16, #tpu.memory_space<vmem>>, %arg4: memref<1x128xf32, #tpu.memory_space<vmem>>, %arg5: memref<128x32xbf16, #tpu.memory_space<vmem>>, %arg6: memref<1x32xf32, #tpu.memory_space<vmem>>, %arg7: memref<32x128xbf16, #tpu.memory_space<vmem>>, %arg8: memref<1x128xf32, #tpu.memory_space<vmem>>, %arg9: memref<128x784xbf16, #tpu.memory_space<vmem>>, %arg10: memref<1x784xf32, #tpu.memory_space<vmem>>, %arg11: memref<256x784xf32, #tpu.memory_space<vmem>>) attributes {dimension_semantics = [#tpu.dimension_semantics<parallel>], iteration_bounds = array<i64: 1>, scalar_prefetch = 0 : i64, scratch_operands = 0 : i64, tpu.core_type = #tpu.core_type<tc>, window_params = [{transform_indices = @transform_0, window_bounds = array<i64: 256, 784>}, {transform_indices = @transform_1, window_bounds = array<i64: 256, 784>}, {pipeline_mode = #tpu.pipeline_mode<synchronous>, transform_indices = @transform_2, window_bounds = array<i64: 784, 128>}, {pipeline_mode = #tpu.pipeline_mode<synchronous>, transform_indices = @transform_3, window_bounds = array<i64: 1, 128>}, {pipeline_mode = #tpu.pipeline_mode<synchronous>, transform_indices = @transform_4, window_bounds = array<i64: 128, 32>}, {pipeline_mode = #tpu.pipeline_mode<synchronous>, transform_indices = @transform_5, window_bounds = array<i64: 1, 32>}, {pipeline_mode = #tpu.pipeline_mode<synchronous>, transform_indices = @transform_6, window_bounds = array<i64: 32, 128>}, {pipeline_mode = #tpu.pipeline_mode<synchronous>, transform_indices = @transform_7, window_bounds = array<i64: 1, 128>}, {pipeline_mode = #tpu.pipeline_mode<synchronous>, transform_indices = @transform_8, window_bounds = array<i64: 128, 784>}, {pipeline_mode = #tpu.pipeline_mode<synchronous>, transform_indices = @transform_9, window_bounds = array<i64: 1, 784>}, {transform_indices = @transform_10, window_bounds = array<i64: 256, 784>}]} {
    %c0 = arith.constant 0 : index
    %c0_0 = arith.constant 0 : index
    %0 = vector.load %arg1[%c0, %c0_0] : memref<256x784xbf16, #tpu.memory_space<vmem>>, vector<256x784xbf16>
    %1 = arith.extf %0 : vector<256x784xbf16> to vector<256x784xf32>
    %c0_1 = arith.constant 0 : index
    %c0_2 = arith.constant 0 : index
    %2 = vector.load %arg2[%c0_1, %c0_2] : memref<256x784xbf16, #tpu.memory_space<vmem>>, vector<256x784xbf16>
    %3 = arith.extf %2 : vector<256x784xbf16> to vector<256x784xf32>
    %cst = arith.constant 5.000000e-01 : f32
    %4 = vector.broadcast %cst : f32 to vector<256x784xf32>
    %5 = arith.mulf %4, %3 : vector<256x784xf32>
    %6 = arith.addf %1, %5 : vector<256x784xf32>
    %7 = arith.truncf %6 : vector<256x784xf32> to vector<256x784xbf16>
    %c0_3 = arith.constant 0 : index
    %c0_4 = arith.constant 0 : index
    %8 = vector.load %arg3[%c0_3, %c0_4] : memref<784x128xbf16, #tpu.memory_space<vmem>>, vector<784x128xbf16>
    %cst_5 = arith.constant dense<0.000000e+00> : vector<256x128xf32>
    %9 = tpu.matmul %7, %8, %cst_5 {dimension_numbers = #tpu.dot_dimension_numbers<[1], [0], [0], [1], [0, 0, 1, 1], [], []>} : vector<256x784xbf16>, vector<784x128xbf16>, vector<256x128xf32> -> vector<256x128xf32>
    %c0_6 = arith.constant 0 : index
    %c0_7 = arith.constant 0 : index
    %10 = vector.load %arg4[%c0_6, %c0_7] : memref<1x128xf32, #tpu.memory_space<vmem>>, vector<1x128xf32>
    %11 = vector.broadcast %10 : vector<1x128xf32> to vector<256x128xf32>
    %12 = arith.addf %9, %11 : vector<256x128xf32>
    %cst_8 = arith.constant 0.000000e+00 : f32
    %13 = vector.broadcast %cst_8 : f32 to vector<256x128xf32>
    %14 = arith.maximumf %12, %13 : vector<256x128xf32>
    %15 = arith.truncf %14 : vector<256x128xf32> to vector<256x128xbf16>
    %c0_9 = arith.constant 0 : index
    %c0_10 = arith.constant 0 : index
    %16 = vector.load %arg5[%c0_9, %c0_10] : memref<128x32xbf16, #tpu.memory_space<vmem>>, vector<128x32xbf16>
    %cst_11 = arith.constant dense<0.000000e+00> : vector<256x32xf32>
    %17 = tpu.matmul %15, %16, %cst_11 {dimension_numbers = #tpu.dot_dimension_numbers<[1], [0], [0], [1], [0, 0, 1, 1], [], []>} : vector<256x128xbf16>, vector<128x32xbf16>, vector<256x32xf32> -> vector<256x32xf32>
    %c0_12 = arith.constant 0 : index
    %c0_13 = arith.constant 0 : index
    %18 = vector.load %arg6[%c0_12, %c0_13] : memref<1x32xf32, #tpu.memory_space<vmem>>, vector<1x32xf32>
    %19 = vector.broadcast %18 : vector<1x32xf32> to vector<256x32xf32>
    %20 = arith.addf %17, %19 : vector<256x32xf32>
    %21 = arith.truncf %20 : vector<256x32xf32> to vector<256x32xbf16>
    %c0_14 = arith.constant 0 : index
    %c0_15 = arith.constant 0 : index
    %22 = vector.load %arg7[%c0_14, %c0_15] : memref<32x128xbf16, #tpu.memory_space<vmem>>, vector<32x128xbf16>
    %cst_16 = arith.constant dense<0.000000e+00> : vector<256x128xf32>
    %23 = tpu.matmul %21, %22, %cst_16 {dimension_numbers = #tpu.dot_dimension_numbers<[1], [0], [0], [1], [0, 0, 1, 1], [], []>} : vector<256x32xbf16>, vector<32x128xbf16>, vector<256x128xf32> -> vector<256x128xf32>
    %c0_17 = arith.constant 0 : index
    %c0_18 = arith.constant 0 : index
    %24 = vector.load %arg8[%c0_17, %c0_18] : memref<1x128xf32, #tpu.memory_space<vmem>>, vector<1x128xf32>
    %25 = vector.broadcast %24 : vector<1x128xf32> to vector<256x128xf32>
    %26 = arith.addf %23, %25 : vector<256x128xf32>
    %cst_19 = arith.constant 0.000000e+00 : f32
    %27 = vector.broadcast %cst_19 : f32 to vector<256x128xf32>
    %28 = arith.maximumf %26, %27 : vector<256x128xf32>
    %29 = arith.truncf %28 : vector<256x128xf32> to vector<256x128xbf16>
    %c0_20 = arith.constant 0 : index
    %c0_21 = arith.constant 0 : index
    %30 = vector.load %arg9[%c0_20, %c0_21] : memref<128x784xbf16, #tpu.memory_space<vmem>>, vector<128x784xbf16>
    %cst_22 = arith.constant dense<0.000000e+00> : vector<256x784xf32>
    %31 = tpu.matmul %29, %30, %cst_22 {dimension_numbers = #tpu.dot_dimension_numbers<[1], [0], [0], [1], [0, 0, 1, 1], [], []>} : vector<256x128xbf16>, vector<128x784xbf16>, vector<256x784xf32> -> vector<256x784xf32>
    %c0_23 = arith.constant 0 : index
    %c0_24 = arith.constant 0 : index
    %32 = vector.load %arg10[%c0_23, %c0_24] : memref<1x784xf32, #tpu.memory_space<vmem>>, vector<1x784xf32>
    %33 = vector.broadcast %32 : vector<1x784xf32> to vector<256x784xf32>
    %34 = arith.addf %31, %33 : vector<256x784xf32>
    %35 = arith.negf %34 : vector<256x784xf32>
    %36 = math.exp %35 : vector<256x784xf32>
    %cst_25 = arith.constant 1.000000e+00 : f32
    %37 = vector.broadcast %cst_25 : f32 to vector<256x784xf32>
    %38 = arith.addf %37, %36 : vector<256x784xf32>
    %39 = arith.divf %37, %38 : vector<256x784xf32>
    %c0_26 = arith.constant 0 : index
    %c0_27 = arith.constant 0 : index
    %40 = vector.load %arg11[%c0_26, %c0_27] : memref<256x784xf32, #tpu.memory_space<vmem>>, vector<256x784xf32>
    tpu.vector_store %arg11[%c0_26, %c0_27], %39 {strides = array<i32>} : memref<256x784xf32, #tpu.memory_space<vmem>>, vector<256x784xf32>,
    return
  }
  func.func @transform_0(%arg0: i32) -> (i32, i32) {
    %c0_i32 = arith.constant 0 : i32
    %c0_i32_0 = arith.constant 0 : i32
    return %arg0, %c0_i32 : i32, i32
  }
  func.func @transform_1(%arg0: i32) -> (i32, i32) {
    %c0_i32 = arith.constant 0 : i32
    %c0_i32_0 = arith.constant 0 : i32
    return %arg0, %c0_i32 : i32, i32
  }
  func.func @transform_2(%arg0: i32) -> (i32, i32) {
    %c0_i32 = arith.constant 0 : i32
    %c0_i32_0 = arith.constant 0 : i32
    %c0_i32_1 = arith.constant 0 : i32
    return %c0_i32, %c0_i32_0 : i32, i32
  }
  func.func @transform_3(%arg0: i32) -> (i32, i32) {
    %c0_i32 = arith.constant 0 : i32
    %c0_i32_0 = arith.constant 0 : i32
    %c0_i32_1 = arith.constant 0 : i32
    return %c0_i32, %c0_i32_0 : i32, i32
  }
  func.func @transform_4(%arg0: i32) -> (i32, i32) {
    %c0_i32 = arith.constant 0 : i32
    %c0_i32_0 = arith.constant 0 : i32
    %c0_i32_1 = arith.constant 0 : i32
    return %c0_i32, %c0_i32_0 : i32, i32
  }
  func.func @transform_5(%arg0: i32) -> (i32, i32) {
    %c0_i32 = arith.constant 0 : i32
    %c0_i32_0 = arith.constant 0 : i32
    %c0_i32_1 = arith.constant 0 : i32
    return %c0_i32, %c0_i32_0 : i32, i32
  }
  func.func @transform_6(%arg0: i32) -> (i32, i32) {
    %c0_i32 = arith.constant 0 : i32
    %c0_i32_0 = arith.constant 0 : i32
    %c0_i32_1 = arith.constant 0 : i32
    return %c0_i32, %c0_i32_0 : i32, i32
  }
  func.func @transform_7(%arg0: i32) -> (i32, i32) {
    %c0_i32 = arith.constant 0 : i32
    %c0_i32_0 = arith.constant 0 : i32
    %c0_i32_1 = arith.constant 0 : i32
    return %c0_i32, %c0_i32_0 : i32, i32
  }
  func.func @transform_8(%arg0: i32) -> (i32, i32) {
    %c0_i32 = arith.constant 0 : i32
    %c0_i32_0 = arith.constant 0 : i32
    %c0_i32_1 = arith.constant 0 : i32
    return %c0_i32, %c0_i32_0 : i32, i32
  }
  func.func @transform_9(%arg0: i32) -> (i32, i32) {
    %c0_i32 = arith.constant 0 : i32
    %c0_i32_0 = arith.constant 0 : i32
    %c0_i32_1 = arith.constant 0 : i32
    return %c0_i32, %c0_i32_0 : i32, i32
  }
  func.func @transform_10(%arg0: i32) -> (i32, i32) {
    %c0_i32 = arith.constant 0 : i32
    %c0_i32_0 = arith.constant 0 : i32
    return %arg0, %c0_i32 : i32, i32
  }
}

</mosaic_0001>

<bundles_post_ra>
// kernel: denoising_autoencoder_fwd.1
= control target key start
LH: loop header
LB: loop body
LE: loop exit
PB: predicated region body
PF: predicated region fallthrough
CT: control target
= control target key end

     0   :  { %vm1699_vm0 = vcmask 130048   ;;  %vm2711_vm1 = vcmask 261120   ;;  %s10630_s2 = inlined_call_operand.vmem [shape: bf16[784,128], index: 2, kind: input, shape index: {}]   ;;  %s10631_s0 = inlined_call_operand.vmem [shape: bf16[256,784], index: 0, kind: input, shape index: {}]   ;;  %s10632_s1 = inlined_call_operand.vmem [shape: bf16[256,784], index: 1, kind: input, shape index: {}]   ;;  %s10633_s4 = inlined_call_operand.vmem [shape: bf16[128,32], index: 4, kind: input, shape index: {}]   ;;  %s10634_s3 = inlined_call_operand.vmem [shape: f32[1,128], index: 3, kind: input, shape index: {}]   ;;  %s10635_s6 = inlined_call_operand.vmem [shape: bf16[32,128], index: 6, kind: input, shape index: {}]   ;;  %s10636_s8 = inlined_call_operand.vmem [shape: bf16[128,784], index: 8, kind: input, shape index: {}]   ;;  %s10637_s5 = inlined_call_operand.vmem [shape: f32[1,32], index: 5, kind: input, shape index: {}]   ;;  %s10638_s7 = inlined_call_operand.vmem [shape: f32[1,128], index: 7, kind: input, shape index: {}]   ;;  %s10639_s9 = inlined_call_operand.vmem [shape: f32[1,784], index: 9, kind: input, shape index: {}]   ;;  %s10640_s10 = inlined_call_operand.vmem [shape: f32[256,784], index: 10, kind: output, shape index: {}]  }
   0x1   :  { %v6630_v0 = vld [vmem:[%s10630_s2 + $0x78] sm:$0xff]   ;;  %v6634_v4 = vld [vmem:[%s10630_s2 + $0x70] sm:$0xff]   ;;  %v6638_v8 = vld [vmem:[%s10630_s2 + $0x68] sm:$0xff]  }
   0x2   :  { %v6631_v1 = vld [vmem:[%s10630_s2 + $0x38] sm:$0xff]   ;;  %6044 = vmatprep.subr.bf16.mxu0 %v6630_v0  ;;  %v6635_v5 = vld [vmem:[%s10630_s2 + $0x30] sm:$0xff]   ;;  %v6639_v9 = vld [vmem:[%s10630_s2 + $0x28] sm:$0xff]  }
   0x3   :  { %v6632_v2 = vld [vmem:[%s10630_s2 + $0xf8] sm:$0xff]   ;;  %6045 = vmatpush3.bf16.msra.mxu0 %v6631_v1  ;;  %v6636_v6 = vld [vmem:[%s10630_s2 + $0xf0] sm:$0xff]   ;;  %v6640_v10 = vld [vmem:[%s10630_s2 + $0xe8] sm:$0xff]  }
   0x4   :  { %v6633_v3 = vld [vmem:[%s10630_s2 + $0xb8] sm:$0xff]   ;;  %6156 = vmatprep.subr.bf16.mxu1 %v6632_v2  ;;  %6046 = vmatprep.subr.bf16.mxu0 %v6634_v4  ;;  %v6637_v7 = vld [vmem:[%s10630_s2 + $0xb0] sm:$0xff]   ;;  %v6641_v11 = vld [vmem:[%s10630_s2 + $0xa8] sm:$0xff]  }
   0x5   :  { %6157 = vmatpush3.bf16.msra.mxu1 %v6633_v3  ;;  %v6642_v12 = vld [vmem:[%s10630_s2 + $0x60] sm:$0xff]   ;;  %v6646_v16 = vld [vmem:[%s10630_s2 + $0x58] sm:$0xff]   ;;  %v6650_v20 = vld [vmem:[%s10630_s2 + $0x50] sm:$0xff]  }
   0x6   :  { %6158 = vmatprep.subr.bf16.mxu1 %v6636_v6  ;;  %v6643_v13 = vld [vmem:[%s10630_s2 + $0x20] sm:$0xff]   ;;  %v6647_v17 = vld [vmem:[%s10630_s2 + $0x18] sm:$0xff]   ;;  %v6651_v21 = vld [vmem:[%s10630_s2 + $0x10] sm:$0xff]  }
   0x7   :  { %6047 = vmatpush3.bf16.msra.mxu0 %v6635_v5  ;;  %v6644_v14 = vld [vmem:[%s10630_s2 + $0xe0] sm:$0xff]   ;;  %v6648_v18 = vld [vmem:[%s10630_s2 + $0xd8] sm:$0xff]   ;;  %v6652_v22 = vld [vmem:[%s10630_s2 + $0xd0] sm:$0xff]  }
   0x8   :  { %6048 = vmatprep.subr.bf16.mxu0 %v6638_v8  ;;  %v6645_v15 = vld [vmem:[%s10630_s2 + $0xa0] sm:$0xff]   ;;  %v6649_v19 = vld [vmem:[%s10630_s2 + $0x98] sm:$0xff]   ;;  %v6653_v23 = vld [vmem:[%s10630_s2 + $0x90] sm:$0xff]  }
   0x9   :  { %6159 = vmatpush3.bf16.msra.mxu1 %v6637_v7  ;;  %v6654_v24 = vld [vmem:[%s10630_s2 + $0x48] sm:$0xff]   ;;  %v6658_v28 = vld [vmem:[%s10630_s2 + $0x40] sm:$0xff]   ;;  %v6662_v44 = vld [vmem:[%s10630_s2 + $0x178] sm:$0xff]  }
   0xa   :  { %6160 = vmatprep.subr.bf16.mxu1 %v6640_v10  ;;  %v6655_v25 = vld [vmem:[%s10630_s2 + $0x8] sm:$0xff]   ;;  %v6659_v29 = vld [vmem:[%s10630_s2] sm:$0xff]   ;;  %v44_v61 = vld [vmem:[%s10631_s0 + $0x38] sm:$0xff] }
   0xb   :  { %6049 = vmatpush3.bf16.msra.mxu0 %v6639_v9  ;;  %v6656_v26 = vld [vmem:[%s10630_s2 + $0xc8] sm:$0xff]   ;;  %v6660_v30 = vld [vmem:[%s10630_s2 + $0xc0] sm:$0xff]   ;;  %v48_v62 = vld [vmem:[%s10631_s0 + $0x54] sm:$0xff]  ;;  %v179_v8 = vunpack.c.h.bf16 %v44_v61 }
   0xc   :  { %6050 = vmatprep.subr.bf16.mxu0 %v6642_v12  ;;  %v6657_v27 = vld [vmem:[%s10630_s2 + $0x88] sm:$0xff]   ;;  %v36_v31 = vld [vmem:[%s10631_s0] sm:$0xff]  ;;  %v396_v3 = vld [vmem:[%s10632_s1 + $0x38] sm:$0xff]  ;;  %v186_v9 = vunpack.c.h.bf16 %v48_v62 }
   0xd   :  { %6161 = vmatpush3.bf16.msra.mxu1 %v6641_v11  ;;  %v40_v32 = vld [vmem:[%s10631_s0 + $0x1c] sm:$0xff]  ;;  %v164_v34 = vunpack.c.l.bf16 %v36_v31  ;;  %v165_v35 = vunpack.c.h.bf16 %v36_v31  ;;  %v37_v45 = vld [vmem:[%s10631_s0 + $0x8] sm:$0xff]  ;;  %v400_v4 = vld [vmem:[%s10632_s1 + $0x54] sm:$0xff] }
   0xe   :  { %6162 = vmatprep.subr.bf16.mxu1 %v6644_v14  ;;  %v388_v33 = vld [vmem:[%s10632_s1] sm:$0xff]  ;;  %v171_v36 = vunpack.c.l.bf16 %v40_v32  ;;  %v172_v37 = vunpack.c.h.bf16 %v40_v32  ;;  %v389_v51 = vld [vmem:[%s10632_s1 + $0x8] sm:$0xff]  ;;  %v166_v53 = vunpack.c.l.bf16 %v37_v45  ;;  %v167_v54 = vunpack.c.h.bf16 %v37_v45  ;;  %v6663_v7 = vld [vmem:[%s10630_s2 + $0x138] sm:$0xff]  }
   0xf   :  { %6051 = vmatpush3.bf16.msra.mxu0 %v6643_v13  ;;  %v392_v38 = vld [vmem:[%s10632_s1 + $0x1c] sm:$0xff]  ;;  %v516_v39 = vunpack.c.l.bf16 %v388_v33  ;;  %v517_v40 = vunpack.c.h.bf16 %v388_v33  ;;  %v41_v46 = vld [vmem:[%s10631_s0 + $0x24] sm:$0xff]  ;;  %v518_v63 = vunpack.c.l.bf16 %v389_v51  ;;  %v519_v0 = vunpack.c.h.bf16 %v389_v51  ;;  %v6665_v31 = vld [vmem:[%s10630_s2 + $0x170] sm:$0xff]  }
  0x10   :  { %6052 = vmatprep.subr.bf16.mxu0 %v6646_v16  ;;  %v523_v41 = vunpack.c.l.bf16 %v392_v38  ;;  %v524_v42 = vunpack.c.h.bf16 %v392_v38  ;;  %v6661_v43 = vld [vmem:[%s10630_s2 + $0x80] sm:$0xff]   ;;  %v173_v55 = vunpack.c.l.bf16 %v41_v46  ;;  %v174_v56 = vunpack.c.h.bf16 %v41_v46  ;;  %v7891_v45 = vld [vmem:[%s10631_s0 + $0x8c] sm:$0xff] }
  0x11   :  { %6163 = vmatpush3.bf16.msra.mxu1 %v6645_v15  ;;  %v740_v47 = vmul.f32 0.5, %v516_v39  ;;  %v741_v48 = vmul.f32 0.5, %v517_v40  ;;  %v393_v52 = vld [vmem:[%s10632_s1 + $0x24] sm:$0xff]  ;;  %v742_v10 = vmul.f32 0.5, %v518_v63  ;;  %v743_v11 = vmul.f32 0.5, %v519_v0  ;;  %v404_v46 = vld [vmem:[%s10632_s1 + $0x70] sm:$0xff] }
  0x12   :  { %6164 = vmatprep.subr.bf16.mxu1 %v6648_v18  ;;  %v747_v49 = vmul.f32 0.5, %v523_v41  ;;  %v748_v50 = vmul.f32 0.5, %v524_v42  ;;  %v525_v1 = vunpack.c.l.bf16 %v393_v52  ;;  %v526_v2 = vunpack.c.h.bf16 %v393_v52  ;;  %v45_v18 = vld [vmem:[%s10631_s0 + $0x40] sm:$0xff]  ;;  %v408_v52 = vld [vmem:[%s10632_s1 + $0x8c] sm:$0xff] }
  0x13   :  { %6053 = vmatpush3.bf16.msra.mxu0 %v6647_v17  ;;  %v965_v57 = vadd.f32 %v741_v48, %v165_v35  ;;  %v964_v59 = vadd.f32 %v740_v47, %v164_v34  ;;  %v531_v14 = vunpack.c.h.bf16 %v396_v3  ;;  %v538_v15 = vunpack.c.h.bf16 %v400_v4  ;;  %v6666_v47 = vld [vmem:[%s10630_s2 + $0x130] sm:$0xff]  }
  0x14   :  { %6054 = vmatprep.subr.bf16.mxu0 %v6650_v20  ;;  %v972_v58 = vadd.f32 %v748_v50, %v172_v37  ;;  %v971_v60 = vadd.f32 %v747_v49, %v171_v36  ;;  %v749_v12 = vmul.f32 0.5, %v525_v1  ;;  %v750_v13 = vmul.f32 0.5, %v526_v2  ;;  %v6664_v20 = vld [vmem:[%s10630_s2 + $0x180] sm:$0xff]   ;;  %v7885_v36 = vld [vmem:[%s10631_s0 + $0x70] sm:$0xff] }
  0x15   :  { %6165 = vmatpush3.bf16.msra.mxu1 %v6649_v19  ;;  %v178_v16 = vunpack.c.l.bf16 %v44_v61  ;;  %v185_v17 = vunpack.c.l.bf16 %v48_v62  ;;  %v7867_v19 = vld [vmem:[%s10631_s0 + $0x5c] sm:$0xff]  ;;  %v181_v34 = vunpack.c.h.bf16 %v45_v18  ;;  %v552_v1 = vunpack.c.h.bf16 %v408_v52  ;;  %v7910_v2 = vld [vmem:[%s10631_s0 + $0x94] sm:$0xff] }
  0x16   :  { %6166 = vmatprep.subr.bf16.mxu1 %v6652_v22  ;;  %v1189_v5 = vpack.c.bf16 %v972_v58, %v965_v57  ;;  %v1188_v6 = vpack.c.bf16 %v971_v60, %v964_v59  ;;  %v974_v22 = vadd.f32 %v750_v13, %v174_v56  ;;  %v188_v35 = vunpack.c.h.bf16 %v7867_v19  ;;  %v53_v61 = vld [vmem:[%s10631_s0 + $0x78] sm:$0xff] }
  0x17   :  { %6055 = vmatpush3.bf16.msra.mxu0 %v6651_v21  ;;  %v967_v21 = vadd.f32 %v743_v11, %v167_v54  ;;  %v193_v56 = vunpack.c.h.bf16 %v7885_v36  ;;  %v200_v59 = vunpack.c.h.bf16 %v7891_v45  ;;  %v545_v60 = vunpack.c.h.bf16 %v404_v46  ;;  %v409_v13 = vld [vmem:[%s10632_s1 + $0x94] sm:$0xff] }
  0x18   :  { %6056 = vmatprep.subr.bf16.mxu0 %v6654_v24  ;;  %1780 = vmatprep.mubr.bf16.mxu0 %v1189_v5  ;;  %v973_v24 = vadd.f32 %v749_v12, %v173_v55  ;;  %v192_v5 = vunpack.c.l.bf16 %v7885_v36  ;;  %v776_v11 = vmul.f32 0.5, %v552_v1  ;;  %v544_v12 = vunpack.c.l.bf16 %v404_v46 }
  0x19   :  { %6167 = vmatpush3.bf16.msra.mxu1 %v6653_v23  ;;  %v966_v23 = vadd.f32 %v742_v10, %v166_v53  ;;  %v1191_v32 = vpack.c.bf16 %v974_v22, %v967_v21 }
  0x1a   :  { %6168 = vmatprep.subr.bf16.mxu1 %v6656_v26  ;;  %v755_v26 = vmul.f32 0.5, %v531_v14  ;;  %v768_v21 = vmul.f32 0.5, %v544_v12  ;;  %v424_v12 = vld [vmem:[%s10632_s1 + $0xfc] sm:$0xff] }
  0x1b   :  { %6057 = vmatpush3.bf16.msra.mxu0 %v6655_v25  ;;  %v397_v25 = vld [vmem:[%s10632_s1 + $0x40] sm:$0xff]  ;;  %v1190_v33 = vpack.c.bf16 %v973_v24, %v966_v23  ;;  %1941 = vmatprep.mubr.bf16.mxu1 %v1191_v32  ;;  %v7930_v23 = vld [vmem:[%s10631_s0 + $0xa8] sm:$0xff] }
  0x1c   :  { %6058 = vmatprep.subr.bf16.mxu0 %v6658_v28  ;;  %v530_v28 = vunpack.c.l.bf16 %v396_v3  ;;  %v979_v37 = vadd.f32 %v755_v26, %v179_v8  ;;  %v533_v41 = vunpack.c.h.bf16 %v397_v25  ;;  %v532_v51 = vunpack.c.l.bf16 %v397_v25  ;;  %v6667_v8 = vld [vmem:[%s10630_s2 + $0x168] sm:$0xff]  }
  0x1d   :  { %6169 = vmatpush3.bf16.msra.mxu1 %v6657_v27  ;;  %v762_v27 = vmul.f32 0.5, %v538_v15  ;;  %v551_v15 = vunpack.c.l.bf16 %v408_v52  ;;  %v554_v25 = vunpack.c.h.bf16 %v409_v13  ;;  %v194_v26 = vunpack.c.l.bf16 %v53_v61 }
  0x1e   :  { %6170 = vmatprep.subr.bf16.mxu1 %v6660_v30  ;;  %v401_v30 = vld [vmem:[%s10632_s1 + $0x5c] sm:$0xff]  ;;  %v754_v39 = vmul.f32 0.5, %v530_v28  ;;  %v757_v53 = vmul.f32 0.5, %v533_v41  ;;  %v756_v58 = vmul.f32 0.5, %v532_v51  ;;  %v7936_v28 = vld [vmem:[%s10631_s0 + $0xc4] sm:$0xff] }
  0x1f   :  { %6059 = vmatpush3.bf16.msra.mxu0 %v6659_v29  ;;  %v537_v29 = vunpack.c.l.bf16 %v400_v4  ;;  %v986_v38 = vadd.f32 %v762_v27, %v186_v9  ;;  %v540_v42 = vunpack.c.h.bf16 %v401_v30  ;;  %v539_v55 = vunpack.c.l.bf16 %v401_v30 }
  0x20   :  { %6268 = vmatprep.subr.bf16.mxu0 %v6662_v44  ;;  %v187_v44 = vunpack.c.l.bf16 %v7867_v19  ;;  %v978_v49 = vadd.f32 %v754_v39, %v178_v16  ;;  %v981_v62 = vadd.f32 %v757_v53, %v181_v34  ;;  %v769_v4 = vmul.f32 0.5, %v545_v60  ;;  %v416_v34 = vld [vmem:[%s10632_s1 + $0xc4] sm:$0xff]  ;;  %v417_v60 = vld [vmem:[%s10632_s1 + $0xcc] sm:$0xff] }
  0x21   :  { %6171 = vmatpush3.bf16.msra.mxu1 %v6661_v43  ;;  %v761_v40 = vmul.f32 0.5, %v537_v29  ;;  %v180_v43 = vunpack.c.l.bf16 %v45_v18  ;;  %v1196_v48 = vpack.c.bf16 %v986_v38, %v979_v37  ;;  %v764_v54 = vmul.f32 0.5, %v540_v42  ;;  %v6668_v18 = vld [vmem:[%s10630_s2 + $0x128] sm:$0xff]  }
  0x22   :  { %1781 = vmatmul.mubr.bf16.vlgmr.msra.gmra.mxu0 %v1188_v6  ;;  %6463 = vmatprep.subr.bf16.mxu1 %v6664_v20  ;;  %v763_v0 = vmul.f32 0.5, %v539_v55  ;;  %v199_v6 = vunpack.c.l.bf16 %v7891_v45  ;;  %v993_v14 = vadd.f32 %v769_v4, %v193_v56  ;;  %v195_v16 = vunpack.c.h.bf16 %v53_v61  ;;  %v412_v29 = vld [vmem:[%s10632_s1 + $0xa8] sm:$0xff]  ;;  %v6670_v55 = vld [vmem:[%s10630_s2 + $0x120] sm:$0xff]  }
  0x23   :  { %6269 = vmatpush3.bf16.msra.mxu0 %v6663_v7  ;;  %v985_v50 = vadd.f32 %v761_v40, %v185_v17  ;;  %1788 = vmatprep.mubr.bf16.mxu0 %v1196_v48  ;;  %v988_v63 = vadd.f32 %v764_v54, %v188_v35  ;;  %v980_v3 = vadd.f32 %v756_v58, %v180_v43  ;;  %v405_v7 = vld [vmem:[%s10632_s1 + $0x78] sm:$0xff]  ;;  %v202_v17 = vunpack.c.h.bf16 %v7910_v2  ;;  %v6669_v43 = vld [vmem:[%s10630_s2 + $0x160] sm:$0xff]   ;;  %v61_v48 = vld [vmem:[%s10631_s0 + $0xb0] sm:$0xff] }
  0x24   :  { %6270 = vmatprep.subr.bf16.mxu0 %v6665_v31  ;;  %1942 = vmatmul.mubr.bf16.vlgmr.msra.gmra.mxu1 %v1190_v33  ;;  %v987_v10 = vadd.f32 %v763_v0, %v187_v44  ;;  %v547_v22 = vunpack.c.h.bf16 %v405_v7  ;;  %v775_v24 = vmul.f32 0.5, %v551_v15  ;;  %v201_v27 = vunpack.c.l.bf16 %v7910_v2 }
  0x25   :  { %6464 = vmatpush3.bf16.msra.mxu1 %v6664_v20  ;;  %v1195_v57 = vpack.c.bf16 %v985_v50, %v978_v49  ;;  %v1198_v9 = vpack.c.bf16 %v988_v63, %v981_v62  ;;  %v1000_v20 = vadd.f32 %v776_v11, %v200_v59  ;;  %v992_v31 = vadd.f32 %v768_v21, %v192_v5  ;;  %v7955_v49 = vld [vmem:[%s10631_s0 + $0xcc] sm:$0xff]  ;;  %v7972_v5 = vld [vmem:[%s10631_s0 + $0xe0] sm:$0xff] }
  0x26   :  { %v1197_v19 = vpack.c.bf16 %v987_v10, %v980_v3  ;;  %v771_v32 = vmul.f32 0.5, %v547_v22  ;;  %v546_v33 = vunpack.c.l.bf16 %v405_v7  ;;  %v999_v35 = vadd.f32 %v775_v24, %v199_v6  ;;  %v413_v50 = vld [vmem:[%s10632_s1 + $0xb0] sm:$0xff]  ;;  %v72_v10 = vld [vmem:[%s10631_s0 + $0xfc] sm:$0xff] }
  0x27   :  { %6271 = vmatpush3.bf16.msra.mxu0 %v6666_v47  ;;  %1949 = vmatprep.mubr.bf16.mxu1 %v1198_v9  ;;  %v1203_v30 = vpack.c.bf16 %v1000_v20, %v993_v14  ;;  %v778_v36 = vmul.f32 0.5, %v554_v25  ;;  %v553_v37 = vunpack.c.l.bf16 %v409_v13  ;;  %v207_v38 = vunpack.c.h.bf16 %v7930_v23  ;;  %v420_v11 = vld [vmem:[%s10632_s1 + $0xe0] sm:$0xff] }
  0x28   :  { %6272 = vmatprep.subr.bf16.mxu0 %v6667_v8  ;;  %v995_v39 = vadd.f32 %v771_v32, %v195_v16  ;;  %v770_v40 = vmul.f32 0.5, %v546_v33  ;;  %v214_v41 = vunpack.c.h.bf16 %v7936_v28  ;;  %v559_v42 = vunpack.c.h.bf16 %v412_v29  ;;  %v6672_v32 = vld [vmem:[%s10630_s2 + $0x118] sm:$0xff]  }
  0x29   :  { %v1202_v44 = vpack.c.bf16 %v999_v35, %v992_v31  ;;  %v1002_v45 = vadd.f32 %v778_v36, %v202_v17  ;;  %v777_v46 = vmul.f32 0.5, %v553_v37  ;;  %v566_v47 = vunpack.c.h.bf16 %v416_v34  ;;  %v6671_v17 = vld [vmem:[%s10630_s2 + $0x158] sm:$0xff]   ;;  %v7994_v31 = vld [vmem:[%s10631_s0 + $0x104] sm:$0xff] }
  0x2a   :  { %1789 = vmatmul.mubr.bf16.gmra.mxu0 %v1195_v57  ;;  %v994_v51 = vadd.f32 %v770_v40, %v194_v26  ;;  %v783_v52 = vmul.f32 0.5, %v559_v42  ;;  %v206_v53 = vunpack.c.l.bf16 %v7930_v23  ;;  %v213_v54 = vunpack.c.l.bf16 %v7936_v28  ;;  %v421_v37 = vld [vmem:[%s10632_s1 + $0xe8] sm:$0xff] }
  0x2b   :  { %6273 = vmatpush3.bf16.msra.mxu0 %v6668_v18  ;;  %1796 = vmatprep.mubr.bf16.mxu0 %v1203_v30  ;;  %v1205_v56 = vpack.c.bf16 %v1002_v45, %v995_v39  ;;  %v1001_v57 = vadd.f32 %v777_v46, %v201_v27  ;;  %v790_v58 = vmul.f32 0.5, %v566_v47  ;;  %v558_v59 = vunpack.c.l.bf16 %v412_v29  ;;  %v69_v30 = vld [vmem:[%s10631_s0 + $0xe8] sm:$0xff] }
  0x2c   :  { %1950 = vmatmul.mubr.bf16.gmra.mxu1 %v1197_v19  ;;  %6274 = vmatprep.subr.bf16.mxu0 %v6669_v43  ;;  %v1007_v61 = vadd.f32 %v783_v52, %v207_v38  ;;  %v565_v62 = vunpack.c.l.bf16 %v416_v34  ;;  %v209_v63 = vunpack.c.h.bf16 %v61_v48  ;;  %v216_v0 = vunpack.c.h.bf16 %v7955_v49  ;;  %v425_v42 = vld [vmem:[%s10632_s1 + $0x104] sm:$0xff] }
  0x2d   :  { %1957 = vmatprep.mubr.bf16.mxu1 %v1205_v56  ;;  %v1204_v1 = vpack.c.bf16 %v1001_v57, %v994_v51  ;;  %v1014_v2 = vadd.f32 %v790_v58, %v214_v41  ;;  %v782_v3 = vmul.f32 0.5, %v558_v59  ;;  %v561_v4 = vunpack.c.h.bf16 %v413_v50  ;;  %v8010_v51 = vld [vmem:[%s10631_s0 + $0x118] sm:$0xff]  ;;  %v6673_v58 = vld [vmem:[%s10630_s2 + $0x150] sm:$0xff]  }
  0x2e   :  { %v789_v6 = vmul.f32 0.5, %v565_v62  ;;  %v568_v7 = vunpack.c.h.bf16 %v417_v60  ;;  %v208_v8 = vunpack.c.l.bf16 %v61_v48  ;;  %v215_v9 = vunpack.c.l.bf16 %v7955_v49  ;;  %v8016_v56 = vld [vmem:[%s10631_s0 + $0x134] sm:$0xff] }
  0x2f   :  { %6275 = vmatpush3.bf16.msra.mxu0 %v6670_v55  ;;  %v1210_v13 = vpack.c.bf16 %v1014_v2, %v1007_v61  ;;  %v1006_v14 = vadd.f32 %v782_v3, %v206_v53  ;;  %v785_v15 = vmul.f32 0.5, %v561_v4  ;;  %v560_v16 = vunpack.c.l.bf16 %v413_v50  ;;  %v428_v57 = vld [vmem:[%s10632_s1 + $0x118] sm:$0xff]  ;;  %v6674_v4 = vld [vmem:[%s10630_s2 + $0x110] sm:$0xff]  }
  0x30   :  { %v1013_v18 = vadd.f32 %v789_v6, %v213_v54  ;;  %v792_v19 = vmul.f32 0.5, %v568_v7  ;;  %v567_v20 = vunpack.c.l.bf16 %v417_v60  ;;  %v221_v21 = vunpack.c.h.bf16 %v7972_v5  ;;  %6276 = vmatprep.subr.bf16.mxu0 %v6671_v17 }
  0x31   :  { %v1009_v22 = vadd.f32 %v785_v15, %v209_v63  ;;  %v784_v23 = vmul.f32 0.5, %v560_v16  ;;  %v228_v24 = vunpack.c.h.bf16 %v72_v10  ;;  %v573_v25 = vunpack.c.h.bf16 %v420_v11  ;;  %v432_v63 = vld [vmem:[%s10632_s1 + $0x134] sm:$0xff] }
  0x32   :  { %1797 = vmatmul.mubr.bf16.gmra.mxu0 %v1202_v44  ;;  %v1209_v26 = vpack.c.bf16 %v1013_v18, %v1006_v14  ;;  %v1016_v27 = vadd.f32 %v792_v19, %v216_v0  ;;  %v791_v28 = vmul.f32 0.5, %v567_v20  ;;  %v580_v29 = vunpack.c.h.bf16 %v424_v12  ;;  %v8038_v14 = vld [vmem:[%s10631_s0 + $0x13c] sm:$0xff] }
  0x33   :  { %1804 = vmatprep.mubr.bf16.mxu0 %v1210_v13  ;;  %v1008_v33 = vadd.f32 %v784_v23, %v208_v8  ;;  %v797_v34 = vmul.f32 0.5, %v573_v25  ;;  %v220_v35 = vunpack.c.l.bf16 %v7972_v5  ;;  %v227_v36 = vunpack.c.l.bf16 %v72_v10  ;;  %6277 = vmatpush3.bf16.msra.mxu0 %v6672_v32  ;;  %v77_v13 = vld [vmem:[%s10631_s0 + $0x120] sm:$0xff] }
  0x34   :  { %1958 = vmatmul.mubr.bf16.gmra.mxu1 %v1204_v1  ;;  %v1212_v38 = vpack.c.bf16 %v1016_v27, %v1009_v22  ;;  %v1015_v39 = vadd.f32 %v791_v28, %v215_v9  ;;  %v804_v40 = vmul.f32 0.5, %v580_v29  ;;  %v572_v41 = vunpack.c.l.bf16 %v420_v11  ;;  %6278 = vmatprep.subr.bf16.mxu0 %v6673_v58  ;;  %v429_v19 = vld [vmem:[%s10632_s1 + $0x120] sm:$0xff]  ;;  %v6675_v29 = vld [vmem:[%s10630_s2 + $0x148] sm:$0xff]  }
  0x35   :  { %v1021_v43 = vadd.f32 %v797_v34, %v221_v21  ;;  %v579_v44 = vunpack.c.l.bf16 %v424_v12  ;;  %v223_v45 = vunpack.c.h.bf16 %v69_v30  ;;  %v230_v46 = vunpack.c.h.bf16 %v7994_v31  ;;  %v8055_v34 = vld [vmem:[%s10631_s0 + $0x150] sm:$0xff] }
  0x36   :  { %1965 = vmatprep.mubr.bf16.mxu1 %v1212_v38  ;;  %v1211_v47 = vpack.c.bf16 %v1015_v39, %v1008_v33  ;;  %v1028_v48 = vadd.f32 %v804_v40, %v228_v24  ;;  %v796_v49 = vmul.f32 0.5, %v572_v41  ;;  %v575_v50 = vunpack.c.h.bf16 %v421_v37  ;;  %v433_v24 = vld [vmem:[%s10632_s1 + $0x13c] sm:$0xff]  ;;  %v6676_v41 = vld [vmem:[%s10630_s2 + $0x108] sm:$0xff]  }
  0x37   :  { %v803_v52 = vmul.f32 0.5, %v579_v44  ;;  %v582_v53 = vunpack.c.h.bf16 %v425_v42  ;;  %v222_v54 = vunpack.c.l.bf16 %v69_v30  ;;  %v229_v55 = vunpack.c.l.bf16 %v7994_v31  ;;  %6279 = vmatpush3.bf16.msra.mxu0 %v6674_v4 }
  0x38   :  { %v1217_v59 = vpack.c.bf16 %v1028_v48, %v1021_v43  ;;  %v1020_v60 = vadd.f32 %v796_v49, %v220_v35  ;;  %v799_v61 = vmul.f32 0.5, %v575_v50  ;;  %v574_v62 = vunpack.c.l.bf16 %v421_v37  ;;  %v8060_v35 = vld [vmem:[%s10631_s0 + $0x16c] sm:$0xff]  ;;  %6280 = vmatprep.subr.bf16.mxu0 %v6675_v29 }
  0x39   :  { %v1027_v0 = vadd.f32 %v803_v52, %v227_v36  ;;  %v806_v1 = vmul.f32 0.5, %v582_v53  ;;  %v581_v2 = vunpack.c.l.bf16 %v425_v42  ;;  %v235_v3 = vunpack.c.h.bf16 %v8010_v51  ;;  %v436_v36 = vld [vmem:[%s10632_s1 + $0x150] sm:$0xff] }
  0x3a   :  { %1805 = vmatmul.mubr.bf16.gmra.mxu0 %v1209_v26  ;;  %v1023_v5 = vadd.f32 %v799_v61, %v223_v45  ;;  %v798_v6 = vmul.f32 0.5, %v574_v62  ;;  %v242_v7 = vunpack.c.h.bf16 %v8016_v56  ;;  %v587_v8 = vunpack.c.h.bf16 %v428_v57  ;;  %v437_v61 = vld [vmem:[%s10632_s1 + $0x158] sm:$0xff] }
  0x3b   :  { %1812 = vmatprep.mubr.bf16.mxu0 %v1217_v59  ;;  %v1216_v9 = vpack.c.bf16 %v1027_v0, %v1020_v60  ;;  %v1030_v10 = vadd.f32 %v806_v1, %v230_v46  ;;  %v805_v11 = vmul.f32 0.5, %v581_v2  ;;  %v594_v12 = vunpack.c.h.bf16 %v432_v63  ;;  %v440_v46 = vld [vmem:[%s10632_s1 + $0x16c] sm:$0xff]  ;;  %6281 = vmatpush3.bf16.msra.mxu0 %v6676_v41  ;;  %v85_v59 = vld [vmem:[%s10631_s0 + $0x158] sm:$0xff]  ;;  %v6677_v2 = vld [vmem:[%s10630_s2 + $0x140] sm:$0xff]  }
  0x3c   :  { %1966 = vmatmul.mubr.bf16.gmra.mxu1 %v1211_v47  ;;  %v1022_v15 = vadd.f32 %v798_v6, %v222_v54  ;;  %v811_v16 = vmul.f32 0.5, %v587_v8  ;;  %v234_v17 = vunpack.c.l.bf16 %v8010_v51  ;;  %v241_v18 = vunpack.c.l.bf16 %v8016_v56  ;;  %v89_v60 = vld [vmem:[%s10631_s0 + $0x174] sm:$0xff]  ;;  %6282 = vmatprep.subr.bf16.mxu0 %v6677_v2  ;;  %v104_v2 = vld [vmem:[%s10631_s0 + $0x1dc] sm:$0xff] }
  0x3d   :  { %v1219_v20 = vpack.c.bf16 %v1030_v10, %v1023_v5  ;;  %v1029_v21 = vadd.f32 %v805_v11, %v229_v55  ;;  %v818_v22 = vmul.f32 0.5, %v594_v12  ;;  %v586_v23 = vunpack.c.l.bf16 %v428_v57  ;;  %v93_v41 = vld [vmem:[%s10631_s0 + $0x190] sm:$0xff] }
  0x3e   :  { %v1035_v25 = vadd.f32 %v811_v16, %v235_v3  ;;  %v593_v26 = vunpack.c.l.bf16 %v432_v63  ;;  %v237_v27 = vunpack.c.h.bf16 %v77_v13  ;;  %v244_v28 = vunpack.c.h.bf16 %v8038_v14  ;;  %v92_v16 = vld [vmem:[%s10631_s0 + $0x188] sm:$0xff] }
  0x3f   :  { %1973 = vmatprep.mubr.bf16.mxu1 %v1219_v20  ;;  %v1218_v30 = vpack.c.bf16 %v1029_v21, %v1022_v15  ;;  %v1042_v31 = vadd.f32 %v818_v22, %v242_v7  ;;  %v810_v32 = vmul.f32 0.5, %v586_v23  ;;  %v589_v33 = vunpack.c.h.bf16 %v429_v19  ;;  %v441_v7 = vld [vmem:[%s10632_s1 + $0x174] sm:$0xff]  ;;  %v96_v22 = vld [vmem:[%s10631_s0 + $0x1a4] sm:$0xff] }
  0x40   :  { %v817_v37 = vmul.f32 0.5, %v593_v26  ;;  %v596_v38 = vunpack.c.h.bf16 %v433_v24  ;;  %v236_v39 = vunpack.c.l.bf16 %v77_v13  ;;  %v243_v40 = vunpack.c.l.bf16 %v8038_v14  ;;  %v444_v23 = vld [vmem:[%s10632_s1 + $0x188] sm:$0xff] }
  0x41   :  { %v1224_v42 = vpack.c.bf16 %v1042_v31, %v1035_v25  ;;  %v1034_v43 = vadd.f32 %v810_v32, %v234_v17  ;;  %v813_v44 = vmul.f32 0.5, %v589_v33  ;;  %v588_v45 = vunpack.c.l.bf16 %v429_v19  ;;  %v6678_v17 = vld [vmem:[%s10630_s2 + $0x100] sm:$0xff]  }
  0x42   :  { %1813 = vmatmul.mubr.bf16.gmra.mxu0 %v1216_v9  ;;  %v1041_v47 = vadd.f32 %v817_v37, %v241_v18  ;;  %v820_v48 = vmul.f32 0.5, %v596_v38  ;;  %v595_v49 = vunpack.c.l.bf16 %v433_v24  ;;  %v249_v50 = vunpack.c.h.bf16 %v8055_v34 }
  0x43   :  { %1820 = vmatprep.mubr.bf16.mxu0 %v1224_v42  ;;  %v1037_v51 = vadd.f32 %v813_v44, %v237_v27  ;;  %v812_v52 = vmul.f32 0.5, %v588_v45  ;;  %v256_v53 = vunpack.c.h.bf16 %v8060_v35  ;;  %v601_v54 = vunpack.c.h.bf16 %v436_v36  ;;  %6283 = vmatpush3.bf16.msra.mxu0 %v6678_v17  ;;  %v97_v42 = vld [vmem:[%s10631_s0 + $0x1ac] sm:$0xff] }
  0x44   :  { %1974 = vmatmul.mubr.bf16.gmra.mxu1 %v1218_v30  ;;  %v1223_v55 = vpack.c.bf16 %v1041_v47, %v1034_v43  ;;  %v1044_v56 = vadd.f32 %v820_v48, %v244_v28  ;;  %v819_v57 = vmul.f32 0.5, %v595_v49  ;;  %v608_v58 = vunpack.c.h.bf16 %v440_v46  ;;  %v448_v28 = vld [vmem:[%s10632_s1 + $0x1a4] sm:$0xff]  ;;  %v445_v47 = vld [vmem:[%s10632_s1 + $0x190] sm:$0xff] }
  0x45   :  { %v1036_v62 = vadd.f32 %v812_v52, %v236_v39  ;;  %v825_v63 = vmul.f32 0.5, %v601_v54  ;;  %v248_v0 = vunpack.c.l.bf16 %v8055_v34  ;;  %v255_v1 = vunpack.c.l.bf16 %v8060_v35  ;;  %v449_v52 = vld [vmem:[%s10632_s1 + $0x1ac] sm:$0xff] }
  0x46   :  { %v1226_v3 = vpack.c.bf16 %v1044_v56, %v1037_v51  ;;  %v1043_v4 = vadd.f32 %v819_v57, %v243_v40  ;;  %v832_v5 = vmul.f32 0.5, %v608_v58  ;;  %v600_v6 = vunpack.c.l.bf16 %v436_v36 }
  0x47   :  { %v1049_v8 = vadd.f32 %v825_v63, %v249_v50  ;;  %v607_v9 = vunpack.c.l.bf16 %v440_v46  ;;  %v251_v10 = vunpack.c.h.bf16 %v85_v59  ;;  %v258_v11 = vunpack.c.h.bf16 %v89_v60 }
  0x48   :  { %1981 = vmatprep.mubr.bf16.mxu1 %v1226_v3  ;;  %v1225_v12 = vpack.c.bf16 %v1043_v4, %v1036_v62  ;;  %v1056_v13 = vadd.f32 %v832_v5, %v256_v53  ;;  %v824_v14 = vmul.f32 0.5, %v600_v6  ;;  %v603_v15 = vunpack.c.h.bf16 %v437_v61  ;;  %v452_v3 = vld [vmem:[%s10632_s1 + $0x1c0] sm:$0xff] }
  0x49   :  { %v831_v18 = vmul.f32 0.5, %v607_v9  ;;  %v610_v19 = vunpack.c.h.bf16 %v441_v7  ;;  %v250_v20 = vunpack.c.l.bf16 %v85_v59  ;;  %v257_v21 = vunpack.c.l.bf16 %v89_v60 }
  0x4a   :  { %1821 = vmatmul.mubr.bf16.gmra.mxu0 %v1223_v55  ;;  %v1231_v24 = vpack.c.bf16 %v1056_v13, %v1049_v8  ;;  %v1048_v25 = vadd.f32 %v824_v14, %v248_v0  ;;  %v827_v26 = vmul.f32 0.5, %v603_v15  ;;  %v602_v27 = vunpack.c.l.bf16 %v437_v61  ;;  %v100_v61 = vld [vmem:[%s10631_s0 + $0x1c0] sm:$0xff] }
  0x4b   :  { %v1055_v29 = vadd.f32 %v831_v18, %v255_v1  ;;  %v834_v30 = vmul.f32 0.5, %v610_v19  ;;  %v609_v31 = vunpack.c.l.bf16 %v441_v7  ;;  %v263_v32 = vunpack.c.h.bf16 %v92_v16  ;;  %v456_v8 = vld [vmem:[%s10632_s1 + $0x1dc] sm:$0xff] }
  0x4c   :  { %1982 = vmatmul.mubr.bf16.gmra.mxu1 %v1225_v12  ;;  %1828 = vmatprep.mubr.bf16.mxu0 %v1231_v24  ;;  %v1051_v33 = vadd.f32 %v827_v26, %v251_v10  ;;  %v826_v34 = vmul.f32 0.5, %v602_v27  ;;  %v270_v35 = vunpack.c.h.bf16 %v96_v22  ;;  %v615_v36 = vunpack.c.h.bf16 %v444_v23  ;;  %v453_v27 = vld [vmem:[%s10632_s1 + $0x1c8] sm:$0xff] }
  0x4d   :  { %v1230_v37 = vpack.c.bf16 %v1055_v29, %v1048_v25  ;;  %v1058_v38 = vadd.f32 %v834_v30, %v258_v11  ;;  %v833_v39 = vmul.f32 0.5, %v609_v31  ;;  %v622_v40 = vunpack.c.h.bf16 %v448_v28 }
  0x4e   :  { %v1050_v43 = vadd.f32 %v826_v34, %v250_v20  ;;  %v839_v44 = vmul.f32 0.5, %v615_v36  ;;  %v262_v45 = vunpack.c.l.bf16 %v92_v16  ;;  %v269_v46 = vunpack.c.l.bf16 %v96_v22  ;;  %v105_v22 = vld [vmem:[%s10631_s0 + $0x1e4] sm:$0xff] }
  0x4f   :  { %v1233_v48 = vpack.c.bf16 %v1058_v38, %v1051_v33  ;;  %v1057_v49 = vadd.f32 %v833_v39, %v257_v21  ;;  %v846_v50 = vmul.f32 0.5, %v622_v40  ;;  %v614_v51 = vunpack.c.l.bf16 %v444_v23  ;;  %v101_v21 = vld [vmem:[%s10631_s0 + $0x1c8] sm:$0xff] }
  0x50   :  { %v1063_v53 = vadd.f32 %v839_v44, %v263_v32  ;;  %v621_v54 = vunpack.c.l.bf16 %v448_v28  ;;  %v265_v55 = vunpack.c.h.bf16 %v93_v41  ;;  %v272_v56 = vunpack.c.h.bf16 %v97_v42  ;;  %v457_v32 = vld [vmem:[%s10632_s1 + $0x1e4] sm:$0xff] }
  0x51   :  { %1989 = vmatprep.mubr.bf16.mxu1 %v1233_v48  ;;  %v1232_v57 = vpack.c.bf16 %v1057_v49, %v1050_v43  ;;  %v1070_v58 = vadd.f32 %v846_v50, %v270_v35  ;;  %v838_v59 = vmul.f32 0.5, %v614_v51  ;;  %v617_v60 = vunpack.c.h.bf16 %v445_v47 }
  0x52   :  { %1829 = vmatmul.mubr.bf16.gmra.mxu0 %v1230_v37  ;;  %v845_v62 = vmul.f32 0.5, %v621_v54  ;;  %v624_v63 = vunpack.c.h.bf16 %v449_v52  ;;  %v264_v0 = vunpack.c.l.bf16 %v93_v41  ;;  %v271_v1 = vunpack.c.l.bf16 %v97_v42  ;;  %v108_v41 = vld [vmem:[%s10631_s0 + $0x1f8] sm:$0xff] }
  0x53   :  { %v1238_v4 = vpack.c.bf16 %v1070_v58, %v1063_v53  ;;  %v1062_v5 = vadd.f32 %v838_v59, %v262_v45  ;;  %v841_v6 = vmul.f32 0.5, %v617_v60  ;;  %v616_v7 = vunpack.c.l.bf16 %v445_v47  ;;  %v460_v47 = vld [vmem:[%s10632_s1 + $0x1f8] sm:$0xff] }
  0x54   :  { %1990 = vmatmul.mubr.bf16.gmra.mxu1 %v1232_v57  ;;  %v1069_v9 = vadd.f32 %v845_v62, %v269_v46  ;;  %v848_v10 = vmul.f32 0.5, %v624_v63  ;;  %v623_v11 = vunpack.c.l.bf16 %v449_v52  ;;  %v277_v12 = vunpack.c.h.bf16 %v100_v61  ;;  %v112_v46 = vld [vmem:[%s10631_s0 + $0x214] sm:$0xff] }
  0x55   :  { %1836 = vmatprep.mubr.bf16.mxu0 %v1238_v4  ;;  %v1065_v13 = vadd.f32 %v841_v6, %v265_v55  ;;  %v840_v14 = vmul.f32 0.5, %v616_v7  ;;  %v284_v15 = vunpack.c.h.bf16 %v104_v2  ;;  %v629_v16 = vunpack.c.h.bf16 %v452_v3  ;;  %v464_v52 = vld [vmem:[%s10632_s1 + $0x214] sm:$0xff]  ;;  %v461_v7 = vld [vmem:[%s10632_s1 + $0x200] sm:$0xff] }
  0x56   :  { %v1237_v17 = vpack.c.bf16 %v1069_v9, %v1062_v5  ;;  %v1072_v18 = vadd.f32 %v848_v10, %v272_v56  ;;  %v847_v19 = vmul.f32 0.5, %v623_v11  ;;  %v636_v20 = vunpack.c.h.bf16 %v456_v8 }
  0x57   :  { %v1064_v23 = vadd.f32 %v840_v14, %v264_v0  ;;  %v853_v24 = vmul.f32 0.5, %v629_v16  ;;  %v276_v25 = vunpack.c.l.bf16 %v100_v61  ;;  %v283_v26 = vunpack.c.l.bf16 %v104_v2  ;;  %v113_v2 = vld [vmem:[%s10631_s0 + $0x21c] sm:$0xff] }
  0x58   :  { %v1240_v28 = vpack.c.bf16 %v1072_v18, %v1065_v13  ;;  %v1071_v29 = vadd.f32 %v847_v19, %v271_v1  ;;  %v860_v30 = vmul.f32 0.5, %v636_v20  ;;  %v628_v31 = vunpack.c.l.bf16 %v452_v3  ;;  %v109_v1 = vld [vmem:[%s10631_s0 + $0x200] sm:$0xff] }
  0x59   :  { %v1077_v33 = vadd.f32 %v853_v24, %v277_v12  ;;  %v635_v34 = vunpack.c.l.bf16 %v456_v8  ;;  %v279_v35 = vunpack.c.h.bf16 %v101_v21  ;;  %v286_v36 = vunpack.c.h.bf16 %v105_v22  ;;  %v465_v12 = vld [vmem:[%s10632_s1 + $0x21c] sm:$0xff] }
  0x5a   :  { %1837 = vmatmul.mubr.bf16.gmra.mxu0 %v1237_v17  ;;  %1997 = vmatprep.mubr.bf16.mxu1 %v1240_v28  ;;  %v1239_v37 = vpack.c.bf16 %v1071_v29, %v1064_v23  ;;  %v1084_v38 = vadd.f32 %v860_v30, %v284_v15  ;;  %v852_v39 = vmul.f32 0.5, %v628_v31  ;;  %v631_v40 = vunpack.c.h.bf16 %v453_v27 }
  0x5b   :  { %v859_v42 = vmul.f32 0.5, %v635_v34  ;;  %v638_v43 = vunpack.c.h.bf16 %v457_v32  ;;  %v278_v44 = vunpack.c.l.bf16 %v101_v21  ;;  %v285_v45 = vunpack.c.l.bf16 %v105_v22  ;;  %v116_v21 = vld [vmem:[%s10631_s0 + $0x230] sm:$0xff] }
  0x5c   :  { %1998 = vmatmul.mubr.bf16.gmra.mxu1 %v1239_v37  ;;  %v1245_v48 = vpack.c.bf16 %v1084_v38, %v1077_v33  ;;  %v1076_v49 = vadd.f32 %v852_v39, %v276_v25  ;;  %v855_v50 = vmul.f32 0.5, %v631_v40  ;;  %v630_v51 = vunpack.c.l.bf16 %v453_v27  ;;  %v468_v27 = vld [vmem:[%s10632_s1 + $0x230] sm:$0xff] }
  0x5d   :  { %v1083_v53 = vadd.f32 %v859_v42, %v283_v26  ;;  %v862_v54 = vmul.f32 0.5, %v638_v43  ;;  %v637_v55 = vunpack.c.l.bf16 %v457_v32  ;;  %v291_v56 = vunpack.c.h.bf16 %v108_v41  ;;  %v120_v26 = vld [vmem:[%s10631_s0 + $0x24c] sm:$0xff] }
  0x5e   :  { %1844 = vmatprep.mubr.bf16.mxu0 %v1245_v48  ;;  %v1079_v57 = vadd.f32 %v855_v50, %v279_v35  ;;  %v854_v58 = vmul.f32 0.5, %v630_v51  ;;  %v298_v59 = vunpack.c.h.bf16 %v112_v46  ;;  %v643_v60 = vunpack.c.h.bf16 %v460_v47  ;;  %v472_v32 = vld [vmem:[%s10632_s1 + $0x24c] sm:$0xff]  ;;  %v469_v51 = vld [vmem:[%s10632_s1 + $0x238] sm:$0xff] }
  0x5f   :  { %v1244_v61 = vpack.c.bf16 %v1083_v53, %v1076_v49  ;;  %v1086_v62 = vadd.f32 %v862_v54, %v286_v36  ;;  %v861_v63 = vmul.f32 0.5, %v637_v55  ;;  %v650_v0 = vunpack.c.h.bf16 %v464_v52 }
  0x60   :  { %v1078_v3 = vadd.f32 %v854_v58, %v278_v44  ;;  %v867_v4 = vmul.f32 0.5, %v643_v60  ;;  %v290_v5 = vunpack.c.l.bf16 %v108_v41  ;;  %v297_v6 = vunpack.c.l.bf16 %v112_v46  ;;  %v121_v46 = vld [vmem:[%s10631_s0 + $0x254] sm:$0xff] }
  0x61   :  { %v1247_v8 = vpack.c.bf16 %v1086_v62, %v1079_v57  ;;  %v1085_v9 = vadd.f32 %v861_v63, %v285_v45  ;;  %v874_v10 = vmul.f32 0.5, %v650_v0  ;;  %v642_v11 = vunpack.c.l.bf16 %v460_v47  ;;  %v117_v45 = vld [vmem:[%s10631_s0 + $0x238] sm:$0xff] }
  0x62   :  { %1845 = vmatmul.mubr.bf16.gmra.mxu0 %v1244_v61  ;;  %v1091_v13 = vadd.f32 %v867_v4, %v291_v56  ;;  %v649_v14 = vunpack.c.l.bf16 %v464_v52  ;;  %v293_v15 = vunpack.c.h.bf16 %v109_v1  ;;  %v300_v16 = vunpack.c.h.bf16 %v113_v2  ;;  %v473_v56 = vld [vmem:[%s10632_s1 + $0x254] sm:$0xff] }
  0x63   :  { %2005 = vmatprep.mubr.bf16.mxu1 %v1247_v8  ;;  %v1246_v17 = vpack.c.bf16 %v1085_v9, %v1078_v3  ;;  %v1098_v18 = vadd.f32 %v874_v10, %v298_v59  ;;  %v866_v19 = vmul.f32 0.5, %v642_v11  ;;  %v645_v20 = vunpack.c.h.bf16 %v461_v7 }
  0x64   :  { %v873_v22 = vmul.f32 0.5, %v649_v14  ;;  %v652_v23 = vunpack.c.h.bf16 %v465_v12  ;;  %v292_v24 = vunpack.c.l.bf16 %v109_v1  ;;  %v299_v25 = vunpack.c.l.bf16 %v113_v2  ;;  %v124_v1 = vld [vmem:[%s10631_s0 + $0x268] sm:$0xff] }
  0x65   :  { %2006 = vmatmul.mubr.bf16.gmra.mxu1 %v1246_v17  ;;  %v1252_v28 = vpack.c.bf16 %v1098_v18, %v1091_v13  ;;  %v1090_v29 = vadd.f32 %v866_v19, %v290_v5  ;;  %v869_v30 = vmul.f32 0.5, %v645_v20  ;;  %v644_v31 = vunpack.c.l.bf16 %v461_v7  ;;  %v476_v7 = vld [vmem:[%s10632_s1 + $0x268] sm:$0xff] }
  0x66   :  { %v1097_v33 = vadd.f32 %v873_v22, %v297_v6  ;;  %v876_v34 = vmul.f32 0.5, %v652_v23  ;;  %v651_v35 = vunpack.c.l.bf16 %v465_v12  ;;  %v305_v36 = vunpack.c.h.bf16 %v116_v21  ;;  %v128_v6 = vld [vmem:[%s10631_s0 + $0x284] sm:$0xff] }
  0x67   :  { %1852 = vmatprep.mubr.bf16.mxu0 %v1252_v28  ;;  %v1093_v37 = vadd.f32 %v869_v30, %v293_v15  ;;  %v868_v38 = vmul.f32 0.5, %v644_v31  ;;  %v312_v39 = vunpack.c.h.bf16 %v120_v26  ;;  %v657_v40 = vunpack.c.h.bf16 %v468_v27  ;;  %v480_v12 = vld [vmem:[%s10632_s1 + $0x284] sm:$0xff]  ;;  %v477_v31 = vld [vmem:[%s10632_s1 + $0x270] sm:$0xff] }
  0x68   :  { %v1251_v41 = vpack.c.bf16 %v1097_v33, %v1090_v29  ;;  %v1100_v42 = vadd.f32 %v876_v34, %v300_v16  ;;  %v875_v43 = vmul.f32 0.5, %v651_v35  ;;  %v664_v44 = vunpack.c.h.bf16 %v472_v32 }
  0x69   :  { %v1092_v47 = vadd.f32 %v868_v38, %v292_v24  ;;  %v881_v48 = vmul.f32 0.5, %v657_v40  ;;  %v304_v49 = vunpack.c.l.bf16 %v116_v21  ;;  %v311_v50 = vunpack.c.l.bf16 %v120_v26  ;;  %v129_v26 = vld [vmem:[%s10631_s0 + $0x28c] sm:$0xff] }
  0x6a   :  { %1853 = vmatmul.mubr.bf16.gmra.mxu0 %v1251_v41  ;;  %v1254_v52 = vpack.c.bf16 %v1100_v42, %v1093_v37  ;;  %v1099_v53 = vadd.f32 %v875_v43, %v299_v25  ;;  %v888_v54 = vmul.f32 0.5, %v664_v44  ;;  %v656_v55 = vunpack.c.l.bf16 %v468_v27  ;;  %v125_v25 = vld [vmem:[%s10631_s0 + $0x270] sm:$0xff] }
  0x6b   :  { %v1105_v57 = vadd.f32 %v881_v48, %v305_v36  ;;  %v663_v58 = vunpack.c.l.bf16 %v472_v32  ;;  %v307_v59 = vunpack.c.h.bf16 %v117_v45  ;;  %v314_v60 = vunpack.c.h.bf16 %v121_v46  ;;  %v481_v36 = vld [vmem:[%s10632_s1 + $0x28c] sm:$0xff] }
  0x6c   :  { %2013 = vmatprep.mubr.bf16.mxu1 %v1254_v52  ;;  %v1253_v61 = vpack.c.bf16 %v1099_v53, %v1092_v47  ;;  %v1112_v62 = vadd.f32 %v888_v54, %v312_v39  ;;  %v880_v63 = vmul.f32 0.5, %v656_v55  ;;  %v659_v0 = vunpack.c.h.bf16 %v469_v51 }
  0x6d   :  { %v887_v2 = vmul.f32 0.5, %v663_v58  ;;  %v666_v3 = vunpack.c.h.bf16 %v473_v56  ;;  %v306_v4 = vunpack.c.l.bf16 %v117_v45  ;;  %v313_v5 = vunpack.c.l.bf16 %v121_v46  ;;  %v132_v45 = vld [vmem:[%s10631_s0 + $0x2a0] sm:$0xff] }
  0x6e   :  { %2014 = vmatmul.mubr.bf16.gmra.mxu1 %v1253_v61  ;;  %v1259_v8 = vpack.c.bf16 %v1112_v62, %v1105_v57  ;;  %v1104_v9 = vadd.f32 %v880_v63, %v304_v49  ;;  %v883_v10 = vmul.f32 0.5, %v659_v0  ;;  %v658_v11 = vunpack.c.l.bf16 %v469_v51  ;;  %v484_v51 = vld [vmem:[%s10632_s1 + $0x2a0] sm:$0xff] }
  0x6f   :  { %v1111_v13 = vadd.f32 %v887_v2, %v311_v50  ;;  %v890_v14 = vmul.f32 0.5, %v666_v3  ;;  %v665_v15 = vunpack.c.l.bf16 %v473_v56  ;;  %v319_v16 = vunpack.c.h.bf16 %v124_v1  ;;  %v136_v50 = vld [vmem:[%s10631_s0 + $0x2bc] sm:$0xff] }
  0x70   :  { %1860 = vmatprep.mubr.bf16.mxu0 %v1259_v8  ;;  %v1107_v17 = vadd.f32 %v883_v10, %v307_v59  ;;  %v882_v18 = vmul.f32 0.5, %v658_v11  ;;  %v326_v19 = vunpack.c.h.bf16 %v128_v6  ;;  %v671_v20 = vunpack.c.h.bf16 %v476_v7  ;;  %v488_v56 = vld [vmem:[%s10632_s1 + $0x2bc] sm:$0xff]  ;;  %v485_v11 = vld [vmem:[%s10632_s1 + $0x2a8] sm:$0xff] }
  0x71   :  { %v1258_v21 = vpack.c.bf16 %v1111_v13, %v1104_v9  ;;  %v1114_v22 = vadd.f32 %v890_v14, %v314_v60  ;;  %v889_v23 = vmul.f32 0.5, %v665_v15  ;;  %v678_v24 = vunpack.c.h.bf16 %v480_v12 }
  0x72   :  { %v1106_v27 = vadd.f32 %v882_v18, %v306_v4  ;;  %v895_v28 = vmul.f32 0.5, %v671_v20  ;;  %v318_v29 = vunpack.c.l.bf16 %v124_v1  ;;  %v325_v30 = vunpack.c.l.bf16 %v128_v6  ;;  %v137_v6 = vld [vmem:[%s10631_s0 + $0x2c4] sm:$0xff] }
  0x73   :  { %1861 = vmatmul.mubr.bf16.gmra.mxu0 %v1258_v21  ;;  %v1261_v32 = vpack.c.bf16 %v1114_v22, %v1107_v17  ;;  %v1113_v33 = vadd.f32 %v889_v23, %v313_v5  ;;  %v902_v34 = vmul.f32 0.5, %v678_v24  ;;  %v670_v35 = vunpack.c.l.bf16 %v476_v7  ;;  %v133_v5 = vld [vmem:[%s10631_s0 + $0x2a8] sm:$0xff] }
  0x74   :  { %v1119_v37 = vadd.f32 %v895_v28, %v319_v16  ;;  %v677_v38 = vunpack.c.l.bf16 %v480_v12  ;;  %v321_v39 = vunpack.c.h.bf16 %v125_v25  ;;  %v328_v40 = vunpack.c.h.bf16 %v129_v26  ;;  %v489_v16 = vld [vmem:[%s10632_s1 + $0x2c4] sm:$0xff] }
  0x75   :  { %2021 = vmatprep.mubr.bf16.mxu1 %v1261_v32  ;;  %v1260_v41 = vpack.c.bf16 %v1113_v33, %v1106_v27  ;;  %v1126_v42 = vadd.f32 %v902_v34, %v326_v19  ;;  %v894_v43 = vmul.f32 0.5, %v670_v35  ;;  %v673_v44 = vunpack.c.h.bf16 %v477_v31 }
  0x76   :  { %v901_v46 = vmul.f32 0.5, %v677_v38  ;;  %v680_v47 = vunpack.c.h.bf16 %v481_v36  ;;  %v320_v48 = vunpack.c.l.bf16 %v125_v25  ;;  %v327_v49 = vunpack.c.l.bf16 %v129_v26  ;;  %v140_v25 = vld [vmem:[%s10631_s0 + $0x2d8] sm:$0xff] }
  0x77   :  { %2022 = vmatmul.mubr.bf16.gmra.mxu1 %v1260_v41  ;;  %v1266_v52 = vpack.c.bf16 %v1126_v42, %v1119_v37  ;;  %v1118_v53 = vadd.f32 %v894_v43, %v318_v29  ;;  %v897_v54 = vmul.f32 0.5, %v673_v44  ;;  %v672_v55 = vunpack.c.l.bf16 %v477_v31  ;;  %v492_v31 = vld [vmem:[%s10632_s1 + $0x2d8] sm:$0xff] }
  0x78   :  { %v1125_v57 = vadd.f32 %v901_v46, %v325_v30  ;;  %v904_v58 = vmul.f32 0.5, %v680_v47  ;;  %v679_v59 = vunpack.c.l.bf16 %v481_v36  ;;  %v333_v60 = vunpack.c.h.bf16 %v132_v45  ;;  %v144_v30 = vld [vmem:[%s10631_s0 + $0x2f4] sm:$0xff] }
  0x79   :  { %1868 = vmatprep.mubr.bf16.mxu0 %v1266_v52  ;;  %v1121_v61 = vadd.f32 %v897_v54, %v321_v39  ;;  %v896_v62 = vmul.f32 0.5, %v672_v55  ;;  %v340_v63 = vunpack.c.h.bf16 %v136_v50  ;;  %v685_v0 = vunpack.c.h.bf16 %v484_v51  ;;  %v496_v36 = vld [vmem:[%s10632_s1 + $0x2f4] sm:$0xff]  ;;  %v493_v55 = vld [vmem:[%s10632_s1 + $0x2e0] sm:$0xff] }
  0x7a   :  { %v1265_v1 = vpack.c.bf16 %v1125_v57, %v1118_v53  ;;  %v1128_v2 = vadd.f32 %v904_v58, %v328_v40  ;;  %v903_v3 = vmul.f32 0.5, %v679_v59  ;;  %v692_v4 = vunpack.c.h.bf16 %v488_v56 }
  0x7b   :  { %v1120_v7 = vadd.f32 %v896_v62, %v320_v48  ;;  %v909_v8 = vmul.f32 0.5, %v685_v0  ;;  %v332_v9 = vunpack.c.l.bf16 %v132_v45  ;;  %v339_v10 = vunpack.c.l.bf16 %v136_v50  ;;  %v145_v50 = vld [vmem:[%s10631_s0 + $0x2fc] sm:$0xff] }
  0x7c   :  { %1869 = vmatmul.mubr.bf16.gmra.mxu0 %v1265_v1  ;;  %v1268_v12 = vpack.c.bf16 %v1128_v2, %v1121_v61  ;;  %v1127_v13 = vadd.f32 %v903_v3, %v327_v49  ;;  %v916_v14 = vmul.f32 0.5, %v692_v4  ;;  %v684_v15 = vunpack.c.l.bf16 %v484_v51  ;;  %v141_v49 = vld [vmem:[%s10631_s0 + $0x2e0] sm:$0xff] }
  0x7d   :  { %v1133_v17 = vadd.f32 %v909_v8, %v333_v60  ;;  %v691_v18 = vunpack.c.l.bf16 %v488_v56  ;;  %v335_v19 = vunpack.c.h.bf16 %v133_v5  ;;  %v342_v20 = vunpack.c.h.bf16 %v137_v6  ;;  %v497_v60 = vld [vmem:[%s10632_s1 + $0x2fc] sm:$0xff] }
  0x7e   :  { %2029 = vmatprep.mubr.bf16.mxu1 %v1268_v12  ;;  %v1267_v21 = vpack.c.bf16 %v1127_v13, %v1120_v7  ;;  %v1140_v22 = vadd.f32 %v916_v14, %v340_v63  ;;  %v908_v23 = vmul.f32 0.5, %v684_v15  ;;  %v687_v24 = vunpack.c.h.bf16 %v485_v11 }
  0x7f   :  { %v915_v26 = vmul.f32 0.5, %v691_v18  ;;  %v694_v27 = vunpack.c.h.bf16 %v489_v16  ;;  %v334_v28 = vunpack.c.l.bf16 %v133_v5  ;;  %v341_v29 = vunpack.c.l.bf16 %v137_v6  ;;  %v148_v5 = vld [vmem:[%s10631_s0 + $0x310] sm:$0xff] }
  0x80   :  { %2030 = vmatmul.mubr.bf16.gmra.mxu1 %v1267_v21  ;;  %v1273_v32 = vpack.c.bf16 %v1140_v22, %v1133_v17  ;;  %v1132_v33 = vadd.f32 %v908_v23, %v332_v9  ;;  %v911_v34 = vmul.f32 0.5, %v687_v24  ;;  %v686_v35 = vunpack.c.l.bf16 %v485_v11  ;;  %v500_v11 = vld [vmem:[%s10632_s1 + $0x310] sm:$0xff] }
  0x81   :  { %v1139_v37 = vadd.f32 %v915_v26, %v339_v10  ;;  %v918_v38 = vmul.f32 0.5, %v694_v27  ;;  %v693_v39 = vunpack.c.l.bf16 %v489_v16  ;;  %v347_v40 = vunpack.c.h.bf16 %v140_v25  ;;  %v152_v10 = vld [vmem:[%s10631_s0 + $0x32c] sm:$0xff] }
  0x82   :  { %1876 = vmatprep.mubr.bf16.mxu0 %v1273_v32  ;;  %v1135_v41 = vadd.f32 %v911_v34, %v335_v19  ;;  %v910_v42 = vmul.f32 0.5, %v686_v35  ;;  %v354_v43 = vunpack.c.h.bf16 %v144_v30  ;;  %v699_v44 = vunpack.c.h.bf16 %v492_v31  ;;  %v504_v16 = vld [vmem:[%s10632_s1 + $0x32c] sm:$0xff]  ;;  %v501_v35 = vld [vmem:[%s10632_s1 + $0x318] sm:$0xff] }
  0x83   :  { %v1272_v45 = vpack.c.bf16 %v1139_v37, %v1132_v33  ;;  %v1142_v46 = vadd.f32 %v918_v38, %v342_v20  ;;  %v917_v47 = vmul.f32 0.5, %v693_v39  ;;  %v706_v48 = vunpack.c.h.bf16 %v496_v36 }
  0x84   :  { %v1134_v51 = vadd.f32 %v910_v42, %v334_v28  ;;  %v923_v52 = vmul.f32 0.5, %v699_v44  ;;  %v346_v53 = vunpack.c.l.bf16 %v140_v25  ;;  %v353_v54 = vunpack.c.l.bf16 %v144_v30  ;;  %v153_v30 = vld [vmem:[%s10631_s0 + $0x334] sm:$0xff] }
  0x85   :  { %1877 = vmatmul.mubr.bf16.gmra.mxu0 %v1272_v45  ;;  %v1275_v56 = vpack.c.bf16 %v1142_v46, %v1135_v41  ;;  %v1141_v57 = vadd.f32 %v917_v47, %v341_v29  ;;  %v930_v58 = vmul.f32 0.5, %v706_v48  ;;  %v698_v59 = vunpack.c.l.bf16 %v492_v31  ;;  %v149_v29 = vld [vmem:[%s10631_s0 + $0x318] sm:$0xff] }
  0x86   :  { %v1147_v61 = vadd.f32 %v923_v52, %v347_v40  ;;  %v705_v62 = vunpack.c.l.bf16 %v496_v36  ;;  %v349_v63 = vunpack.c.h.bf16 %v141_v49  ;;  %v356_v0 = vunpack.c.h.bf16 %v145_v50  ;;  %v505_v40 = vld [vmem:[%s10632_s1 + $0x334] sm:$0xff] }
  0x87   :  { %2037 = vmatprep.mubr.bf16.mxu1 %v1275_v56  ;;  %v1274_v1 = vpack.c.bf16 %v1141_v57, %v1134_v51  ;;  %v1154_v2 = vadd.f32 %v930_v58, %v354_v43  ;;  %v922_v3 = vmul.f32 0.5, %v698_v59  ;;  %v701_v4 = vunpack.c.h.bf16 %v493_v55 }
  0x88   :  { %v929_v6 = vmul.f32 0.5, %v705_v62  ;;  %v708_v7 = vunpack.c.h.bf16 %v497_v60  ;;  %v348_v8 = vunpack.c.l.bf16 %v141_v49  ;;  %v355_v9 = vunpack.c.l.bf16 %v145_v50  ;;  %v156_v49 = vld [vmem:[%s10631_s0 + $0x348] sm:$0xff] }
  0x89   :  { %2038 = vmatmul.mubr.bf16.gmra.mxu1 %v1274_v1  ;;  %v1280_v12 = vpack.c.bf16 %v1154_v2, %v1147_v61  ;;  %v1146_v13 = vadd.f32 %v922_v3, %v346_v53  ;;  %v925_v14 = vmul.f32 0.5, %v701_v4  ;;  %v700_v15 = vunpack.c.l.bf16 %v493_v55  ;;  %v508_v55 = vld [vmem:[%s10632_s1 + $0x348] sm:$0xff] }
  0x8a   :  { %v1153_v17 = vadd.f32 %v929_v6, %v353_v54  ;;  %v932_v18 = vmul.f32 0.5, %v708_v7  ;;  %v707_v19 = vunpack.c.l.bf16 %v497_v60  ;;  %v361_v20 = vunpack.c.h.bf16 %v148_v5  ;;  %v160_v54 = vld [vmem:[%s10631_s0 + $0x364] sm:$0xff] }
  0x8b   :  { %1884 = vmatprep.mubr.bf16.mxu0 %v1280_v12  ;;  %v1149_v21 = vadd.f32 %v925_v14, %v349_v63  ;;  %v924_v22 = vmul.f32 0.5, %v700_v15  ;;  %v368_v23 = vunpack.c.h.bf16 %v152_v10  ;;  %v713_v24 = vunpack.c.h.bf16 %v500_v11  ;;  %v512_v60 = vld [vmem:[%s10632_s1 + $0x364] sm:$0xff]  ;;  %v509_v15 = vld [vmem:[%s10632_s1 + $0x350] sm:$0xff] }
  0x8c   :  { %v1279_v25 = vpack.c.bf16 %v1153_v17, %v1146_v13  ;;  %v1156_v26 = vadd.f32 %v932_v18, %v356_v0  ;;  %v931_v27 = vmul.f32 0.5, %v707_v19  ;;  %v720_v28 = vunpack.c.h.bf16 %v504_v16 }
  0x8d   :  { %v1148_v31 = vadd.f32 %v924_v22, %v348_v8  ;;  %v937_v32 = vmul.f32 0.5, %v713_v24  ;;  %v360_v33 = vunpack.c.l.bf16 %v148_v5  ;;  %v367_v34 = vunpack.c.l.bf16 %v152_v10  ;;  %v161_v10 = vld [vmem:[%s10631_s0 + $0x36c] sm:$0xff] }
  0x8e   :  { %1885 = vmatmul.mubr.bf16.gmra.mxu0 %v1279_v25  ;;  %v1282_v36 = vpack.c.bf16 %v1156_v26, %v1149_v21  ;;  %v1155_v37 = vadd.f32 %v931_v27, %v355_v9  ;;  %v944_v38 = vmul.f32 0.5, %v720_v28  ;;  %v712_v39 = vunpack.c.l.bf16 %v500_v11  ;;  %v157_v9 = vld [vmem:[%s10631_s0 + $0x350] sm:$0xff] }
  0x8f   :  { %v1161_v41 = vadd.f32 %v937_v32, %v361_v20  ;;  %v719_v42 = vunpack.c.l.bf16 %v504_v16  ;;  %v363_v43 = vunpack.c.h.bf16 %v149_v29  ;;  %v370_v44 = vunpack.c.h.bf16 %v153_v30  ;;  %v513_v20 = vld [vmem:[%s10632_s1 + $0x36c] sm:$0xff] }
  0x90   :  { %2045 = vmatprep.mubr.bf16.mxu1 %v1282_v36  ;;  %v1281_v45 = vpack.c.bf16 %v1155_v37, %v1148_v31  ;;  %v1168_v46 = vadd.f32 %v944_v38, %v368_v23  ;;  %v936_v47 = vmul.f32 0.5, %v712_v39  ;;  %v715_v48 = vunpack.c.h.bf16 %v501_v35 }
  0x91   :  { %v943_v50 = vmul.f32 0.5, %v719_v42  ;;  %v722_v51 = vunpack.c.h.bf16 %v505_v40  ;;  %v362_v52 = vunpack.c.l.bf16 %v149_v29  ;;  %v369_v53 = vunpack.c.l.bf16 %v153_v30  ;;  %v38_v29 = vld [vmem:[%s10631_s0 + $0x10] sm:$0xff] }
  0x92   :  { %2046 = vmatmul.mubr.bf16.gmra.mxu1 %v1281_v45  ;;  %v1287_v56 = vpack.c.bf16 %v1168_v46, %v1161_v41  ;;  %v1160_v57 = vadd.f32 %v936_v47, %v360_v33  ;;  %v939_v58 = vmul.f32 0.5, %v715_v48  ;;  %v714_v59 = vunpack.c.l.bf16 %v501_v35 }
  0x93   :  { %v1167_v61 = vadd.f32 %v943_v50, %v367_v34  ;;  %v946_v62 = vmul.f32 0.5, %v722_v51  ;;  %v721_v63 = vunpack.c.l.bf16 %v505_v40  ;;  %v375_v0 = vunpack.c.h.bf16 %v156_v49  ;;  %v42_v34 = vld [vmem:[%s10631_s0 + $0x2c] sm:$0xff] }
  0x94   :  { %1892 = vmatprep.mubr.bf16.mxu0 %v1287_v56  ;;  %v1163_v1 = vadd.f32 %v939_v58, %v363_v43  ;;  %v938_v2 = vmul.f32 0.5, %v714_v59  ;;  %v382_v3 = vunpack.c.h.bf16 %v160_v54  ;;  %v727_v4 = vunpack.c.h.bf16 %v508_v55  ;;  %v390_v43 = vld [vmem:[%s10632_s1 + $0x10] sm:$0xff] }
  0x95   :  { %v1286_v5 = vpack.c.bf16 %v1167_v61, %v1160_v57  ;;  %v1170_v6 = vadd.f32 %v946_v62, %v370_v44  ;;  %v945_v7 = vmul.f32 0.5, %v721_v63  ;;  %v734_v8 = vunpack.c.h.bf16 %v512_v60  ;;  %v394_v44 = vld [vmem:[%s10632_s1 + $0x2c] sm:$0xff]  ;;  %v391_v58 = vld [vmem:[%s10632_s1 + $0x18] ss:$28 sps:$4 sm:$0xff]  }
  0x96   :  { %v1162_v11 = vadd.f32 %v938_v2, %v362_v52  ;;  %v951_v12 = vmul.f32 0.5, %v727_v4  ;;  %v374_v13 = vunpack.c.l.bf16 %v156_v49  ;;  %v381_v14 = vunpack.c.l.bf16 %v160_v54  ;;  %v39_v49 = vld [vmem:[%s10631_s0 + $0x18] ss:$28 sps:$4 sm:$0xff]  }
  0x97   :  { %1893 = vmatmul.mubr.bf16.gmra.mxu0 %v1286_v5  ;;  %v1289_v16 = vpack.c.bf16 %v1170_v6, %v1163_v1  ;;  %v1169_v17 = vadd.f32 %v945_v7, %v369_v53  ;;  %v958_v18 = vmul.f32 0.5, %v734_v8  ;;  %v726_v19 = vunpack.c.l.bf16 %v508_v55  ;;  %v399_v8 = vld [vmem:[%s10632_s1 + $0x50] ss:$28 sps:$4 sm:$0xff]  }
  0x98   :  { %v1175_v21 = vadd.f32 %v951_v12, %v375_v0  ;;  %v733_v22 = vunpack.c.l.bf16 %v512_v60  ;;  %v377_v23 = vunpack.c.h.bf16 %v157_v9  ;;  %v384_v24 = vunpack.c.h.bf16 %v161_v10  ;;  %v46_v12 = vld [vmem:[%s10631_s0 + $0x48] sm:$0xff] }
  0x99   :  { %2053 = vmatprep.mubr.bf16.mxu1 %v1289_v16  ;;  %v1288_v25 = vpack.c.bf16 %v1169_v17, %v1162_v11  ;;  %v1182_v26 = vadd.f32 %v958_v18, %v382_v3  ;;  %v950_v27 = vmul.f32 0.5, %v726_v19  ;;  %v729_v28 = vunpack.c.h.bf16 %v509_v15  ;;  %v47_v3 = vld [vmem:[%s10631_s0 + $0x50] ss:$28 sps:$4 sm:$0xff]   ;;  %v50_v17 = vld [vmem:[%s10631_s0 + $0x64] sm:$0xff] }
  0x9a   :  { %v957_v30 = vmul.f32 0.5, %v733_v22  ;;  %v736_v31 = vunpack.c.h.bf16 %v513_v20  ;;  %v376_v32 = vunpack.c.l.bf16 %v157_v9  ;;  %v383_v33 = vunpack.c.l.bf16 %v161_v10  ;;  %v398_v18 = vld [vmem:[%s10632_s1 + $0x48] sm:$0xff] }
  0x9b   :  { %2054 = vmatmul.mubr.bf16.gmra.mxu1 %v1288_v25  ;;  %v1294_v35 = vpack.c.bf16 %v1182_v26, %v1175_v21  ;;  %v1174_v36 = vadd.f32 %v950_v27, %v374_v13  ;;  %v953_v37 = vmul.f32 0.5, %v729_v28  ;;  %v728_v38 = vunpack.c.l.bf16 %v509_v15 }
  0x9c   :  { %v1181_v39 = vadd.f32 %v957_v30, %v381_v14  ;;  %v960_v40 = vmul.f32 0.5, %v736_v31  ;;  %v735_v41 = vunpack.c.l.bf16 %v513_v20  ;;  %v168_v42 = vunpack.c.l.bf16 %v38_v29 }
  0x9d   :  { %1900 = vmatprep.mubr.bf16.mxu0 %v1294_v35  ;;  %v1177_v45 = vadd.f32 %v953_v37, %v377_v23  ;;  %v952_v46 = vmul.f32 0.5, %v728_v38  ;;  %v169_v47 = vunpack.c.h.bf16 %v38_v29  ;;  %v175_v48 = vunpack.c.l.bf16 %v42_v34  ;;  %v402_v23 = vld [vmem:[%s10632_s1 + $0x64] sm:$0xff] }
  0x9e   :  { %v1293_v50 = vpack.c.bf16 %v1181_v39, %v1174_v36  ;;  %v1184_v51 = vadd.f32 %v960_v40, %v384_v24  ;;  %v959_v52 = vmul.f32 0.5, %v735_v41  ;;  %v176_v53 = vunpack.c.h.bf16 %v42_v34  ;;  %v406_v38 = vld [vmem:[%s10632_s1 + $0x80] sm:$0xff] }
  0x9f   :  { %v1176_v54 = vadd.f32 %v952_v46, %v376_v32  ;;  %v520_v55 = vunpack.c.l.bf16 %v390_v43  ;;  %v521_v56 = vunpack.c.h.bf16 %v390_v43  ;;  %v527_v57 = vunpack.c.l.bf16 %v394_v44  ;;  %v54_v32 = vld [vmem:[%s10631_s0 + $0x80] sm:$0xff] }
  0xa0   :  { %1901 = vmatmul.mubr.bf16.gmra.mxu0 %v1293_v50  ;;  %v1296_v59 = vpack.c.bf16 %v1184_v51, %v1177_v45  ;;  %v1183_v60 = vadd.f32 %v959_v52, %v383_v33  ;;  %v528_v61 = vunpack.c.h.bf16 %v394_v44  ;;  %v170_v62 = vunpack.c.l.bf16 %v39_v49  ;;  %v58_v33 = vld [vmem:[%s10631_s0 + $0x9c] sm:$0xff] }
  0xa1   :  { %v744_v63 = vmul.f32 0.5, %v520_v55  ;;  %v745_v0 = vmul.f32 0.5, %v521_v56  ;;  %v751_v1 = vmul.f32 0.5, %v527_v57  ;;  %v177_v2 = vunpack.c.h.bf16 %v39_v49  ;;  %v410_v43 = vld [vmem:[%s10632_s1 + $0x9c] sm:$0xff]  ;;  %v55_v56 = vld [vmem:[%s10631_s0 + $0x88] ss:$28 sps:$4 sm:$0xff]  }
  0xa2   :  { %2061 = vmatprep.mubr.bf16.mxu1 %v1296_v59  ;;  %v1295_v4 = vpack.c.bf16 %v1183_v60, %v1176_v54  ;;  %v752_v5 = vmul.f32 0.5, %v528_v61  ;;  %v522_v6 = vunpack.c.l.bf16 %v391_v58  ;;  %v529_v7 = vunpack.c.h.bf16 %v391_v58  ;;  %v407_v61 = vld [vmem:[%s10632_s1 + $0x88] ss:$28 sps:$4 sm:$0xff]  }
  0xa3   :  { %v968_v9 = vadd.f32 %v744_v63, %v168_v42  ;;  %v969_v10 = vadd.f32 %v745_v0, %v169_v47  ;;  %v975_v11 = vadd.f32 %v751_v1, %v175_v48  ;;  %v184_v16 = vunpack.c.l.bf16 %v47_v3 }
  0xa4   :  { %2062 = vmatmul.mubr.bf16.gmra.mxu1 %v1295_v4  ;;  %v976_v13 = vadd.f32 %v752_v5, %v176_v53  ;;  %v746_v14 = vmul.f32 0.5, %v522_v6  ;;  %v753_v15 = vmul.f32 0.5, %v529_v7  ;;  %v191_v20 = vunpack.c.h.bf16 %v47_v3  ;;  %v415_v7 = vld [vmem:[%s10632_s1 + $0xc0] ss:$28 sps:$4 sm:$0xff]  }
  0xa5   :  { %v1192_v19 = vpack.c.bf16 %v975_v11, %v968_v9  ;;  %v536_v21 = vunpack.c.l.bf16 %v399_v8  ;;  %v543_v22 = vunpack.c.h.bf16 %v399_v8  ;;  %v183_v27 = vunpack.c.h.bf16 %v46_v12 }
  0xa6   :  { %v1193_v24 = vpack.c.bf16 %v976_v13, %v969_v10  ;;  %v970_v25 = vadd.f32 %v746_v14, %v170_v62  ;;  %v977_v26 = vadd.f32 %v753_v15, %v177_v2  ;;  %v190_v30 = vunpack.c.h.bf16 %v50_v17  ;;  %v63_v2 = vld [vmem:[%s10631_s0 + $0xc0] ss:$28 sps:$4 sm:$0xff]   ;;  %v66_v13 = vld [vmem:[%s10631_s0 + $0xd4] sm:$0xff] }
  0xa7   :  { %v760_v28 = vmul.f32 0.5, %v536_v21  ;;  %v767_v29 = vmul.f32 0.5, %v543_v22  ;;  %v535_v31 = vunpack.c.h.bf16 %v398_v18  ;;  %v542_v35 = vunpack.c.h.bf16 %v402_v23 }
  0xa8   :  { %2102 = vmatprep.mubr.bf16.mxu0 %v1193_v24  ;;  %v1194_v34 = vpack.c.bf16 %v977_v26, %v970_v25  ;;  %v182_v36 = vunpack.c.l.bf16 %v46_v12  ;;  %v189_v37 = vunpack.c.l.bf16 %v50_v17  ;;  %v534_v42 = vunpack.c.l.bf16 %v398_v18  ;;  %v62_v12 = vld [vmem:[%s10631_s0 + $0xb8] sm:$0xff] }
  0xa9   :  { %2103 = vmatmul.mubr.bf16.vlgmr.msra.gmra.mxu0 %v1192_v19  ;;  %v984_v39 = vadd.f32 %v760_v28, %v184_v16  ;;  %v991_v40 = vadd.f32 %v767_v29, %v191_v20  ;;  %v759_v41 = vmul.f32 0.5, %v535_v31  ;;  %v766_v44 = vmul.f32 0.5, %v542_v35  ;;  %v414_v18 = vld [vmem:[%s10632_s1 + $0xb8] sm:$0xff] }
  0xaa   :  { %6465 = vmatprep.mubr.msk.bf16.mxu1 %vm1699_vm0, %v1194_v34  ;;  %v541_v45 = vunpack.c.l.bf16 %v402_v23  ;;  %v197_v46 = vunpack.c.h.bf16 %v54_v32  ;;  %v204_v47 = vunpack.c.h.bf16 %v58_v33  ;;  %v758_v50 = vmul.f32 0.5, %v534_v42  ;;  %v418_v23 = vld [vmem:[%s10632_s1 + $0xd4] sm:$0xff] }
  0xab   :  { %v1201_v48 = vpack.c.bf16 %v991_v40, %v984_v39  ;;  %v983_v49 = vadd.f32 %v759_v41, %v183_v27  ;;  %v549_v51 = vunpack.c.h.bf16 %v406_v38  ;;  %v990_v52 = vadd.f32 %v766_v44, %v190_v30  ;;  %v422_v42 = vld [vmem:[%s10632_s1 + $0xf0] sm:$0xff] }
  0xac   :  { %v765_v53 = vmul.f32 0.5, %v541_v45  ;;  %v556_v54 = vunpack.c.h.bf16 %v410_v43  ;;  %v196_v55 = vunpack.c.l.bf16 %v54_v32  ;;  %v982_v57 = vadd.f32 %v758_v50, %v182_v36  ;;  %v70_v36 = vld [vmem:[%s10631_s0 + $0xf0] sm:$0xff] }
  0xad   :  { %6466 = vmatmul.mubr.msk.bf16.vlgmr.msra.gmra.mxu1 %vm1699_vm0, %v1201_v48  ;;  %v773_v58 = vmul.f32 0.5, %v549_v51  ;;  %v203_v59 = vunpack.c.l.bf16 %v58_v33  ;;  %v548_v60 = vunpack.c.l.bf16 %v406_v38  ;;  %v1200_v62 = vpack.c.bf16 %v990_v52, %v983_v49 }
  0xae   :  { %v989_v63 = vadd.f32 %v765_v53, %v189_v37  ;;  %v780_v0 = vmul.f32 0.5, %v556_v54  ;;  %v555_v1 = vunpack.c.l.bf16 %v410_v43  ;;  %v198_v5 = vunpack.c.l.bf16 %v55_v56  ;;  %v74_v37 = vld [vmem:[%s10631_s0 + $0x10c] sm:$0xff] }
  0xaf   :  { %v997_v3 = vadd.f32 %v773_v58, %v197_v46  ;;  %v772_v4 = vmul.f32 0.5, %v548_v60  ;;  %v205_v6 = vunpack.c.h.bf16 %v55_v56  ;;  %2110 = vmatprep.mubr.bf16.mxu0 %v1200_v62  ;;  %v550_v11 = vunpack.c.l.bf16 %v407_v61  ;;  %v71_v56 = vld [vmem:[%s10631_s0 + $0xf8] ss:$28 sps:$4 sm:$0xff]  }
  0xb0   :  { %v1199_v8 = vpack.c.bf16 %v989_v63, %v982_v57  ;;  %v1004_v9 = vadd.f32 %v780_v0, %v204_v47  ;;  %v779_v10 = vmul.f32 0.5, %v555_v1  ;;  %v557_v15 = vunpack.c.h.bf16 %v407_v61  ;;  %v426_v47 = vld [vmem:[%s10632_s1 + $0x10c] sm:$0xff]  ;;  %v423_v61 = vld [vmem:[%s10632_s1 + $0xf8] ss:$28 sps:$4 sm:$0xff]  }
  0xb1   :  { %v996_v14 = vadd.f32 %v772_v4, %v196_v55  ;;  %v212_v16 = vunpack.c.l.bf16 %v63_v2  ;;  %v219_v17 = vunpack.c.h.bf16 %v63_v2  ;;  %v774_v21 = vmul.f32 0.5, %v550_v11  ;;  %v79_v2 = vld [vmem:[%s10631_s0 + $0x130] ss:$28 sps:$4 sm:$0xff]  }
  0xb2   :  { %2111 = vmatmul.mubr.bf16.gmra.mxu0 %v1199_v8  ;;  %v1207_v19 = vpack.c.bf16 %v1004_v9, %v997_v3  ;;  %v1003_v20 = vadd.f32 %v779_v10, %v203_v59  ;;  %v564_v22 = vunpack.c.l.bf16 %v415_v7  ;;  %v781_v24 = vmul.f32 0.5, %v557_v15 }
  0xb3   :  { %v571_v25 = vunpack.c.h.bf16 %v415_v7  ;;  %v211_v26 = vunpack.c.h.bf16 %v62_v12  ;;  %v218_v27 = vunpack.c.h.bf16 %v66_v13  ;;  %v998_v29 = vadd.f32 %v774_v21, %v198_v5  ;;  %v431_v7 = vld [vmem:[%s10632_s1 + $0x130] ss:$28 sps:$4 sm:$0xff]  }
  0xb4   :  { %2118 = vmatprep.mubr.bf16.mxu0 %v1207_v19  ;;  %v1206_v28 = vpack.c.bf16 %v1003_v20, %v996_v14  ;;  %v788_v30 = vmul.f32 0.5, %v564_v22  ;;  %v563_v31 = vunpack.c.h.bf16 %v414_v18  ;;  %v1005_v32 = vadd.f32 %v781_v24, %v205_v6  ;;  %v430_v22 = vld [vmem:[%s10632_s1 + $0x128] sm:$0xff] }
  0xb5   :  { %v795_v33 = vmul.f32 0.5, %v571_v25  ;;  %v570_v34 = vunpack.c.h.bf16 %v418_v23  ;;  %v210_v35 = vunpack.c.l.bf16 %v62_v12  ;;  %v217_v40 = vunpack.c.l.bf16 %v66_v13 }
  0xb6   :  { %v1012_v38 = vadd.f32 %v788_v30, %v212_v16  ;;  %v787_v39 = vmul.f32 0.5, %v563_v31  ;;  %v562_v41 = vunpack.c.l.bf16 %v414_v18  ;;  %v1208_v43 = vpack.c.bf16 %v1005_v32, %v998_v29  ;;  %v78_v16 = vld [vmem:[%s10631_s0 + $0x128] sm:$0xff]  ;;  %v8430_v29 = vld [vmem:[%s10631_s0 + $0x17c] sm:$0xff] }
  0xb7   :  { %v1019_v44 = vadd.f32 %v795_v33, %v219_v17  ;;  %v794_v45 = vmul.f32 0.5, %v570_v34  ;;  %v569_v46 = vunpack.c.l.bf16 %v418_v23  ;;  %v225_v50 = vunpack.c.h.bf16 %v70_v36  ;;  %v82_v17 = vld [vmem:[%s10631_s0 + $0x144] sm:$0xff]  ;;  %v6679_v34 = vld [vmem:[%s10633_s4 + $0x38] sm:$0xff]  }
  0xb8   :  { %v1011_v48 = vadd.f32 %v787_v39, %v211_v26  ;;  %v786_v49 = vmul.f32 0.5, %v562_v41  ;;  %v232_v51 = vunpack.c.h.bf16 %v74_v37  ;;  %6469 = vmatprep.mubr.msk.bf16.mxu1 %vm1699_vm0, %v1208_v43  ;;  %v577_v55 = vunpack.c.h.bf16 %v422_v42  ;;  %v438_v39 = vld [vmem:[%s10632_s1 + $0x160] sm:$0xff]  ;;  %6497 = vmatprep.subr.bf16.mxu1 %v6679_v34 }
  0xb9   :  { %v1215_v52 = vpack.c.bf16 %v1019_v44, %v1012_v38  ;;  %v1018_v53 = vadd.f32 %v794_v45, %v218_v27  ;;  %v793_v54 = vmul.f32 0.5, %v569_v46  ;;  %v584_v58 = vunpack.c.h.bf16 %v426_v47  ;;  %v434_v27 = vld [vmem:[%s10632_s1 + $0x144] sm:$0xff]  ;;  %6498 = vmatpush3.bf16.msra.mxu1 %v6679_v34 }
  0xba   :  { %2119 = vmatmul.mubr.bf16.gmra.mxu0 %v1206_v28  ;;  %v1010_v57 = vadd.f32 %v786_v49, %v210_v35  ;;  %v224_v59 = vunpack.c.l.bf16 %v70_v36  ;;  %v231_v60 = vunpack.c.l.bf16 %v74_v37  ;;  %v801_v0 = vmul.f32 0.5, %v577_v55  ;;  %v8425_v28 = vld [vmem:[%s10631_s0 + $0x160] sm:$0xff] }
  0xbb   :  { %6470 = vmatmul.mubr.msk.bf16.gmra.mxu1 %vm1699_vm0, %v1215_v52  ;;  %v1214_v62 = vpack.c.bf16 %v1018_v53, %v1011_v48  ;;  %v1017_v63 = vadd.f32 %v793_v54, %v217_v40  ;;  %v576_v1 = vunpack.c.l.bf16 %v422_v42  ;;  %v808_v3 = vmul.f32 0.5, %v584_v58  ;;  %v442_v48 = vld [vmem:[%s10632_s1 + $0x17c] sm:$0xff]  ;;  %v87_v53 = vld [vmem:[%s10631_s0 + $0x168] ss:$28 sps:$4 sm:$0xff]  }
  0xbc   :  { %v583_v4 = vunpack.c.l.bf16 %v426_v47  ;;  %v226_v5 = vunpack.c.l.bf16 %v71_v56  ;;  %v233_v6 = vunpack.c.h.bf16 %v71_v56  ;;  %v1025_v9 = vadd.f32 %v801_v0, %v225_v50 }
  0xbd   :  { %2126 = vmatprep.mubr.bf16.mxu0 %v1214_v62  ;;  %v1213_v8 = vpack.c.bf16 %v1017_v63, %v1010_v57  ;;  %v800_v10 = vmul.f32 0.5, %v576_v1  ;;  %v578_v11 = vunpack.c.l.bf16 %v423_v61  ;;  %v1032_v12 = vadd.f32 %v808_v3, %v232_v51 }
  0xbe   :  { %v807_v13 = vmul.f32 0.5, %v583_v4  ;;  %v585_v14 = vunpack.c.h.bf16 %v423_v61  ;;  %v240_v15 = vunpack.c.l.bf16 %v79_v2  ;;  %v247_v20 = vunpack.c.h.bf16 %v79_v2  ;;  %v439_v2 = vld [vmem:[%s10632_s1 + $0x168] ss:$28 sps:$4 sm:$0xff]  }
  0xbf   :  { %v1024_v18 = vadd.f32 %v800_v10, %v224_v59  ;;  %v802_v19 = vmul.f32 0.5, %v578_v11  ;;  %v592_v21 = vunpack.c.l.bf16 %v431_v7  ;;  %v1221_v23 = vpack.c.bf16 %v1032_v12, %v1025_v9 }
  0xc0   :  { %v1031_v24 = vadd.f32 %v807_v13, %v231_v60  ;;  %v809_v25 = vmul.f32 0.5, %v585_v14  ;;  %v599_v26 = vunpack.c.h.bf16 %v431_v7  ;;  %v239_v32 = vunpack.c.h.bf16 %v78_v16  ;;  %v95_v7 = vld [vmem:[%s10631_s0 + $0x1a0] ss:$28 sps:$4 sm:$0xff]  }
  0xc1   :  { %v1026_v30 = vadd.f32 %v802_v19, %v226_v5  ;;  %v816_v31 = vmul.f32 0.5, %v592_v21  ;;  %v246_v33 = vunpack.c.h.bf16 %v82_v17  ;;  %v591_v38 = vunpack.c.h.bf16 %v430_v22  ;;  %v447_v13 = vld [vmem:[%s10632_s1 + $0x1a0] ss:$28 sps:$4 sm:$0xff]   ;;  %v98_v19 = vld [vmem:[%s10631_s0 + $0x1b4] sm:$0xff] }
  0xc2   :  { %2127 = vmatmul.mubr.bf16.gmra.mxu0 %v1213_v8  ;;  %v1220_v35 = vpack.c.bf16 %v1031_v24, %v1024_v18  ;;  %v1033_v36 = vadd.f32 %v809_v25, %v233_v6  ;;  %v823_v37 = vmul.f32 0.5, %v599_v26  ;;  %v598_v41 = vunpack.c.h.bf16 %v434_v27  ;;  %v6680_v8 = vld [vmem:[%s10633_s4 + $0x30] sm:$0xff]   ;;  %v94_v18 = vld [vmem:[%s10631_s0 + $0x198] sm:$0xff] }
  0xc3   :  { %2134 = vmatprep.mubr.bf16.mxu0 %v1221_v23  ;;  %v1040_v40 = vadd.f32 %v816_v31, %v240_v15  ;;  %v238_v42 = vunpack.c.l.bf16 %v78_v16  ;;  %v245_v43 = vunpack.c.l.bf16 %v82_v17  ;;  %v815_v46 = vmul.f32 0.5, %v591_v38  ;;  %6499 = vmatprep.subr.bf16.mxu1 %v6680_v8  ;;  %v446_v24 = vld [vmem:[%s10632_s1 + $0x198] sm:$0xff] }
  0xc4   :  { %v1222_v44 = vpack.c.bf16 %v1033_v36, %v1026_v30  ;;  %v1047_v45 = vadd.f32 %v823_v37, %v247_v20  ;;  %v590_v47 = vunpack.c.l.bf16 %v430_v22  ;;  %v822_v49 = vmul.f32 0.5, %v598_v41  ;;  %6500 = vmatpush3.bf16.msra.mxu1 %v6680_v8 }
  0xc5   :  { %v597_v50 = vunpack.c.l.bf16 %v434_v27  ;;  %v253_v51 = vunpack.c.h.bf16 %v8425_v28  ;;  %v260_v52 = vunpack.c.h.bf16 %v8430_v29  ;;  %v1039_v55 = vadd.f32 %v815_v46, %v239_v32 }
  0xc6   :  { %6473 = vmatprep.mubr.msk.bf16.mxu1 %vm1699_vm0, %v1222_v44  ;;  %v1229_v54 = vpack.c.bf16 %v1047_v45, %v1040_v40  ;;  %v814_v56 = vmul.f32 0.5, %v590_v47  ;;  %v605_v57 = vunpack.c.h.bf16 %v438_v39  ;;  %v1046_v58 = vadd.f32 %v822_v49, %v246_v33 }
  0xc7   :  { %v821_v59 = vmul.f32 0.5, %v597_v50  ;;  %v612_v60 = vunpack.c.h.bf16 %v442_v48  ;;  %v252_v61 = vunpack.c.l.bf16 %v8425_v28  ;;  %v259_v0 = vunpack.c.l.bf16 %v8430_v29  ;;  %v450_v29 = vld [vmem:[%s10632_s1 + $0x1b4] sm:$0xff] }
  0xc8   :  { %6474 = vmatmul.mubr.msk.bf16.gmra.mxu1 %vm1699_vm0, %v1229_v54  ;;  %v1038_v62 = vadd.f32 %v814_v56, %v238_v42  ;;  %v829_v63 = vmul.f32 0.5, %v605_v57  ;;  %v604_v1 = vunpack.c.l.bf16 %v438_v39  ;;  %v1228_v3 = vpack.c.bf16 %v1046_v58, %v1039_v55  ;;  %v102_v42 = vld [vmem:[%s10631_s0 + $0x1d0] sm:$0xff]  ;;  %v6681_v54 = vld [vmem:[%s10633_s4 + $0x28] sm:$0xff]  }
  0xc9   :  { %v1045_v4 = vadd.f32 %v821_v59, %v245_v43  ;;  %v836_v5 = vmul.f32 0.5, %v612_v60  ;;  %v611_v6 = vunpack.c.l.bf16 %v442_v48  ;;  %v254_v11 = vunpack.c.l.bf16 %v87_v53  ;;  %v8486_v43 = vld [vmem:[%s10631_s0 + $0x1ec] sm:$0xff]  ;;  %6501 = vmatprep.subr.bf16.mxu1 %v6681_v54 }
  0xca   :  { %2135 = vmatmul.mubr.bf16.gmra.mxu0 %v1220_v35  ;;  %v1053_v9 = vadd.f32 %v829_v63, %v253_v51  ;;  %v828_v10 = vmul.f32 0.5, %v604_v1  ;;  %v261_v12 = vunpack.c.h.bf16 %v87_v53  ;;  %v606_v17 = vunpack.c.l.bf16 %v439_v2  ;;  %v454_v48 = vld [vmem:[%s10632_s1 + $0x1d0] sm:$0xff]  ;;  %6502 = vmatpush3.bf16.msra.mxu1 %v6681_v54  ;;  %v8561_v54 = vld [vmem:[%s10631_s0 + $0x240] sm:$0xff] }
  0xcb   :  { %2142 = vmatprep.mubr.bf16.mxu0 %v1228_v3  ;;  %v1227_v14 = vpack.c.bf16 %v1045_v4, %v1038_v62  ;;  %v1060_v15 = vadd.f32 %v836_v5, %v260_v52  ;;  %v835_v16 = vmul.f32 0.5, %v611_v6  ;;  %v613_v21 = vunpack.c.h.bf16 %v439_v2  ;;  %v458_v53 = vld [vmem:[%s10632_s1 + $0x1ec] sm:$0xff]  ;;  %v103_v63 = vld [vmem:[%s10631_s0 + $0x1d8] ss:$28 sps:$4 sm:$0xff]  }
  0xcc   :  { %v8468_v20 = vadd.f32 %v828_v10, %v252_v61  ;;  %v268_v22 = vunpack.c.l.bf16 %v95_v7  ;;  %v275_v23 = vunpack.c.h.bf16 %v95_v7  ;;  %v830_v27 = vmul.f32 0.5, %v606_v17  ;;  %v455_v4 = vld [vmem:[%s10632_s1 + $0x1d8] ss:$28 sps:$4 sm:$0xff]  }
  0xcd   :  { %v1235_v25 = vpack.c.bf16 %v1060_v15, %v1053_v9  ;;  %v8473_v26 = vadd.f32 %v835_v16, %v259_v0  ;;  %v620_v28 = vunpack.c.l.bf16 %v447_v13  ;;  %v837_v30 = vmul.f32 0.5, %v613_v21  ;;  %v111_v9 = vld [vmem:[%s10631_s0 + $0x210] ss:$28 sps:$4 sm:$0xff]  }
  0xce   :  { %v627_v31 = vunpack.c.h.bf16 %v447_v13  ;;  %v267_v32 = vunpack.c.h.bf16 %v94_v18  ;;  %v274_v33 = vunpack.c.h.bf16 %v98_v19  ;;  %v1054_v35 = vadd.f32 %v830_v27, %v254_v11 }
  0xcf   :  { %v1234_v34 = vpack.c.bf16 %v8473_v26, %v8468_v20  ;;  %v844_v36 = vmul.f32 0.5, %v620_v28  ;;  %v619_v37 = vunpack.c.h.bf16 %v446_v24  ;;  %v1061_v38 = vadd.f32 %v837_v30, %v261_v12  ;;  %v8533_v26 = vld [vmem:[%s10634_s3] ss:$0 sm:$0xff] }
  0xd0   :  { %v851_v39 = vmul.f32 0.5, %v627_v31  ;;  %v626_v40 = vunpack.c.h.bf16 %v450_v29  ;;  %v266_v41 = vunpack.c.l.bf16 %v94_v18  ;;  %v273_v46 = vunpack.c.l.bf16 %v98_v19  ;;  %v8538_v31 = vld [vmem:[%s10631_s0 + $0x224] sm:$0xff] }
  0xd1   :  { %v1068_v44 = vadd.f32 %v844_v36, %v268_v22  ;;  %v843_v45 = vmul.f32 0.5, %v619_v37  ;;  %v618_v47 = vunpack.c.l.bf16 %v446_v24  ;;  %v1236_v49 = vpack.c.bf16 %v1061_v38, %v1054_v35  ;;  %v8526_v24 = vld [vmem:[%s10631_s0 + $0x208] sm:$0xff]  ;;  %v6682_v38 = vld [vmem:[%s10633_s4 + $0x20] sm:$0xff]  }
  0xd2   :  { %2143 = vmatmul.mubr.bf16.gmra.mxu0 %v1227_v14  ;;  %v1075_v50 = vadd.f32 %v851_v39, %v275_v23  ;;  %v850_v51 = vmul.f32 0.5, %v626_v40  ;;  %v625_v52 = vunpack.c.l.bf16 %v450_v29  ;;  %v281_v57 = vunpack.c.h.bf16 %v102_v42  ;;  %v463_v14 = vld [vmem:[%s10632_s1 + $0x210] ss:$28 sps:$4 sm:$0xff]   ;;  %v466_v37 = vld [vmem:[%s10632_s1 + $0x224] sm:$0xff]  ;;  %6503 = vmatprep.subr.bf16.mxu1 %v6682_v38 }
  0xd3   :  { %2150 = vmatprep.mubr.bf16.mxu0 %v1235_v25  ;;  %v1067_v55 = vadd.f32 %v843_v45, %v267_v32  ;;  %v842_v56 = vmul.f32 0.5, %v618_v47  ;;  %v288_v58 = vunpack.c.h.bf16 %v8486_v43  ;;  %6477 = vmatprep.mubr.msk.bf16.mxu1 %vm1699_vm0, %v1236_v49  ;;  %v633_v62 = vunpack.c.h.bf16 %v454_v48  ;;  %v462_v36 = vld [vmem:[%s10632_s1 + $0x208] sm:$0xff] }
  0xd4   :  { %v1243_v59 = vpack.c.bf16 %v1075_v50, %v1068_v44  ;;  %v1074_v60 = vadd.f32 %v850_v51, %v274_v33  ;;  %v849_v61 = vmul.f32 0.5, %v625_v52  ;;  %v640_v1 = vunpack.c.h.bf16 %v458_v53  ;;  %6504 = vmatpush3.bf16.msra.mxu1 %v6682_v38  ;;  %v471_v38 = vld [vmem:[%s10632_s1 + $0x248] ss:$28 sps:$4 sm:$0xff]  }
  0xd5   :  { %v8502_v0 = vadd.f32 %v842_v56, %v266_v41  ;;  %v280_v2 = vunpack.c.l.bf16 %v102_v42  ;;  %v287_v3 = vunpack.c.l.bf16 %v8486_v43  ;;  %v857_v7 = vmul.f32 0.5, %v633_v62 }
  0xd6   :  { %6478 = vmatmul.mubr.msk.bf16.gmra.mxu1 %vm1699_vm0, %v1243_v59  ;;  %v1242_v5 = vpack.c.bf16 %v1074_v60, %v1067_v55  ;;  %v8509_v6 = vadd.f32 %v849_v61, %v273_v46  ;;  %v632_v8 = vunpack.c.l.bf16 %v454_v48  ;;  %v864_v10 = vmul.f32 0.5, %v640_v1  ;;  %v470_v1 = vld [vmem:[%s10632_s1 + $0x240] sm:$0xff] }
  0xd7   :  { %v639_v11 = vunpack.c.l.bf16 %v458_v53  ;;  %v282_v12 = vunpack.c.l.bf16 %v103_v63  ;;  %v289_v13 = vunpack.c.h.bf16 %v103_v63  ;;  %v8519_v16 = vadd.f32 %v857_v7, %v281_v57 }
  0xd8   :  { %v1241_v15 = vpack.c.bf16 %v8509_v6, %v8502_v0  ;;  %v856_v18 = vmul.f32 0.5, %v632_v8  ;;  %v634_v19 = vunpack.c.l.bf16 %v455_v4  ;;  %v8521_v20 = vadd.f32 %v864_v10, %v288_v58  ;;  %v8568_v0 = vld [vmem:[%s10631_s0 + $0x25c] sm:$0xff] }
  0xd9   :  { %v863_v21 = vmul.f32 0.5, %v639_v11  ;;  %v641_v22 = vunpack.c.h.bf16 %v455_v4  ;;  %v296_v23 = vunpack.c.l.bf16 %v111_v9  ;;  %v303_v29 = vunpack.c.h.bf16 %v111_v9  ;;  %v474_v8 = vld [vmem:[%s10632_s1 + $0x25c] sm:$0xff] }
  0xda   :  { %2151 = vmatmul.mubr.bf16.gmra.mxu0 %v1234_v34  ;;  %v8528_v25 = vadd.f32 %v856_v18, %v280_v2  ;;  %v858_v28 = vmul.f32 0.5, %v634_v19  ;;  %v648_v30 = vunpack.c.l.bf16 %v463_v14  ;;  %v1249_v32 = vpack.c.bf16 %v8521_v20, %v8519_v16 }
  0xdb   :  { %2158 = vmatprep.mubr.bf16.mxu0 %v1242_v5  ;;  %v8542_v33 = vadd.f32 %v863_v21, %v287_v3  ;;  %v865_v35 = vmul.f32 0.5, %v641_v22  ;;  %v655_v41 = vunpack.c.h.bf16 %v463_v14  ;;  %v295_v43 = vunpack.c.h.bf16 %v8526_v24 }
  0xdc   :  { %v1082_v39 = vadd.f32 %v858_v28, %v282_v12  ;;  %v872_v42 = vmul.f32 0.5, %v648_v30  ;;  %v302_v48 = vunpack.c.h.bf16 %v8538_v31  ;;  %v647_v52 = vunpack.c.h.bf16 %v462_v36 }
  0xdd   :  { %v1248_v44 = vpack.c.bf16 %v8542_v33, %v8528_v25  ;;  %v1089_v47 = vadd.f32 %v865_v35, %v289_v13  ;;  %v879_v49 = vmul.f32 0.5, %v655_v41  ;;  %v654_v53 = vunpack.c.h.bf16 %v466_v37 }
  0xde   :  { %v1096_v50 = vadd.f32 %v872_v42, %v296_v23  ;;  %v294_v58 = vunpack.c.l.bf16 %v8526_v24  ;;  %v301_v59 = vunpack.c.l.bf16 %v8538_v31  ;;  %v871_v62 = vmul.f32 0.5, %v647_v52  ;;  %v119_v31 = vld [vmem:[%s10631_s0 + $0x248] ss:$28 sps:$4 sm:$0xff]  }
  0xdf   :  { %v1250_v55 = vpack.c.bf16 %v1089_v47, %v1082_v39  ;;  %v1103_v61 = vadd.f32 %v879_v49, %v303_v29  ;;  %v878_v63 = vmul.f32 0.5, %v654_v53  ;;  %v646_v5 = vunpack.c.l.bf16 %v462_v36 }
  0xe0   :  { %v653_v6 = vunpack.c.l.bf16 %v466_v37  ;;  %v309_v7 = vunpack.c.h.bf16 %v8561_v54  ;;  %v1095_v11 = vadd.f32 %v871_v62, %v295_v43  ;;  %v316_v18 = vunpack.c.h.bf16 %v8568_v0 }
  0xe1   :  { %6481 = vmatprep.mubr.msk.bf16.mxu1 %vm1699_vm0, %v1250_v55  ;;  %v1257_v10 = vpack.c.bf16 %v1103_v61, %v1096_v50  ;;  %v1102_v12 = vadd.f32 %v878_v63, %v302_v48  ;;  %v870_v14 = vmul.f32 0.5, %v646_v5  ;;  %v661_v19 = vunpack.c.h.bf16 %v470_v1  ;;  %v479_v55 = vld [vmem:[%s10632_s1 + $0x280] ss:$28 sps:$4 sm:$0xff]   ;;  %v8633_v5 = vld [vmem:[%s10631_s0 + $0x294] sm:$0xff] }
  0xe2   :  { %v6060_v17 = vpop.f32.mrf.mxu0  ;;  %2159 = vmatmul.mubr.bf16.gmra.mxu0 %v1241_v15  ;;  %v877_v16 = vmul.f32 0.5, %v653_v6  ;;  %v668_v23 = vunpack.c.h.bf16 %v474_v8  ;;  %v6683_v15 = vld [vmem:[%s10633_s4 + $0x18] sm:$0xff]   ;;  %v308_v30 = vunpack.c.l.bf16 %v8561_v54  ;;  %v315_v37 = vunpack.c.l.bf16 %v8568_v0 }
  0xe3   :  { %2166 = vmatprep.mubr.bf16.mxu0 %v1249_v32  ;;  %6482 = vmatmul.mubr.msk.bf16.gmra.mxu1 %vm1699_vm0, %v1257_v10  ;;  %v1256_v20 = vpack.c.bf16 %v1102_v12, %v1095_v11  ;;  %v8586_v24 = vadd.f32 %v870_v14, %v294_v58  ;;  %v885_v29 = vmul.f32 0.5, %v661_v19  ;;  %v660_v42 = vunpack.c.l.bf16 %v470_v1  ;;  %v8622_v61 = vld [vmem:[%s10631_s0 + $0x278] sm:$0xff]  ;;  %v6684_v14 = vld [vmem:[%s10633_s4 + $0x10] sm:$0xff]  }
  0xe4   :  { %v6061_v27 = vpop.f32.mrf.mxu0  ;;  %v6172_v46 = vpop.f32.mrf.mxu1  ;;  %v892_v36 = vmul.f32 0.5, %v668_v23  ;;  %6505 = vmatprep.subr.bf16.mxu1 %v6683_v15  ;;  %v667_v43 = vunpack.c.l.bf16 %v474_v8  ;;  %v310_v49 = vunpack.c.l.bf16 %v119_v31  ;;  %v317_v50 = vunpack.c.h.bf16 %v119_v31  ;;  %v478_v6 = vld [vmem:[%s10632_s1 + $0x278] sm:$0xff] }
  0xe5   :  { %v6062_v34 = vadd.f32 %v6061_v27, %v6060_v17  ;;  %v8588_v27 = vadd.f32 %v877_v16, %v301_v59  ;;  %v8603_v41 = vadd.f32 %v885_v29, %v309_v7  ;;  %6506 = vmatpush3.bf16.msra.mxu1 %v6683_v15  ;;  %v884_v52 = vmul.f32 0.5, %v660_v42  ;;  %v482_v7 = vld [vmem:[%s10632_s1 + $0x294] sm:$0xff] }
  0xe6   :  { %v6063_v40 = vpop.f32.mrf.mxu0  ;;  %v6173_v56 = vpop.f32.mrf.mxu1  ;;  %v8608_v48 = vadd.f32 %v892_v36, %v316_v18  ;;  %v891_v53 = vmul.f32 0.5, %v667_v43  ;;  %v662_v54 = vunpack.c.l.bf16 %v471_v38  ;;  %v669_v59 = vunpack.c.h.bf16 %v471_v38  ;;  %6507 = vmatprep.subr.bf16.mxu1 %v6684_v14 }
  0xe7   :  { %v1783_v45 = vadd.f32 %v6062_v34, %v8533_v26  ;;  %v6174_v60 = vadd.f32 %v6173_v56, %v6172_v46  ;;  %v1255_v39 = vpack.c.bf16 %v8588_v27, %v8586_v24  ;;  %v8626_v0 = vadd.f32 %v884_v52, %v308_v30 }
  0xe8   :  { %v6064_v51 = vpop.f32.mrf.mxu0  ;;  %v6175_v3 = vpop.f32.mrf.mxu1  ;;  %v1263_v58 = vpack.c.bf16 %v8608_v48, %v8603_v41  ;;  %v8628_v25 = vadd.f32 %v891_v53, %v315_v37  ;;  %v886_v33 = vmul.f32 0.5, %v662_v54  ;;  %v893_v1 = vmul.f32 0.5, %v669_v59  ;;  %v138_v48 = vld [vmem:[%s10631_s0 + $0x2cc] sm:$0xff] }
  0xe9   :  { %v6065_v57 = vadd.f32 %v6064_v51, %v6063_v40  ;;  %v8579_v9 = vadd.f32 %v6174_v60, %v1783_v45  ;;  %v127_v45 = vld [vmem:[%s10631_s0 + $0x280] ss:$28 sps:$4 sm:$0xff]   ;;  %v330_v23 = vunpack.c.h.bf16 %v8633_v5  ;;  %v675_v15 = vunpack.c.h.bf16 %v478_v6  ;;  %6508 = vmatpush3.bf16.msra.mxu1 %v6684_v14 }
  0xea   :  { %v6066_v4 = vpop.f32.mrf.mxu0  ;;  %v6176_v13 = vpop.f32.mrf.mxu1  ;;  %2167 = vmatmul.mubr.bf16.gmra.mxu0 %v1248_v44  ;;  %v324_v60 = vunpack.c.l.bf16 %v127_v45  ;;  %v1262_v10 = vpack.c.bf16 %v8628_v25, %v8626_v0  ;;  %v1110_v12 = vadd.f32 %v886_v33, %v310_v49  ;;  %v322_v41 = vunpack.c.l.bf16 %v8622_v61  ;;  %v6685_v49 = vld [vmem:[%s10633_s4 + $0x8] sm:$0xff]  }
  0xeb   :  { %v1786_v2 = vadd.f32 %v6065_v57, %v8533_v26  ;;  %v6177_v21 = vadd.f32 %v6176_v13, %v6175_v3  ;;  %2174 = vmatprep.mubr.bf16.mxu0 %v1256_v20  ;;  %v676_v3 = vunpack.c.l.bf16 %v479_v55  ;;  %v323_v13 = vunpack.c.h.bf16 %v8622_v61  ;;  %6509 = vmatprep.subr.bf16.mxu1 %v6685_v49  ;;  %v495_v0 = vld [vmem:[%s10632_s1 + $0x2f0] ss:$28 sps:$4 sm:$0xff]  }
  0xec   :  { %v6067_v17 = vpop.f32.mrf.mxu0  ;;  %v6178_v35 = vpop.f32.mrf.mxu1  ;;  %v899_v38 = vmul.f32 0.5, %v675_v15  ;;  %v329_v42 = vunpack.c.l.bf16 %v8633_v5  ;;  %v681_v24 = vunpack.c.l.bf16 %v482_v7  ;;  %v344_v33 = vunpack.c.h.bf16 %v138_v48  ;;  %v135_v5 = vld [vmem:[%s10631_s0 + $0x2b8] ss:$28 sps:$4 sm:$0xff]   ;;  %v143_v15 = vld [vmem:[%s10631_s0 + $0x2f0] ss:$28 sps:$4 sm:$0xff]  }
  0xed   :  { %v6068_v22 = vadd.f32 %v6067_v17, %v6066_v4  ;;  %v8594_v32 = vadd.f32 %v6177_v21, %v1786_v2  ;;  %v331_v2 = vunpack.c.h.bf16 %v127_v45  ;;  %v683_v4 = vunpack.c.h.bf16 %v479_v55  ;;  %6510 = vmatpush3.bf16.msra.mxu1 %v6685_v49 }
  0xee   :  { %v6069_v28 = vpop.f32.mrf.mxu0  ;;  %v6179_v46 = vpop.f32.mrf.mxu1  ;;  %v1117_v17 = vadd.f32 %v893_v1, %v317_v50  ;;  %v900_v18 = vmul.f32 0.5, %v676_v3  ;;  %v905_v61 = vmul.f32 0.5, %v681_v24 }
  0xef   :  { %v1791_v34 = vadd.f32 %v6068_v22, %v8533_v26  ;;  %v6180_v51 = vadd.f32 %v6179_v46, %v6178_v35  ;;  %v907_v19 = vmul.f32 0.5, %v683_v4  ;;  %v8654_v35 = vld [vmem:[%s10631_s0 + $0x2b0] sm:$0xff] }
  0xf0   :  { %v6070_v40 = vpop.f32.mrf.mxu0  ;;  %v6181_v57 = vpop.f32.mrf.mxu1  ;;  %v1264_v30 = vpack.c.bf16 %v1117_v17, %v1110_v12  ;;  %v1124_v31 = vadd.f32 %v900_v18, %v324_v60  ;;  %v336_v27 = vunpack.c.l.bf16 %v8654_v35  ;;  %v487_v12 = vld [vmem:[%s10632_s1 + $0x2b8] ss:$28 sps:$4 sm:$0xff]  }
  0xf1   :  { %v6071_v47 = vadd.f32 %v6070_v40, %v6069_v28  ;;  %v8624_v62 = vadd.f32 %v6180_v51, %v1791_v34  ;;  %v682_v28 = vunpack.c.h.bf16 %v482_v7  ;;  %v1131_v34 = vadd.f32 %v907_v19, %v331_v2 }
  0xf2   :  { %v6072_v63 = vpop.f32.mrf.mxu0  ;;  %v6182_v44 = vpop.f32.mrf.mxu1  ;;  %2175 = vmatmul.mubr.bf16.gmra.mxu0 %v1255_v39  ;;  %6485 = vmatprep.mubr.msk.bf16.mxu1 %vm1699_vm0, %v1264_v30  ;;  %v1123_v51 = vadd.f32 %v899_v38, %v323_v13  ;;  %v486_v39 = vld [vmem:[%s10632_s1 + $0x2b0] sm:$0xff] }
  0xf3   :  { %v1794_v56 = vadd.f32 %v6071_v47, %v8533_v26  ;;  %v6183_v8 = vadd.f32 %v6182_v44, %v6181_v57  ;;  %v906_v40 = vmul.f32 0.5, %v682_v28  ;;  %v1271_v45 = vpack.c.bf16 %v1131_v34, %v1124_v31  ;;  %2182 = vmatprep.mubr.bf16.mxu0 %v1263_v58  ;;  %v490_v58 = vld [vmem:[%s10632_s1 + $0x2cc] sm:$0xff] }
  0xf4   :  { %v6073_v11 = vpop.f32.mrf.mxu0  ;;  %v6184_v21 = vpop.f32.mrf.mxu1  ;;  %v674_v47 = vunpack.c.l.bf16 %v478_v6  ;;  %v337_v57 = vunpack.c.h.bf16 %v8654_v35  ;;  %v688_v3 = vunpack.c.l.bf16 %v486_v39  ;;  %v689_v4 = vunpack.c.h.bf16 %v486_v39 }
  0xf5   :  { %v6074_v16 = vadd.f32 %v6073_v11, %v6072_v63  ;;  %v8647_v20 = vadd.f32 %v6183_v8, %v1794_v56  ;;  %v1130_v52 = vadd.f32 %v906_v40, %v330_v23  ;;  %6486 = vmatmul.mubr.msk.bf16.gmra.mxu1 %vm1699_vm0, %v1271_v45  ;;  %v343_v63 = vunpack.c.l.bf16 %v138_v48  ;;  %v8711_v45 = vld [vmem:[%s10631_s0 + $0x2e8] sm:$0xff] }
  0xf6   :  { %v6075_v22 = vpop.f32.mrf.mxu0  ;;  %v6185_v36 = vpop.f32.mrf.mxu1  ;;  %v898_v56 = vmul.f32 0.5, %v674_v47  ;;  %v8685_v6 = vadd.f32 %v905_v61, %v329_v42  ;;  %v695_v8 = vunpack.c.l.bf16 %v490_v58  ;;  %v696_v11 = vunpack.c.h.bf16 %v490_v58 }
  0xf7   :  { %v1799_v29 = vadd.f32 %v6074_v16, %v8533_v26  ;;  %v6186_v43 = vadd.f32 %v6185_v36, %v6184_v21  ;;  %v1270_v59 = vpack.c.bf16 %v1130_v52, %v1123_v51  ;;  %v912_v17 = vmul.f32 0.5, %v688_v3  ;;  %v6686_v51 = vld [vmem:[%s10633_s4] sm:$0xff]  }
  0xf8   :  { %v6076_v37 = vpop.f32.mrf.mxu0  ;;  %v6187_v50 = vpop.f32.mrf.mxu1  ;;  %v8680_v1 = vadd.f32 %v898_v56, %v322_v41  ;;  %v913_v18 = vmul.f32 0.5, %v689_v4  ;;  %v919_v21 = vmul.f32 0.5, %v695_v8  ;;  %v338_v23 = vunpack.c.l.bf16 %v135_v5  ;;  %v494_v56 = vld [vmem:[%s10632_s1 + $0x2e8] sm:$0xff]  ;;  %6511 = vmatprep.subr.bf16.mxu1 %v6686_v51 }
  0xf9   :  { %v6077_v46 = vadd.f32 %v6076_v37, %v6075_v22  ;;  %v8672_v53 = vadd.f32 %v6186_v43, %v1799_v29  ;;  %v920_v22 = vmul.f32 0.5, %v696_v11  ;;  %v8701_v34 = vadd.f32 %v912_v17, %v336_v27  ;;  %6512 = vmatpush3.bf16.msra.mxu1 %v6686_v51  ;;  %v150_v17 = vld [vmem:[%s10631_s0 + $0x320] sm:$0xff] }
  0xfa   :  { %v6078_v55 = vpop.f32.mrf.mxu0  ;;  %v6188_v60 = vpop.f32.mrf.mxu1  ;;  %2183 = vmatmul.mubr.bf16.gmra.mxu0 %v1262_v10  ;;  %v1269_v28 = vpack.c.bf16 %v8685_v6, %v8680_v1  ;;  %v1137_v31 = vadd.f32 %v913_v18, %v337_v57  ;;  %v690_v35 = vunpack.c.l.bf16 %v487_v12  ;;  %v8703_v40 = vadd.f32 %v919_v21, %v343_v63 }
  0xfb   :  { %v1802_v54 = vadd.f32 %v6077_v46, %v8533_v26  ;;  %v6189_v44 = vadd.f32 %v6188_v60, %v6187_v50  ;;  %2190 = vmatprep.mubr.bf16.mxu0 %v1270_v59  ;;  %v1144_v38 = vadd.f32 %v920_v22, %v344_v33  ;;  %v345_v10 = vunpack.c.h.bf16 %v135_v5 }
  0xfc   :  { %v6079_v2 = vpop.f32.mrf.mxu0  ;;  %v6190_v14 = vpop.f32.mrf.mxu1  ;;  %v697_v41 = vunpack.c.h.bf16 %v487_v12  ;;  %v914_v42 = vmul.f32 0.5, %v690_v35  ;;  %v352_v43 = vunpack.c.l.bf16 %v143_v15  ;;  %v359_v50 = vunpack.c.h.bf16 %v143_v15  ;;  %v154_v35 = vld [vmem:[%s10631_s0 + $0x33c] sm:$0xff] }
  0xfd   :  { %v6080_v7 = vadd.f32 %v6079_v2, %v6078_v55  ;;  %v8690_v13 = vadd.f32 %v6189_v44, %v1802_v54  ;;  %v1277_v48 = vpack.c.bf16 %v1144_v38, %v1137_v31  ;;  %v704_v39 = vunpack.c.l.bf16 %v495_v0  ;;  %v8722_v55 = vld [vmem:[%s10631_s0 + $0x304] sm:$0xff] }
  0xfe   :  { %v6081_v16 = vpop.f32.mrf.mxu0  ;;  %v6191_v29 = vpop.f32.mrf.mxu1  ;;  %v921_v24 = vmul.f32 0.5, %v697_v41  ;;  %v1138_v27 = vadd.f32 %v914_v42, %v338_v23  ;;  %v711_v54 = vunpack.c.h.bf16 %v495_v0  ;;  %v1276_v58 = vpack.c.bf16 %v8703_v40, %v8701_v34  ;;  %v498_v2 = vld [vmem:[%s10632_s1 + $0x304] sm:$0xff]  ;;  %v506_v41 = vld [vmem:[%s10632_s1 + $0x33c] sm:$0xff] }
  0xff   :  { %v1807_v19 = vadd.f32 %v6080_v7, %v8533_v26  ;;  %v6192_v36 = vadd.f32 %v6191_v29, %v6190_v14  ;;  %v350_v60 = vunpack.c.l.bf16 %v8711_v45  ;;  %v351_v61 = vunpack.c.h.bf16 %v8711_v45 }
 0x100   :  { %v6082_v30 = vpop.f32.mrf.mxu0  ;;  %v6193_v25 = vpop.f32.mrf.mxu1  ;;  %v1145_v33 = vadd.f32 %v921_v24, %v345_v10  ;;  %v928_v44 = vmul.f32 0.5, %v704_v39  ;;  %v935_v1 = vmul.f32 0.5, %v711_v54  ;;  %v358_v6 = vunpack.c.h.bf16 %v8722_v55 }
 0x101   :  { %v6083_v37 = vadd.f32 %v6082_v30, %v6081_v16  ;;  %v8713_v46 = vadd.f32 %v6192_v36, %v1807_v19  ;;  %v702_v7 = vunpack.c.l.bf16 %v494_v56  ;;  %v703_v8 = vunpack.c.h.bf16 %v494_v56  ;;  %v502_v36 = vld [vmem:[%s10632_s1 + $0x320] sm:$0xff] }
 0x102   :  { %v6084_v49 = vpop.f32.mrf.mxu0  ;;  %v6194_v52 = vpop.f32.mrf.mxu1  ;;  %2191 = vmatmul.mubr.bf16.gmra.mxu0 %v1269_v28  ;;  %v1278_v12 = vpack.c.bf16 %v1145_v33, %v1138_v27  ;;  %v1152_v14 = vadd.f32 %v928_v44, %v352_v43  ;;  %v1159_v16 = vadd.f32 %v935_v1, %v359_v50  ;;  %v709_v21 = vunpack.c.l.bf16 %v498_v2  ;;  %v503_v33 = vld [vmem:[%s10632_s1 + $0x328] ss:$28 sps:$4 sm:$0xff]  }
 0x103   :  { %v1810_v47 = vadd.f32 %v6083_v37, %v8533_v26  ;;  %v6195_v57 = vadd.f32 %v6194_v52, %v6193_v25  ;;  %2198 = vmatprep.mubr.bf16.mxu0 %v1277_v48  ;;  %v710_v22 = vunpack.c.h.bf16 %v498_v2  ;;  %v926_v23 = vmul.f32 0.5, %v702_v7 }
 0x104   :  { %v6085_v59 = vpop.f32.mrf.mxu0  ;;  %v6196_v4 = vpop.f32.mrf.mxu1  ;;  %v927_v15 = vmul.f32 0.5, %v703_v8  ;;  %6489 = vmatprep.mubr.msk.bf16.mxu1 %vm1699_vm0, %v1278_v12  ;;  %v1285_v28 = vpack.c.bf16 %v1159_v16, %v1152_v14  ;;  %v357_v31 = vunpack.c.l.bf16 %v8722_v55  ;;  %v933_v38 = vmul.f32 0.5, %v709_v21  ;;  %v159_v12 = vld [vmem:[%s10631_s0 + $0x360] ss:$28 sps:$4 sm:$0xff]  }
 0x105   :  { %v6086_v63 = vadd.f32 %v6085_v59, %v6084_v49  ;;  %v8734_v3 = vadd.f32 %v6195_v57, %v1810_v47  ;;  %v934_v0 = vmul.f32 0.5, %v710_v22  ;;  %v364_v10 = vunpack.c.l.bf16 %v150_v17  ;;  %v151_v57 = vld [vmem:[%s10631_s0 + $0x328] ss:$28 sps:$4 sm:$0xff]  }
 0x106   :  { %v6087_v5 = vpop.f32.mrf.mxu0  ;;  %v6197_v18 = vpop.f32.mrf.mxu1  ;;  %v1151_v25 = vadd.f32 %v927_v15, %v351_v61  ;;  %6490 = vmatmul.mubr.msk.bf16.gmra.mxu1 %vm1699_vm0, %v1285_v28  ;;  %v8756_v47 = vadd.f32 %v926_v23, %v350_v60  ;;  %v365_v48 = vunpack.c.h.bf16 %v150_v17  ;;  %v371_v51 = vunpack.c.l.bf16 %v154_v35 }
 0x107   :  { %v1815_v11 = vadd.f32 %v6086_v63, %v8533_v26  ;;  %v6198_v29 = vadd.f32 %v6197_v18, %v6196_v4  ;;  %v1158_v49 = vadd.f32 %v934_v0, %v358_v6  ;;  %v372_v52 = vunpack.c.h.bf16 %v154_v35  ;;  %v511_v18 = vld [vmem:[%s10632_s1 + $0x360] ss:$28 sps:$4 sm:$0xff]  }
 0x108   :  { %v6088_v19 = vpop.f32.mrf.mxu0  ;;  %v6199_v37 = vpop.f32.mrf.mxu1  ;;  %v716_v24 = vunpack.c.l.bf16 %v502_v36  ;;  %v717_v54 = vunpack.c.h.bf16 %v502_v36  ;;  %v723_v55 = vunpack.c.l.bf16 %v506_v41  ;;  %v724_v56 = vunpack.c.h.bf16 %v506_v41  ;;  %v158_v35 = vld [vmem:[%s10631_s0 + $0x358] sm:$0xff] }
 0x109   :  { %v6089_v30 = vadd.f32 %v6088_v19, %v6087_v5  ;;  %v8752_v42 = vadd.f32 %v6198_v29, %v1815_v11  ;;  %v1284_v59 = vpack.c.bf16 %v1158_v49, %v1151_v25  ;;  %v1157_v61 = vadd.f32 %v933_v38, %v357_v31 }
 0x10a   :  { %v6090_v45 = vpop.f32.mrf.mxu0  ;;  %v6200_v50 = vpop.f32.mrf.mxu1  ;;  %v940_v60 = vmul.f32 0.5, %v716_v24  ;;  %2199 = vmatmul.mubr.bf16.gmra.mxu0 %v1276_v58  ;;  %v941_v4 = vmul.f32 0.5, %v717_v54  ;;  %v947_v5 = vmul.f32 0.5, %v723_v55  ;;  %v948_v6 = vmul.f32 0.5, %v724_v56  ;;  %v162_v55 = vld [vmem:[%s10631_s0 + $0x374] sm:$0xff] }
 0x10b   :  { %v1818_v43 = vadd.f32 %v6089_v30, %v8533_v26  ;;  %v6201_v27 = vadd.f32 %v6200_v50, %v6199_v37  ;;  %2206 = vmatprep.mubr.bf16.mxu0 %v1284_v59  ;;  %v366_v11 = vunpack.c.l.bf16 %v151_v57  ;;  %v718_v17 = vunpack.c.l.bf16 %v503_v33 }
 0x10c   :  { %v6091_v39 = vpop.f32.mrf.mxu0  ;;  %v6202_v1 = vpop.f32.mrf.mxu1  ;;  %v8770_v8 = vadd.f32 %v940_v60, %v364_v10  ;;  %v1165_v40 = vadd.f32 %v941_v4, %v365_v48  ;;  %v1172_v58 = vadd.f32 %v948_v6, %v372_v52  ;;  %v8775_v16 = vadd.f32 %v947_v5, %v371_v51  ;;  %v510_v10 = vld [vmem:[%s10632_s1 + $0x358] sm:$0xff] }
 0x10d   :  { %v6092_v63 = vadd.f32 %v6091_v39, %v6090_v45  ;;  %v8767_v44 = vadd.f32 %v6201_v27, %v1818_v43  ;;  %v373_v22 = vunpack.c.h.bf16 %v151_v57  ;;  %v725_v23 = vunpack.c.h.bf16 %v503_v33  ;;  %v514_v27 = vld [vmem:[%s10632_s1 + $0x374] sm:$0xff] }
 0x10e   :  { %v6093_v2 = vpop.f32.mrf.mxu0  ;;  %v6203_v14 = vpop.f32.mrf.mxu1  ;;  %v1283_v15 = vpack.c.bf16 %v1157_v61, %v8756_v47  ;;  %v1291_v28 = vpack.c.bf16 %v1172_v58, %v1165_v40  ;;  %v942_v30 = vmul.f32 0.5, %v718_v17  ;;  %v380_v31 = vunpack.c.l.bf16 %v159_v12 }
 0x10f   :  { %v1823_v7 = vadd.f32 %v6092_v63, %v8533_v26  ;;  %v6204_v19 = vadd.f32 %v6203_v14, %v6202_v1  ;;  %v949_v0 = vmul.f32 0.5, %v725_v23  ;;  %v732_v25 = vunpack.c.l.bf16 %v511_v18 }
 0x110   :  { %v6094_v34 = vpop.f32.mrf.mxu0  ;;  %v6205_v29 = vpop.f32.mrf.mxu1  ;;  %v1290_v43 = vpack.c.bf16 %v8775_v16, %v8770_v8  ;;  %v1166_v45 = vadd.f32 %v942_v30, %v366_v11  ;;  %v387_v47 = vunpack.c.h.bf16 %v159_v12  ;;  %v739_v48 = vunpack.c.h.bf16 %v511_v18 }
 0x111   :  { %v6095_v21 = vadd.f32 %v6094_v34, %v6093_v2  ;;  %v8784_v36 = vadd.f32 %v6204_v19, %v1823_v7  ;;  %v1173_v51 = vadd.f32 %v949_v0, %v373_v22  ;;  %v956_v52 = vmul.f32 0.5, %v732_v25 }
 0x112   :  { %v6096_v38 = vpop.f32.mrf.mxu0  ;;  %v6206_v41 = vpop.f32.mrf.mxu1  ;;  %v378_v24 = vunpack.c.l.bf16 %v158_v35  ;;  %2207 = vmatmul.mubr.bf16.gmra.mxu0 %v1283_v15  ;;  %v963_v54 = vmul.f32 0.5, %v739_v48  ;;  %v379_v56 = vunpack.c.h.bf16 %v158_v35  ;;  %v730_v57 = vunpack.c.l.bf16 %v510_v10 }
 0x113   :  { %v1826_v37 = vadd.f32 %v6095_v21, %v8533_v26  ;;  %v6207_v49 = vadd.f32 %v6206_v41, %v6205_v29  ;;  %2214 = vmatprep.mubr.bf16.mxu0 %v1291_v28  ;;  %v1292_v63 = vpack.c.bf16 %v1173_v51, %v1166_v45  ;;  %v1180_v33 = vadd.f32 %v956_v52, %v380_v31 }
 0x114   :  { %v6097_v50 = vpop.f32.mrf.mxu0  ;;  %v6208_v61 = vpop.f32.mrf.mxu1  ;;  %v731_v1 = vunpack.c.h.bf16 %v510_v10  ;;  %v1187_v4 = vadd.f32 %v963_v54, %v387_v47  ;;  %v737_v5 = vunpack.c.l.bf16 %v514_v27  ;;  %v738_v6 = vunpack.c.h.bf16 %v514_v27 }
 0x115   :  { %v6098_v39 = vadd.f32 %v6097_v50, %v6096_v38  ;;  %v8798_v59 = vadd.f32 %v6207_v49, %v1826_v37  ;;  %6493 = vmatprep.mubr.msk.bf16.mxu1 %vm1699_vm0, %v1292_v63  ;;  %v385_v11 = vunpack.c.l.bf16 %v162_v55  ;;  %v386_v12 = vunpack.c.h.bf16 %v162_v55 }
 0x116   :  { %v6099_v60 = vpop.f32.mrf.mxu0  ;;  %v6209_v7 = vpop.f32.mrf.mxu1  ;;  %v954_v14 = vmul.f32 0.5, %v730_v57  ;;  %v955_v34 = vmul.f32 0.5, %v731_v1  ;;  %v1299_v58 = vpack.c.bf16 %v1187_v4, %v1180_v33  ;;  %v961_v17 = vmul.f32 0.5, %v737_v5 }
 0x117   :  { %v1831_v2 = vadd.f32 %v6098_v39, %v8533_v26  ;;  %v6210_v40 = vadd.f32 %v6209_v7, %v6208_v61  ;;  %v962_v19 = vmul.f32 0.5, %v738_v6 }
 0x118   :  { %v6100_v8 = vpop.f32.mrf.mxu0  ;;  %v6211_v18 = vpop.f32.mrf.mxu1  ;;  %v1179_v21 = vadd.f32 %v955_v34, %v379_v56  ;;  %6494 = vmatmul.mubr.msk.bf16.gmra.mxu1 %vm1699_vm0, %v1299_v58  ;;  %v1178_v31 = vadd.f32 %v954_v14, %v378_v24  ;;  %v1185_v35 = vadd.f32 %v961_v17, %v385_v11 }
 0x119   :  { %v6101_v16 = vadd.f32 %v6100_v8, %v6099_v60  ;;  %v8802_v22 = vadd.f32 %v6210_v40, %v1831_v2  ;;  %v1186_v29 = vadd.f32 %v962_v19, %v386_v12 }
 0x11a   :  { %v6102_v15 = vpop.f32.mrf.mxu0  ;;  %v6212_v28 = vpop.f32.mrf.mxu1  ;;  %2215 = vmatmul.mubr.bf16.gmra.mxu0 %v1290_v43  ;;  %v1297_v47 = vpack.c.bf16 %v1185_v35, %v1178_v31 }
 0x11b   :  { %v1834_v23 = vadd.f32 %v6101_v16, %v8533_v26  ;;  %v6213_v30 = vadd.f32 %v6212_v28, %v6211_v18  ;;  %v1298_v38 = vpack.c.bf16 %v1186_v29, %v1179_v21 }
 0x11c   :  { %v6103_v37 = vpop.f32.mrf.mxu0  ;;  %v6214_v10 = vpop.f32.mrf.mxu1 }
 0x11d   :  { %v6104_v0 = vadd.f32 %v6103_v37, %v6102_v15  ;;  %v8806_v25 = vadd.f32 %v6213_v30, %v1834_v23  ;;  %2222 = vmatprep.mubr.bf16.mxu0 %v1298_v38 }
 0x11e   :  { %v6105_v41 = vpop.f32.mrf.mxu0  ;;  %v6215_v48 = vpop.f32.mrf.mxu1 }
 0x11f   :  { %v1839_v45 = vadd.f32 %v6104_v0, %v8533_v26  ;;  %v6216_v50 = vadd.f32 %v6215_v48, %v6214_v10 }
 0x120   :  { %v6106_v49 = vpop.f32.mrf.mxu0  ;;  %v6217_v52 = vpop.f32.mrf.mxu1 }
 0x121   :  { %v6107_v51 = vadd.f32 %v6106_v49, %v6105_v41  ;;  %v8809_v43 = vadd.f32 %v6216_v50, %v1839_v45 }
 0x122   :  { %v6108_v27 = vpop.f32.mrf.mxu0  ;;  %2223 = vmatmul.mubr.bf16.gmra.mxu0 %v1297_v47  ;;  %v6218_v39 = vpop.f32.mrf.mxu1 }
 0x123   :  { %v1842_v24 = vadd.f32 %v6107_v51, %v8533_v26  ;;  %v6219_v54 = vadd.f32 %v6218_v39, %v6217_v52 }
 0x124   :  { %v6109_v55 = vpop.f32.mrf.mxu0 }
 0x125   :  { %v6110_v56 = vadd.f32 %v6109_v55, %v6108_v27  ;;  %v8812_v57 = vadd.f32 %v6219_v54, %v1842_v24  ;;  %v6220_v61 = vpop.f32.mrf.mxu1 }
 0x126   :  { %v6111_v63 = vpop.f32.mrf.mxu0 }
 0x127   :  { %v1847_v60 = vadd.f32 %v6110_v56, %v8533_v26  ;;  %v6221_v33 = vpop.f32.mrf.mxu1 }
 0x128   :  { %v6112_v1 = vpop.f32.mrf.mxu0  ;;  %v6222_v2 = vadd.f32 %v6221_v33, %v6220_v61 }
 0x129   :  { %v6113_v4 = vadd.f32 %v6112_v1, %v6111_v63  ;;  %v6223_v5 = vpop.f32.mrf.mxu1 }
 0x12a   :  { %v8815_v6 = vadd.f32 %v6222_v2, %v1847_v60  ;;  %v6114_v8 = vpop.f32.mrf.mxu0 }
 0x12b   :  { %v1850_v7 = vadd.f32 %v6113_v4, %v8533_v26  ;;  %v6224_v11 = vpop.f32.mrf.mxu1 }
 0x12c   :  { %v6225_v12 = vadd.f32 %v6224_v11, %v6223_v5  ;;  %v6115_v14 = vpop.f32.mrf.mxu0 }
 0x12d   :  { %v6116_v34 = vadd.f32 %v6115_v14, %v6114_v8 }
 0x12e   :  { %v8818_v40 = vadd.f32 %v6225_v12, %v1850_v7  ;;  %v6226_v58 = vpop.f32.mrf.mxu1  ;;  %v6117_v16 = vpop.f32.mrf.mxu0 }
 0x12f   :  { %v1855_v17 = vadd.f32 %v6116_v34, %v8533_v26 }
 0x130   :  { %v6227_v18 = vpop.f32.mrf.mxu1  ;;  %v6118_v19 = vpop.f32.mrf.mxu0 }
 0x131   :  { %v6228_v21 = vadd.f32 %v6227_v18, %v6226_v58  ;;  %v6119_v23 = vadd.f32 %v6118_v19, %v6117_v16 }
 0x132   :  { %v6229_v15 = vpop.f32.mrf.mxu1 }
 0x133   :  { %v8821_v29 = vadd.f32 %v6228_v21, %v1855_v17  ;;  %v1858_v28 = vadd.f32 %v6119_v23, %v8533_v26  ;;  %v6120_v30 = vpop.f32.mrf.mxu0 }
 0x134   :  { %v6230_v31 = vpop.f32.mrf.mxu1 }
 0x135   :  { %v6231_v35 = vadd.f32 %v6230_v31, %v6229_v15  ;;  %v6121_v37 = vpop.f32.mrf.mxu0 }
 0x136   :  { %v6122_v38 = vadd.f32 %v6121_v37, %v6120_v30 }
 0x137   :  { %v8824_v0 = vadd.f32 %v6231_v35, %v1858_v28  ;;  %v6232_v10 = vpop.f32.mrf.mxu1  ;;  %v6123_v41 = vpop.f32.mrf.mxu0 }
 0x138   :  { %v1863_v45 = vadd.f32 %v6122_v38, %v8533_v26 }
 0x139   :  { %v6233_v47 = vpop.f32.mrf.mxu1  ;;  %v6124_v48 = vpop.f32.mrf.mxu0 }
 0x13a   :  { %v6234_v49 = vadd.f32 %v6233_v47, %v6232_v10  ;;  %v6125_v50 = vadd.f32 %v6124_v48, %v6123_v41  ;;  %v6687_v47 = vld [vmem:[%s10635_s6 + $0x8] sm:$0xff]  }
 0x13b   :  { %v6235_v51 = vpop.f32.mrf.mxu1  ;;  %6545 = vmatprep.subr.bf16.mxu0 %v6687_v47 }
 0x13c   :  { %v8827_v52 = vadd.f32 %v6234_v49, %v1863_v45  ;;  %v1866_v24 = vadd.f32 %v6125_v50, %v8533_v26  ;;  %v6126_v27 = vpop.f32.mrf.mxu0  ;;  %6546 = vmatpush3.bf16.msra.mxu0 %v6687_v47 }
 0x13d   :  { %v6236_v39 = vpop.f32.mrf.mxu1 }
 0x13e   :  { %v6237_v54 = vadd.f32 %v6236_v39, %v6235_v51  ;;  %v6127_v55 = vpop.f32.mrf.mxu0 }
 0x13f   :  { %v6128_v56 = vadd.f32 %v6127_v55, %v6126_v27 }
 0x140   :  { %v8830_v61 = vadd.f32 %v6237_v54, %v1866_v24  ;;  %v6238_v63 = vpop.f32.mrf.mxu1  ;;  %v6129_v60 = vpop.f32.mrf.mxu0 }
 0x141   :  { %v1871_v33 = vadd.f32 %v6128_v56, %v8533_v26 }
 0x142   :  { %v6239_v1 = vpop.f32.mrf.mxu1  ;;  %v6130_v2 = vpop.f32.mrf.mxu0 }
 0x143   :  { %v6240_v4 = vadd.f32 %v6239_v1, %v6238_v63  ;;  %v6131_v5 = vadd.f32 %v6130_v2, %v6129_v60 }
 0x144   :  { %v6241_v7 = vpop.f32.mrf.mxu1 }
 0x145   :  { %v8833_v8 = vadd.f32 %v6240_v4, %v1871_v33  ;;  %v1874_v11 = vadd.f32 %v6131_v5, %v8533_v26  ;;  %v6132_v12 = vpop.f32.mrf.mxu0 }
 0x146   :  { %v6242_v14 = vpop.f32.mrf.mxu1 }
 0x147   :  { %v6243_v34 = vadd.f32 %v6242_v14, %v6241_v7  ;;  %v6133_v58 = vpop.f32.mrf.mxu0  ;;  %v7665_v14 = vld [vmem:[%s10634_s3] ss:$0 sm:$0xff] }
 0x148   :  { %v6134_v16 = vadd.f32 %v6133_v58, %v6132_v12 }
 0x149   :  { %v8836_v17 = vadd.f32 %v6243_v34, %v1874_v11  ;;  %v6244_v18 = vpop.f32.mrf.mxu1  ;;  %v6135_v19 = vpop.f32.mrf.mxu0 }
 0x14a   :  { %v1879_v21 = vadd.f32 %v6134_v16, %v8533_v26 }
 0x14b   :  { %v6245_v23 = vpop.f32.mrf.mxu1  ;;  %v6136_v15 = vpop.f32.mrf.mxu0 }
 0x14c   :  { %v6246_v28 = vadd.f32 %v6245_v23, %v6244_v18  ;;  %v6137_v30 = vadd.f32 %v6136_v15, %v6135_v19 }
 0x14d   :  { %v6247_v31 = vpop.f32.mrf.mxu1 }
 0x14e   :  { %v8839_v35 = vadd.f32 %v6246_v28, %v1879_v21  ;;  %v1882_v37 = vadd.f32 %v6137_v30, %v8533_v26  ;;  %v6138_v38 = vpop.f32.mrf.mxu0 }
 0x14f   :  { %v6248_v10 = vpop.f32.mrf.mxu1 }
 0x150   :  { %v6249_v41 = vadd.f32 %v6248_v10, %v6247_v31  ;;  %v6139_v45 = vpop.f32.mrf.mxu0 }
 0x151   :  { %v6140_v48 = vadd.f32 %v6139_v45, %v6138_v38 }
 0x152   :  { %v8845_v49 = vadd.f32 %v6249_v41, %v1882_v37  ;;  %v6250_v50 = vpop.f32.mrf.mxu1  ;;  %v6141_v51 = vpop.f32.mrf.mxu0 }
 0x153   :  { %v1887_v24 = vadd.f32 %v6140_v48, %v8533_v26 }
 0x154   :  { %v6251_v27 = vpop.f32.mrf.mxu1  ;;  %v6142_v39 = vpop.f32.mrf.mxu0 }
 0x155   :  { %v6252_v54 = vadd.f32 %v6251_v27, %v6250_v50  ;;  %v6143_v55 = vadd.f32 %v6142_v39, %v6141_v51 }
 0x156   :  { %v6253_v56 = vpop.f32.mrf.mxu1 }
 0x157   :  { %v8848_v63 = vadd.f32 %v6252_v54, %v1887_v24  ;;  %v1890_v60 = vadd.f32 %v6143_v55, %v8533_v26  ;;  %v6144_v33 = vpop.f32.mrf.mxu0 }
 0x158   :  { %v6254_v1 = vpop.f32.mrf.mxu1 }
 0x159   :  { %v6255_v2 = vadd.f32 %v6254_v1, %v6253_v56  ;;  %v6145_v4 = vpop.f32.mrf.mxu0 }
 0x15a   :  { %v6146_v5 = vadd.f32 %v6145_v4, %v6144_v33 }
 0x15b   :  { %v8851_v7 = vadd.f32 %v6255_v2, %v1890_v60  ;;  %v6256_v11 = vpop.f32.mrf.mxu1  ;;  %v6147_v12 = vpop.f32.mrf.mxu0 }
 0x15c   :  { %v1895_v34 = vadd.f32 %v7665_v14, %v6146_v5 }
 0x15d   :  { %v6257_v58 = vpop.f32.mrf.mxu1  ;;  %v6148_v16 = vpop.f32.mrf.mxu0 }
 0x15e   :  { %v6258_v18 = vadd.f32 %v6257_v58, %v6256_v11  ;;  %v6149_v19 = vadd.f32 %v6148_v16, %v6147_v12 }
 0x15f   :  { %v6259_v21 = vpop.f32.mrf.mxu1 }
 0x160   :  { %v8856_v26 = vadd.f32 %v6258_v18, %v1895_v34  ;;  %v1898_v23 = vadd.f32 %v7665_v14, %v6149_v19  ;;  %v6150_v15 = vpop.f32.mrf.mxu0 }
 0x161   :  { %v6260_v28 = vpop.f32.mrf.mxu1 }
 0x162   :  { %v6261_v30 = vadd.f32 %v6260_v28, %v6259_v21  ;;  %v6151_v31 = vpop.f32.mrf.mxu0  ;;  %v6688_v21 = vld [vmem:[%s10635_s6] sm:$0xff]  }
 0x163   :  { %v6152_v37 = vadd.f32 %v6151_v31, %v6150_v15  ;;  %6547 = vmatprep.subr.bf16.mxu0 %v6688_v21 }
 0x164   :  { %v8858_v38 = vadd.f32 %v6261_v30, %v1898_v23  ;;  %v6262_v10 = vpop.f32.mrf.mxu1  ;;  %v6153_v41 = vpop.f32.mrf.mxu0  ;;  %6548 = vmatpush3.bf16.msra.mxu0 %v6688_v21 }
 0x165   :  { %v1903_v45 = vadd.f32 %v7665_v14, %v6152_v37 }
 0x166   :  { %v6263_v47 = vpop.f32.mrf.mxu1  ;;  %v6154_v48 = vpop.f32.mrf.mxu0 }
 0x167   :  { %v6264_v50 = vadd.f32 %v6263_v47, %v6262_v10  ;;  %v6155_v51 = vadd.f32 %v6154_v48, %v6153_v41 }
 0x168   :  { %v6265_v24 = vpop.f32.mrf.mxu1 }
 0x169   :  { %v8860_v27 = vadd.f32 %v6264_v50, %v1903_v45  ;;  %v1906_v39 = vadd.f32 %v7665_v14, %v6155_v51  ;;  %v6284_v54 = vpop.f32.mrf.mxu0 }
 0x16a   :  { %v6266_v55 = vpop.f32.mrf.mxu1 }
 0x16b   :  { %v6267_v56 = vadd.f32 %v6266_v55, %v6265_v24  ;;  %v6285_v60 = vpop.f32.mrf.mxu0 }
 0x16c   :  { %v6286_v33 = vadd.f32 %v6285_v60, %v6284_v54 }
 0x16d   :  { %v8862_v1 = vadd.f32 %v6267_v56, %v1906_v39  ;;  %v6287_v2 = vpop.f32.mrf.mxu0  ;;  %v6467_v4 = vpop.f32.mrf.mxu1 }
 0x16e   :  { %v2105_v5 = vadd.f32 %v6286_v33, %v8579_v9 }
 0x16f   :  { %v6288_v11 = vpop.f32.mrf.mxu0  ;;  %v2265_v12 = vpop.f32.mrf.mxu1 }
 0x170   :  { %v6289_v34 = vadd.f32 %v6288_v11, %v6287_v2  ;;  %v2266_v16 = vadd.f32 %v2265_v12, %v2105_v5 }
 0x171   :  { %v6468_v58 = vpop.f32.mrf.mxu1 }
 0x172   :  { %v6290_v18 = vpop.f32.mrf.mxu0  ;;  %v2108_v19 = vadd.f32 %v6289_v34, %v8594_v32  ;;  %v2392_v30 = vmax.f32 %v2266_v16, 0.0 }
 0x173   :  { %v2268_v14 = vpop.f32.mrf.mxu1 }
 0x174   :  { %v6291_v23 = vpop.f32.mrf.mxu0  ;;  %v2269_v15 = vadd.f32 %v2268_v14, %v2108_v19 }
 0x175   :  { %v6292_v28 = vadd.f32 %v6291_v23, %v6290_v18 }
 0x176   :  { %v2393_v31 = vmax.f32 %v2269_v15, 0.0  ;;  %v6293_v9 = vpop.f32.mrf.mxu0 }
 0x177   :  { %v2113_v37 = vadd.f32 %v6292_v28, %v8624_v62 }
 0x178   :  { %v6294_v10 = vpop.f32.mrf.mxu0  ;;  %v2424_v41 = vpack.c.bf16 %v2393_v31, %v2392_v30 }
 0x179   :  { %v6295_v45 = vadd.f32 %v6294_v10, %v6293_v9  ;;  %v2274_v32 = vadd.f32 %v6467_v4, %v2113_v37 }
 0x17a   :  { %v6296_v47 = vpop.f32.mrf.mxu0  ;;  %6513 = vmatprep.mubr.bf16.mxu1 %v2424_v41 }
 0x17b   :  { %v2116_v48 = vadd.f32 %v6295_v45, %v8647_v20  ;;  %v6471_v50 = vpop.f32.mrf.mxu1  ;;  %v2394_v56 = vmax.f32 %v2274_v32, 0.0 }
 0x17c   :  { %v6297_v51 = vpop.f32.mrf.mxu0 }
 0x17d   :  { %v2277_v24 = vadd.f32 %v6468_v58, %v2116_v48  ;;  %v6298_v39 = vadd.f32 %v6297_v51, %v6296_v47  ;;  %v2281_v54 = vpop.f32.mrf.mxu1 }
 0x17e   :  { %v6299_v55 = vpop.f32.mrf.mxu0 }
 0x17f   :  { %v2395_v60 = vmax.f32 %v2277_v24, 0.0  ;;  %v2121_v33 = vadd.f32 %v6298_v39, %v8672_v53  ;;  %v6472_v2 = vpop.f32.mrf.mxu1 }
 0x180   :  { %v6300_v62 = vpop.f32.mrf.mxu0 }
 0x181   :  { %v2425_v5 = vpack.c.bf16 %v2395_v60, %v2394_v56  ;;  %v6301_v11 = vadd.f32 %v6300_v62, %v6299_v55  ;;  %v2284_v34 = vpop.f32.mrf.mxu1  ;;  %v2282_v16 = vadd.f32 %v2281_v54, %v2121_v33 }
 0x182   :  { %v6302_v12 = vpop.f32.mrf.mxu0 }
 0x183   :  { %6514 = vmatmul.mubr.bf16.vlgmr.msra.gmra.mxu1 %v2425_v5  ;;  %v2124_v20 = vadd.f32 %v6301_v11, %v8690_v13  ;;  %v2396_v14 = vmax.f32 %v2282_v16, 0.0 }
 0x184   :  { %v6303_v4 = vpop.f32.mrf.mxu0 }
 0x185   :  { %v6304_v18 = vadd.f32 %v6303_v4, %v6302_v12  ;;  %v2285_v58 = vadd.f32 %v2284_v34, %v2124_v20 }
 0x186   :  { %v6305_v19 = vpop.f32.mrf.mxu0 }
 0x187   :  { %v2129_v21 = vadd.f32 %v6304_v18, %v8713_v46  ;;  %v2397_v23 = vmax.f32 %v2285_v58, 0.0 }
 0x188   :  { %v6306_v15 = vpop.f32.mrf.mxu0  ;;  %v6475_v53 = vpop.f32.mrf.mxu1 }
 0x189   :  { %v6307_v28 = vadd.f32 %v6306_v15, %v6305_v19  ;;  %v2426_v30 = vpack.c.bf16 %v2397_v23, %v2396_v14  ;;  %v2290_v37 = vadd.f32 %v6471_v50, %v2129_v21 }
 0x18a   :  { %v6308_v31 = vpop.f32.mrf.mxu0  ;;  %v2297_v9 = vpop.f32.mrf.mxu1 }
 0x18b   :  { %v2132_v10 = vadd.f32 %v6307_v28, %v8734_v3  ;;  %6517 = vmatprep.mubr.bf16.mxu1 %v2426_v30  ;;  %v2398_v48 = vmax.f32 %v2290_v37, 0.0 }
 0x18c   :  { %v6309_v41 = vpop.f32.mrf.mxu0  ;;  %v6476_v32 = vpop.f32.mrf.mxu1 }
 0x18d   :  { %v2293_v13 = vadd.f32 %v6472_v2, %v2132_v10  ;;  %v6310_v45 = vadd.f32 %v6309_v41, %v6308_v31 }
 0x18e   :  { %v6311_v47 = vpop.f32.mrf.mxu0  ;;  %v2300_v56 = vpop.f32.mrf.mxu1 }
 0x18f   :  { %v2137_v51 = vadd.f32 %v6310_v45, %v8752_v42  ;;  %v2399_v46 = vmax.f32 %v2293_v13, 0.0 }
 0x190   :  { %v6312_v24 = vpop.f32.mrf.mxu0 }
 0x191   :  { %v6313_v39 = vadd.f32 %v6312_v24, %v6311_v47  ;;  %v2427_v54 = vpack.c.bf16 %v2399_v46, %v2398_v48  ;;  %v2298_v60 = vadd.f32 %v2297_v9, %v2137_v51 }
 0x192   :  { %v6314_v55 = vpop.f32.mrf.mxu0 }
 0x193   :  { %6518 = vmatmul.mubr.bf16.gmra.mxu1 %v2427_v54  ;;  %v2140_v50 = vadd.f32 %v6313_v39, %v8767_v44  ;;  %v2400_v11 = vmax.f32 %v2298_v60, 0.0 }
 0x194   :  { %v6315_v3 = vpop.f32.mrf.mxu0 }
 0x195   :  { %v6316_v33 = vadd.f32 %v6315_v3, %v6314_v55  ;;  %v2301_v62 = vadd.f32 %v2300_v56, %v2140_v50 }
 0x196   :  { %v6317_v2 = vpop.f32.mrf.mxu0  ;;  %v6479_v5 = vpop.f32.mrf.mxu1 }
 0x197   :  { %v2145_v12 = vadd.f32 %v6316_v33, %v8784_v36  ;;  %v2401_v34 = vmax.f32 %v2301_v62, 0.0 }
 0x198   :  { %v6318_v42 = vpop.f32.mrf.mxu0  ;;  %v2313_v18 = vpop.f32.mrf.mxu1 }
 0x199   :  { %v6319_v16 = vadd.f32 %v6318_v42, %v6317_v2  ;;  %v2428_v20 = vpack.c.bf16 %v2401_v34, %v2400_v11  ;;  %v2306_v58 = vadd.f32 %v6475_v53, %v2145_v12 }
 0x19a   :  { %v6320_v4 = vpop.f32.mrf.mxu0  ;;  %v6480_v15 = vpop.f32.mrf.mxu1 }
 0x19b   :  { %v2148_v19 = vadd.f32 %v6319_v16, %v8798_v59  ;;  %6521 = vmatprep.mubr.bf16.mxu1 %v2428_v20  ;;  %v2402_v28 = vmax.f32 %v2306_v58, 0.0 }
 0x19c   :  { %v6321_v14 = vpop.f32.mrf.mxu0  ;;  %v2316_v41 = vpop.f32.mrf.mxu1 }
 0x19d   :  { %v2309_v44 = vadd.f32 %v6476_v32, %v2148_v19  ;;  %v6322_v21 = vadd.f32 %v6321_v14, %v6320_v4 }
 0x19e   :  { %v6323_v23 = vpop.f32.mrf.mxu0 }
 0x19f   :  { %v2153_v30 = vadd.f32 %v6322_v21, %v8802_v22  ;;  %v2403_v31 = vmax.f32 %v2309_v44, 0.0 }
 0x1a0   :  { %v6324_v36 = vpop.f32.mrf.mxu0 }
 0x1a1   :  { %v6325_v9 = vadd.f32 %v6324_v36, %v6323_v23  ;;  %v2429_v37 = vpack.c.bf16 %v2403_v31, %v2402_v28  ;;  %v2314_v13 = vadd.f32 %v2313_v18, %v2153_v30 }
 0x1a2   :  { %v6326_v10 = vpop.f32.mrf.mxu0 }
 0x1a3   :  { %6522 = vmatmul.mubr.bf16.gmra.mxu1 %v2429_v37  ;;  %v2156_v53 = vadd.f32 %v6325_v9, %v8806_v25  ;;  %v6483_v48 = vpop.f32.mrf.mxu1  ;;  %v2404_v51 = vmax.f32 %v2314_v13, 0.0 }
 0x1a4   :  { %v6327_v59 = vpop.f32.mrf.mxu0 }
 0x1a5   :  { %v6328_v45 = vadd.f32 %v6327_v59, %v6326_v10  ;;  %v2317_v47 = vadd.f32 %v2316_v41, %v2156_v53  ;;  %v2329_v56 = vpop.f32.mrf.mxu1 }
 0x1a6   :  { %v6329_v32 = vpop.f32.mrf.mxu0 }
 0x1a7   :  { %v2161_v46 = vadd.f32 %v6328_v45, %v8809_v43  ;;  %v2405_v24 = vmax.f32 %v2317_v47, 0.0  ;;  %v6484_v2 = vpop.f32.mrf.mxu1 }
 0x1a8   :  { %v6330_v22 = vpop.f32.mrf.mxu0 }
 0x1a9   :  { %v6331_v39 = vadd.f32 %v6330_v22, %v6329_v32  ;;  %v2430_v54 = vpack.c.bf16 %v2405_v24, %v2404_v51  ;;  %v2322_v60 = vadd.f32 %v6479_v5, %v2161_v46  ;;  %v2332_v4 = vpop.f32.mrf.mxu1 }
 0x1aa   :  { %v6332_v55 = vpop.f32.mrf.mxu0 }
 0x1ab   :  { %v2164_v50 = vadd.f32 %v6331_v39, %v8812_v57  ;;  %6525 = vmatprep.mubr.bf16.mxu1 %v2430_v54  ;;  %v2406_v11 = vmax.f32 %v2322_v60, 0.0 }
 0x1ac   :  { %v6333_v3 = vpop.f32.mrf.mxu0 }
 0x1ad   :  { %v2325_v25 = vadd.f32 %v6480_v15, %v2164_v50  ;;  %v6334_v33 = vadd.f32 %v6333_v3, %v6332_v55 }
 0x1ae   :  { %v6335_v62 = vpop.f32.mrf.mxu0 }
 0x1af   :  { %v2169_v12 = vadd.f32 %v6334_v33, %v8815_v6  ;;  %v2407_v34 = vmax.f32 %v2325_v25, 0.0 }
 0x1b0   :  { %v6336_v43 = vpop.f32.mrf.mxu0 }
 0x1b1   :  { %v6337_v42 = vadd.f32 %v6336_v43, %v6335_v62  ;;  %v2431_v16 = vpack.c.bf16 %v2407_v34, %v2406_v11  ;;  %v2330_v18 = vadd.f32 %v2329_v56, %v2169_v12 }
 0x1b2   :  { %v6338_v20 = vpop.f32.mrf.mxu0 }
 0x1b3   :  { %6526 = vmatmul.mubr.bf16.gmra.mxu1 %v2431_v16  ;;  %v2172_v5 = vadd.f32 %v6337_v42, %v8818_v40  ;;  %v2408_v21 = vmax.f32 %v2330_v18, 0.0 }
 0x1b4   :  { %v6339_v57 = vpop.f32.mrf.mxu0 }
 0x1b5   :  { %v6340_v58 = vadd.f32 %v6339_v57, %v6338_v20  ;;  %v2333_v19 = vadd.f32 %v2332_v4, %v2172_v5  ;;  %v6487_v44 = vpop.f32.mrf.mxu1 }
 0x1b6   :  { %v6341_v14 = vpop.f32.mrf.mxu0 }
 0x1b7   :  { %v2177_v23 = vadd.f32 %v6340_v58, %v8821_v29  ;;  %v2409_v15 = vmax.f32 %v2333_v19, 0.0  ;;  %v2345_v36 = vpop.f32.mrf.mxu1 }
 0x1b8   :  { %v6342_v6 = vpop.f32.mrf.mxu0 }
 0x1b9   :  { %v6343_v28 = vadd.f32 %v6342_v6, %v6341_v14  ;;  %v2432_v30 = vpack.c.bf16 %v2409_v15, %v2408_v21  ;;  %v2338_v9 = vadd.f32 %v6483_v48, %v2177_v23  ;;  %v6488_v53 = vpop.f32.mrf.mxu1 }
 0x1ba   :  { %v6344_v31 = vpop.f32.mrf.mxu0 }
 0x1bb   :  { %v2180_v37 = vadd.f32 %v6343_v28, %v8824_v0  ;;  %6529 = vmatprep.mubr.bf16.mxu1 %v2432_v30  ;;  %v2410_v59 = vmax.f32 %v2338_v9, 0.0  ;;  %v2348_v24 = vpop.f32.mrf.mxu1 }
 0x1bc   :  { %v6345_v10 = vpop.f32.mrf.mxu0 }
 0x1bd   :  { %v2341_v40 = vadd.f32 %v6484_v2, %v2180_v37  ;;  %v6346_v41 = vadd.f32 %v6345_v10, %v6344_v31 }
 0x1be   :  { %v6347_v13 = vpop.f32.mrf.mxu0 }
 0x1bf   :  { %v2411_v45 = vmax.f32 %v2341_v40, 0.0  ;;  %v2185_v47 = vadd.f32 %v6346_v41, %v8827_v52 }
 0x1c0   :  { %v6348_v29 = vpop.f32.mrf.mxu0 }
 0x1c1   :  { %v6349_v32 = vadd.f32 %v6348_v29, %v6347_v13  ;;  %v2433_v51 = vpack.c.bf16 %v2411_v45, %v2410_v59  ;;  %v2346_v22 = vadd.f32 %v2345_v36, %v2185_v47 }
 0x1c2   :  { %v6350_v46 = vpop.f32.mrf.mxu0 }
 0x1c3   :  { %6530 = vmatmul.mubr.bf16.gmra.mxu1 %v2433_v51  ;;  %v2188_v48 = vadd.f32 %v6349_v32, %v8830_v61  ;;  %v2412_v60 = vmax.f32 %v2346_v22, 0.0 }
 0x1c4   :  { %v6351_v0 = vpop.f32.mrf.mxu0 }
 0x1c5   :  { %v6352_v39 = vadd.f32 %v6351_v0, %v6350_v46  ;;  %v2349_v54 = vadd.f32 %v2348_v24, %v2188_v48 }
 0x1c6   :  { %v6353_v55 = vpop.f32.mrf.mxu0  ;;  %v6491_v56 = vpop.f32.mrf.mxu1 }
 0x1c7   :  { %v2193_v50 = vadd.f32 %v6352_v39, %v8833_v8  ;;  %v2413_v3 = vmax.f32 %v2349_v54, 0.0 }
 0x1c8   :  { %v6354_v25 = vpop.f32.mrf.mxu0  ;;  %v2361_v2 = vpop.f32.mrf.mxu1 }
 0x1c9   :  { %v6355_v52 = vadd.f32 %v6354_v25, %v6353_v55  ;;  %v2434_v33 = vpack.c.bf16 %v2413_v3, %v2412_v60  ;;  %v2354_v11 = vadd.f32 %v6487_v44, %v2193_v50 }
 0x1ca   :  { %v6356_v62 = vpop.f32.mrf.mxu0  ;;  %v6492_v16 = vpop.f32.mrf.mxu1 }
 0x1cb   :  { %v2196_v12 = vadd.f32 %v6355_v52, %v8836_v17  ;;  %6533 = vmatprep.mubr.bf16.mxu1 %v2434_v33  ;;  %v2414_v20 = vmax.f32 %v2354_v11, 0.0 }
 0x1cc   :  { %v6357_v34 = vpop.f32.mrf.mxu0  ;;  %v2364_v19 = vpop.f32.mrf.mxu1 }
 0x1cd   :  { %v2357_v61 = vadd.f32 %v6488_v53, %v2196_v12  ;;  %v6358_v43 = vadd.f32 %v6357_v34, %v6356_v62  ;;  %v6694_v34 = vld [vmem:[%s10636_s8 + $0x154] ss:$28 sps:$4 sm:$0xff]  }
 0x1ce   :  { %v6359_v42 = vpop.f32.mrf.mxu0 }
 0x1cf   :  { %v2415_v4 = vmax.f32 %v2357_v61, 0.0  ;;  %v2201_v18 = vadd.f32 %v6358_v43, %v8839_v35 }
 0x1d0   :  { %v6360_v8 = vpop.f32.mrf.mxu0 }
 0x1d1   :  { %v6361_v5 = vadd.f32 %v6360_v8, %v6359_v42  ;;  %v2435_v57 = vpack.c.bf16 %v2415_v4, %v2414_v20  ;;  %v2362_v14 = vadd.f32 %v2361_v2, %v2201_v18  ;;  %v6697_v42 = vld [vmem:[%s10636_s8 + $0x11c] ss:$28 sps:$4 sm:$0xff]   ;;  %v6706_v4 = vld [vmem:[%s10636_s8 + $0x194] ss:$28 sps:$4 sm:$0xff]  }
 0x1d2   :  { %v6362_v58 = vpop.f32.mrf.mxu0  ;;  %v6695_v18 = vld [vmem:[%s10636_s8 + $0x118] ss:$28 sps:$4 sm:$0xff]   ;;  %3551 = vmatprep.subr.bf16.mxu0 %v6706_v4 }
 0x1d3   :  { %6534 = vmatmul.mubr.bf16.gmra.mxu1 %v2435_v57  ;;  %v2204_v44 = vadd.f32 %v6361_v5, %v8845_v49  ;;  %v2416_v6 = vmax.f32 %v2362_v14, 0.0  ;;  %v6700_v57 = vld [vmem:[%s10636_s8 + $0xe4] ss:$28 sps:$4 sm:$0xff]  }
 0x1d4   :  { %v6363_v17 = vpop.f32.mrf.mxu0 }
 0x1d5   :  { %v6364_v21 = vadd.f32 %v6363_v17, %v6362_v58  ;;  %v2365_v23 = vadd.f32 %v2364_v19, %v2204_v44  ;;  %v6698_v44 = vld [vmem:[%s10636_s8 + $0xe0] ss:$28 sps:$4 sm:$0xff]   ;;  %v6703_v17 = vld [vmem:[%s10636_s8 + $0xac] ss:$28 sps:$4 sm:$0xff]  }
 0x1d6   :  { %v6365_v15 = vpop.f32.mrf.mxu0 }
 0x1d7   :  { %v2209_v28 = vadd.f32 %v6364_v21, %v8848_v63  ;;  %v2417_v30 = vmax.f32 %v2365_v23, 0.0  ;;  %v6704_v23 = vld [vmem:[%s10636_s8 + $0x190] ss:$28 sps:$4 sm:$0xff]  }
 0x1d8   :  { %v6366_v31 = vpop.f32.mrf.mxu0  ;;  %v6495_v36 = vpop.f32.mrf.mxu1 }
 0x1d9   :  { %v6367_v35 = vadd.f32 %v6366_v31, %v6365_v15  ;;  %v2436_v9 = vpack.c.bf16 %v2417_v30, %v2416_v6  ;;  %v2370_v40 = vadd.f32 %v6491_v56, %v2209_v28  ;;  %v6709_v6 = vld [vmem:[%s10636_s8 + $0x15c] ss:$28 sps:$4 sm:$0xff]   ;;  %v6701_v28 = vld [vmem:[%s10636_s8 + $0xa8] ss:$28 sps:$4 sm:$0xff]   ;;  %v6712_v31 = vld [vmem:[%s10636_s8 + $0x74] ss:$28 sps:$4 sm:$0xff]  }
 0x1da   :  { %v6368_v37 = vpop.f32.mrf.mxu0  ;;  %v2377_v10 = vpop.f32.mrf.mxu1  ;;  %v6707_v30 = vld [vmem:[%s10636_s8 + $0x158] ss:$28 sps:$4 sm:$0xff]  }
 0x1db   :  { %v2212_v41 = vadd.f32 %v6367_v35, %v8851_v7  ;;  %6537 = vmatprep.mubr.bf16.mxu1 %v2436_v9  ;;  %v2418_v47 = vmax.f32 %v2370_v40, 0.0  ;;  %v6710_v35 = vld [vmem:[%s10636_s8 + $0x70] ss:$28 sps:$4 sm:$0xff]   ;;  %v6713_v9 = vld [vmem:[%s10636_s8 + $0x120] ss:$28 sps:$4 sm:$0xff]  }
 0x1dc   :  { %v6369_v13 = vpop.f32.mrf.mxu0  ;;  %v6496_v45 = vpop.f32.mrf.mxu1  ;;  %v6721_v40 = vld [vmem:[%s10636_s8 + $0x3c] ss:$28 sps:$4 sm:$0xff]  }
 0x1dd   :  { %v2373_v49 = vadd.f32 %v6492_v16, %v2212_v41  ;;  %v6370_v53 = vadd.f32 %v6369_v13, %v6368_v37  ;;  %v8917_v16 = vld [vmem:[%s10637_s5] ss:$0 sm:$0xff]  ;;  %v6716_v13 = vld [vmem:[%s10636_s8 + $0xe8] ss:$28 sps:$4 sm:$0xff]  }
 0x1de   :  { %v6371_v59 = vpop.f32.mrf.mxu0  ;;  %v2380_v22 = vpop.f32.mrf.mxu1 }
 0x1df   :  { %v2419_v29 = vmax.f32 %v2373_v49, 0.0  ;;  %v2217_v63 = vadd.f32 %v6370_v53, %v8856_v26  ;;  %v6719_v49 = vld [vmem:[%s10636_s8 + $0x38] ss:$28 sps:$4 sm:$0xff]  }
 0x1e0   :  { %v6372_v32 = vpop.f32.mrf.mxu0 }
 0x1e1   :  { %v6373_v51 = vadd.f32 %v6372_v32, %v6371_v59  ;;  %v2437_v46 = vpack.c.bf16 %v2419_v29, %v2418_v47  ;;  %v2378_v48 = vadd.f32 %v2377_v10, %v2217_v63  ;;  %v6718_v10 = vld [vmem:[%s10636_s8 + $0xec] ss:$28 sps:$4 sm:$0xff]   ;;  %v6724_v59 = vld [vmem:[%s10636_s8 + $0xb4] ss:$28 sps:$4 sm:$0xff]  }
 0x1e2   :  { %v6374_v24 = vpop.f32.mrf.mxu0  ;;  %v6722_v32 = vld [vmem:[%s10636_s8 + $0xb0] ss:$28 sps:$4 sm:$0xff]  }
 0x1e3   :  { %6538 = vmatmul.mubr.bf16.gmra.mxu1 %v2437_v46  ;;  %v2220_v0 = vadd.f32 %v6373_v51, %v8858_v38  ;;  %v2420_v56 = vmax.f32 %v2378_v48, 0.0  ;;  %v6689_v38 = vld [vmem:[%s10636_s8 + $0x188] ss:$28 sps:$4 sm:$0xff]  }
 0x1e4   :  { %v6375_v7 = vpop.f32.mrf.mxu0 }
 0x1e5   :  { %v6376_v39 = vadd.f32 %v6375_v7, %v6374_v24  ;;  %v2381_v54 = vadd.f32 %v2380_v22, %v2220_v0 }
 0x1e6   :  { %v6377_v55 = vpop.f32.mrf.mxu0 }
 0x1e7   :  { %v2225_v60 = vadd.f32 %v6376_v39, %v8860_v27  ;;  %v2421_v50 = vmax.f32 %v2381_v54, 0.0  ;;  %v6691_v27 = vld [vmem:[%s10636_s8 + $0x18c] ss:$28 sps:$4 sm:$0xff]  }
 0x1e8   :  { %v6378_v3 = vpop.f32.mrf.mxu0  ;;  %3358 = vmatprep.subr.bf16.mxu1 %v6691_v27 }
 0x1e9   :  { %v6379_v25 = vadd.f32 %v6378_v3, %v6377_v55  ;;  %v2438_v26 = vpack.c.bf16 %v2421_v50, %v2420_v56  ;;  %v2386_v52 = vadd.f32 %v6495_v36, %v2225_v60  ;;  %3359 = vmatpush1.bf16.msra.mxu1 %v6689_v38  ;;  %v6715_v36 = vld [vmem:[%s10636_s8 + $0x124] ss:$28 sps:$4 sm:$0xff]  }
 0x1ea   :  { %3360 = vmatprep.subr.bf16.mxu1 %v6694_v34 }
 0x1eb   :  { %v2228_v33 = vadd.f32 %v6379_v25, %v8862_v1  ;;  %6541 = vmatprep.mubr.bf16.mxu1 %v2438_v26  ;;  %v2422_v2 = vmax.f32 %v2386_v52, 0.0  ;;  %v6692_v1 = vld [vmem:[%s10636_s8 + $0x150] ss:$28 sps:$4 sm:$0xff]  }
 0x1ed   :  { %v2389_v62 = vadd.f32 %v6496_v45, %v2228_v33  ;;  %3361 = vmatpush1.bf16.msra.mxu1 %v6692_v1 }
 0x1ee   :  { %3362 = vmatprep.subr.bf16.mxu1 %v6697_v42 }
 0x1ef   :  { %v2423_v11 = vmax.f32 %v2389_v62, 0.0 }
 0x1f1   :  { %v2439_v12 = vpack.c.bf16 %v2423_v11, %v2422_v2  ;;  %3363 = vmatpush1.bf16.msra.mxu1 %v6695_v18 }
 0x1f2   :  { %3364 = vmatprep.subr.bf16.mxu1 %v6700_v57  ;;  %v6725_v57 = vld [vmem:[%s10636_s8 + $0x78] ss:$28 sps:$4 sm:$0xff]  }
 0x1f3   :  { %6542 = vmatmul.mubr.bf16.gmra.mxu1 %v2439_v12 }
 0x1f5   :  { %3365 = vmatpush1.bf16.msra.mxu1 %v6698_v44 }
 0x1f6   :  { %3366 = vmatprep.subr.bf16.mxu1 %v6703_v17  ;;  %v6730_v17 = vld [vmem:[%s10636_s8 + $0x4] ss:$28 sps:$4 sm:$0xff]  }
 0x1f9   :  { %3367 = vmatpush1.bf16.msra.mxu1 %v6701_v28 }
 0x1fa   :  { %3368 = vmatprep.subr.bf16.mxu1 %v6712_v31 }
 0x1fd   :  { %3369 = vmatpush1.bf16.msra.mxu1 %v6710_v35 }
 0x1fe   :  { %3370 = vmatprep.subr.bf16.mxu1 %v6721_v40 }
 0x201   :  { %3371 = vmatpush1.bf16.msra.mxu1 %v6719_v49 }
 0x202   :  { %3372 = vmatprep.subr.bf16.mxu1 %v6730_v17 }
 0x243   :  { %v6515_v61 = vpop.f32.mrf.mxu1 }
 0x244   :  { %v2554_v14 = vadd.f32 %v6515_v61, %v8917_v16 }
 0x245   :  { %v2545_v43 = vpop.f32.mrf.mxu1 }
 0x246   :  { %v2546_v58 = vadd.f32 %v8917_v16, %v2545_v43 }
 0x247   :  { %v6516_v20 = vpop.f32.mrf.mxu1 }
 0x248   :  { %v2557_v8 = vadd.f32 %v6516_v20, %v8917_v16 }
 0x249   :  { %v2548_v5 = vpop.f32.mrf.mxu1 }
 0x24a   :  { %v2549_v19 = vadd.f32 %v8917_v16, %v2548_v5  ;;  %v2673_v15 = vpack.c.bf16 %v2557_v8, %v2554_v14  ;;  %v6727_v5 = vld [vmem:[%s10636_s8 + $0x7c] ss:$28 sps:$4 sm:$0xff]  }
 0x24b   :  { %v6731_v14 = vld [vmem:[%s10636_s8 + $0x40] ss:$28 sps:$4 sm:$0xff]  }
 0x24c   :  { %v2672_v21 = vpack.c.bf16 %v2549_v19, %v2546_v58  ;;  %v6733_v58 = vld [vmem:[%s10636_s8 + $0x44] ss:$28 sps:$4 sm:$0xff]  }
 0x24e   :  { %6549 = vmatprep.mubr.msk.bf16.mxu0 %vm2711_vm1, %v2672_v21  ;;  %v6736_v21 = vld [vmem:[%s10636_s8 + $0xc] ss:$28 sps:$4 sm:$0xff]  }
 0x24f   :  { %6550 = vmatmul.mubr.msk.bf16.vlgmr.msra.gmra.mxu0 %vm2711_vm1, %v2673_v15  ;;  %v6728_v15 = vld [vmem:[%s10636_s8] ss:$28 sps:$4 sm:$0xff]  }
 0x250   :  { %3552 = vmatpush1.bf16.msra.mxu0 %v6704_v23  ;;  %3373 = vmatpush1.bf16.msra.mxu1 %v6728_v15 }
 0x251   :  { %3553 = vmatprep.subr.bf16.mxu0 %v6709_v6  ;;  %v6734_v6 = vld [vmem:[%s10636_s8 + $0x8] ss:$28 sps:$4 sm:$0xff]  }
 0x253   :  { %v6519_v37 = vpop.f32.mrf.mxu1 }
 0x254   :  { %3554 = vmatpush1.bf16.msra.mxu0 %v6707_v30  ;;  %v2570_v51 = vadd.f32 %v6519_v37, %v8917_v16 }
 0x255   :  { %v2561_v41 = vpop.f32.mrf.mxu1  ;;  %3555 = vmatprep.subr.bf16.mxu0 %v6715_v36 }
 0x256   :  { %v2562_v29 = vadd.f32 %v8917_v16, %v2561_v41 }
 0x257   :  { %v6520_v53 = vpop.f32.mrf.mxu1 }
 0x258   :  { %3556 = vmatpush1.bf16.msra.mxu0 %v6713_v9  ;;  %v2573_v45 = vadd.f32 %v6520_v53, %v8917_v16  ;;  %v7667_v9 = vmov 0  }
 0x259   :  { %v2564_v47 = vpop.f32.mrf.mxu1  ;;  %3557 = vmatprep.subr.bf16.mxu0 %v6718_v10  ;;  %3390 = vmatprep.mubr.bf16.mxu1 %v7667_v9  ;;  %v6739_v10 = vld [vmem:[%s10636_s8 + $0x19c] ss:$28 sps:$4 sm:$0xff]  }
 0x25a   :  { %v2565_v63 = vadd.f32 %v8917_v16, %v2564_v47  ;;  %v2675_v24 = vpack.c.bf16 %v2573_v45, %v2570_v51  ;;  %3744 = vmatprep.subr.bf16.mxu1 %v6739_v10  ;;  %v6766_v10 = vld [vmem:[%s10636_s8 + $0x88] ss:$28 sps:$4 sm:$0xff]  }
 0x25c   :  { %v2674_v46 = vpack.c.bf16 %v2565_v63, %v2562_v29  ;;  %3558 = vmatpush1.bf16.msra.mxu0 %v6716_v13 }
 0x25d   :  { %3559 = vmatprep.subr.bf16.mxu0 %v6724_v59 }
 0x25e   :  { %6553 = vmatprep.mubr.msk.bf16.mxu0 %vm2711_vm1, %v2674_v46 }
 0x25f   :  { %6554 = vmatmul.mubr.msk.bf16.gmra.mxu0 %vm2711_vm1, %v2675_v24 }
 0x260   :  { %3560 = vmatpush1.bf16.msra.mxu0 %v6722_v32 }
 0x261   :  { %3561 = vmatprep.subr.bf16.mxu0 %v6727_v5  ;;  %v6760_v5 = vld [vmem:[%s10636_s8 + $0x130] ss:$28 sps:$4 sm:$0xff]  }
 0x263   :  { %v6523_v22 = vpop.f32.mrf.mxu1 }
 0x264   :  { %v2586_v56 = vadd.f32 %v6523_v22, %v8917_v16  ;;  %3562 = vmatpush1.bf16.msra.mxu0 %v6725_v57 }
 0x265   :  { %v2577_v48 = vpop.f32.mrf.mxu1  ;;  %3563 = vmatprep.subr.bf16.mxu0 %v6733_v58  ;;  %v6748_v58 = vld [vmem:[%s10636_s8 + $0xf4] ss:$28 sps:$4 sm:$0xff]  }
 0x266   :  { %v2578_v54 = vadd.f32 %v8917_v16, %v2577_v48 }
 0x267   :  { %v6524_v0 = vpop.f32.mrf.mxu1 }
 0x268   :  { %v2589_v7 = vadd.f32 %v6524_v0, %v8917_v16  ;;  %3564 = vmatpush1.bf16.msra.mxu0 %v6731_v14  ;;  %v6761_v14 = vld [vmem:[%s10636_s8 + $0xf8] ss:$28 sps:$4 sm:$0xff]  }
 0x269   :  { %v2580_v39 = vpop.f32.mrf.mxu1  ;;  %3565 = vmatprep.subr.bf16.mxu0 %v6736_v21  ;;  %v6746_v21 = vld [vmem:[%s10636_s8 + $0xf0] ss:$28 sps:$4 sm:$0xff]  }
 0x26a   :  { %v2581_v55 = vadd.f32 %v8917_v16, %v2580_v39  ;;  %v2677_v50 = vpack.c.bf16 %v2589_v7, %v2586_v56  ;;  %v6752_v56 = vld [vmem:[%s10636_s8 + $0x1a0] ss:$28 sps:$4 sm:$0xff]  }
 0x26c   :  { %v2676_v60 = vpack.c.bf16 %v2581_v55, %v2578_v54  ;;  %3566 = vmatpush1.bf16.msra.mxu0 %v6734_v6 }
 0x26d   :  { %6581 = vmatprep.subr.bf16.mxu0 %v6752_v56 }
 0x26e   :  { %6557 = vmatprep.mubr.msk.bf16.mxu0 %vm2711_vm1, %v2676_v60 }
 0x26f   :  { %6558 = vmatmul.mubr.msk.bf16.gmra.mxu0 %vm2711_vm1, %v2677_v50 }
 0x273   :  { %v6527_v3 = vpop.f32.mrf.mxu1 }
 0x274   :  { %v2602_v11 = vadd.f32 %v6527_v3, %v8917_v16  ;;  %v9059_v3 = vld [vmem:[%s10638_s7] ss:$0 sm:$0xff] }
 0x275   :  { %v2593_v25 = vpop.f32.mrf.mxu1 }
 0x276   :  { %v2594_v62 = vadd.f32 %v8917_v16, %v2593_v25 }
 0x277   :  { %v6528_v26 = vpop.f32.mrf.mxu1 }
 0x278   :  { %v2605_v52 = vadd.f32 %v6528_v26, %v8917_v16 }
 0x279   :  { %v2596_v33 = vpop.f32.mrf.mxu1 }
 0x27a   :  { %v2597_v2 = vadd.f32 %v8917_v16, %v2596_v33  ;;  %v2679_v38 = vpack.c.bf16 %v2605_v52, %v2602_v11 }
 0x27c   :  { %v2678_v12 = vpack.c.bf16 %v2597_v2, %v2594_v62  ;;  %v6737_v2 = vld [vmem:[%s10636_s8 + $0x198] ss:$28 sps:$4 sm:$0xff]  }
 0x27e   :  { %6561 = vmatprep.mubr.msk.bf16.mxu0 %vm2711_vm1, %v2678_v12 }
 0x27f   :  { %6562 = vmatmul.mubr.msk.bf16.gmra.mxu0 %vm2711_vm1, %v2679_v38  ;;  %v6742_v38 = vld [vmem:[%s10636_s8 + $0x164] ss:$28 sps:$4 sm:$0xff]  }
 0x283   :  { %v6531_v27 = vpop.f32.mrf.mxu1 }
 0x284   :  { %v2618_v4 = vadd.f32 %v6531_v27, %v8917_v16 }
 0x285   :  { %v2609_v34 = vpop.f32.mrf.mxu1 }
 0x286   :  { %v2610_v42 = vadd.f32 %v8917_v16, %v2609_v34  ;;  %v6756_v34 = vld [vmem:[%s10636_s8 + $0x168] ss:$28 sps:$4 sm:$0xff]  }
 0x287   :  { %v6532_v61 = vpop.f32.mrf.mxu1 }
 0x288   :  { %v2621_v1 = vadd.f32 %v6532_v61, %v8917_v16  ;;  %v6740_v61 = vld [vmem:[%s10636_s8 + $0x160] ss:$28 sps:$4 sm:$0xff]  }
 0x289   :  { %v2612_v43 = vpop.f32.mrf.mxu1 }
 0x28a   :  { %v2613_v20 = vadd.f32 %v8917_v16, %v2612_v43  ;;  %v2681_v8 = vpack.c.bf16 %v2621_v1, %v2618_v4  ;;  %v6745_v43 = vld [vmem:[%s10636_s8 + $0x12c] ss:$28 sps:$4 sm:$0xff]  }
 0x28c   :  { %v2680_v18 = vpack.c.bf16 %v2613_v20, %v2610_v42 }
 0x28e   :  { %6565 = vmatprep.mubr.msk.bf16.mxu0 %vm2711_vm1, %v2680_v18 }
 0x28f   :  { %6566 = vmatmul.mubr.msk.bf16.gmra.mxu0 %vm2711_vm1, %v2681_v8  ;;  %v6743_v8 = vld [vmem:[%s10636_s8 + $0x128] ss:$28 sps:$4 sm:$0xff]  }
 0x293   :  { %v6535_v19 = vpop.f32.mrf.mxu1 }
 0x294   :  { %v2634_v35 = vadd.f32 %v6535_v19, %v8917_v16 }
 0x295   :  { %v2625_v44 = vpop.f32.mrf.mxu1 }
 0x296   :  { %v2626_v31 = vadd.f32 %v8917_v16, %v2625_v44 }
 0x297   :  { %v6536_v23 = vpop.f32.mrf.mxu1 }
 0x298   :  { %v2637_v28 = vadd.f32 %v6536_v23, %v8917_v16  ;;  %v6751_v23 = vld [vmem:[%s10636_s8 + $0xbc] ss:$28 sps:$4 sm:$0xff]  }
 0x299   :  { %v2628_v30 = vpop.f32.mrf.mxu1 }
 0x29a   :  { %v2629_v36 = vadd.f32 %v8917_v16, %v2628_v30  ;;  %v2683_v40 = vpack.c.bf16 %v2637_v28, %v2634_v35  ;;  %v6755_v35 = vld [vmem:[%s10636_s8 + $0x84] ss:$28 sps:$4 sm:$0xff]  }
 0x29c   :  { %v2682_v37 = vpack.c.bf16 %v2629_v36, %v2626_v31  ;;  %v6749_v31 = vld [vmem:[%s10636_s8 + $0xb8] ss:$28 sps:$4 sm:$0xff]   ;;  %v6765_v36 = vld [vmem:[%s10636_s8 + $0xc0] ss:$28 sps:$4 sm:$0xff]  }
 0x29e   :  { %6569 = vmatprep.mubr.msk.bf16.mxu0 %vm2711_vm1, %v2682_v37 }
 0x29f   :  { %6570 = vmatmul.mubr.msk.bf16.gmra.mxu0 %vm2711_vm1, %v2683_v40 }
 0x2a3   :  { %v6539_v41 = vpop.f32.mrf.mxu1 }
 0x2a4   :  { %v2650_v29 = vadd.f32 %v6539_v41, %v8917_v16  ;;  %v6753_v41 = vld [vmem:[%s10636_s8 + $0x80] ss:$28 sps:$4 sm:$0xff]  }
 0x2a5   :  { %v2641_v13 = vpop.f32.mrf.mxu1 }
 0x2a6   :  { %v2642_v45 = vadd.f32 %v8917_v16, %v2641_v13 }
 0x2a7   :  { %v6540_v49 = vpop.f32.mrf.mxu1 }
 0x2a8   :  { %v2653_v53 = vadd.f32 %v6540_v49, %v8917_v16  ;;  %v6759_v49 = vld [vmem:[%s10636_s8 + $0x4c] ss:$28 sps:$4 sm:$0xff]  }
 0x2a9   :  { %v2644_v59 = vpop.f32.mrf.mxu1 }
 0x2aa   :  { %v2645_v47 = vadd.f32 %v8917_v16, %v2644_v59  ;;  %v2685_v32 = vpack.c.bf16 %v2653_v53, %v2650_v29  ;;  %v6767_v29 = vld [vmem:[%s10636_s8 + $0x50] ss:$28 sps:$4 sm:$0xff]  }
 0x2ac   :  { %v2684_v63 = vpack.c.bf16 %v2645_v47, %v2642_v45  ;;  %v6757_v47 = vld [vmem:[%s10636_s8 + $0x48] ss:$28 sps:$4 sm:$0xff]  }
 0x2ae   :  { %6573 = vmatprep.mubr.msk.bf16.mxu0 %vm2711_vm1, %v2684_v63 }
 0x2af   :  { %6574 = vmatmul.mubr.msk.bf16.gmra.mxu0 %vm2711_vm1, %v2685_v32  ;;  %v6764_v32 = vld [vmem:[%s10636_s8 + $0x14] ss:$28 sps:$4 sm:$0xff]  }
 0x2b3   :  { %v6543_v51 = vpop.f32.mrf.mxu1 }
 0x2b4   :  { %v2666_v39 = vadd.f32 %v6543_v51, %v8917_v16 }
 0x2b5   :  { %v2657_v46 = vpop.f32.mrf.mxu1 }
 0x2b6   :  { %v2658_v0 = vadd.f32 %v8917_v16, %v2657_v46  ;;  %v6768_v46 = vld [vmem:[%s10636_s8 + $0x18] ss:$28 sps:$4 sm:$0xff]  }
 0x2b7   :  { %v6544_v24 = vpop.f32.mrf.mxu1 }
 0x2b8   :  { %v2669_v22 = vadd.f32 %v6544_v24, %v8917_v16 }
 0x2b9   :  { %v2660_v48 = vpop.f32.mrf.mxu1 }
 0x2ba   :  { %v2661_v7 = vadd.f32 %v8917_v16, %v2660_v48  ;;  %v2687_v55 = vpack.c.bf16 %v2669_v22, %v2666_v39  ;;  %v6762_v48 = vld [vmem:[%s10636_s8 + $0x10] ss:$28 sps:$4 sm:$0xff]  }
 0x2bc   :  { %v2686_v54 = vpack.c.bf16 %v2661_v7, %v2658_v0 }
 0x2be   :  { %6577 = vmatprep.mubr.msk.bf16.mxu0 %vm2711_vm1, %v2686_v54 }
 0x2bf   :  { %6578 = vmatmul.mubr.msk.bf16.gmra.mxu0 %vm2711_vm1, %v2687_v55 }
 0x2c0   :  { %3583 = vmatprep.mubr.bf16.mxu0 %v7667_v9 }
 0x30f   :  { %v6551_v60 = vpop.f32.mrf.mxu0 }
 0x310   :  { %v2803_v27 = vadd.f32 %v6551_v60, %v9059_v3 }
 0x311   :  { %v2794_v50 = vpop.f32.mrf.mxu0 }
 0x312   :  { %v2795_v25 = vadd.f32 %v9059_v3, %v2794_v50  ;;  %v2923_v20 = vmax.f32 %v2803_v27, 0.0 }
 0x313   :  { %v6552_v16 = vpop.f32.mrf.mxu0 }
 0x314   :  { %v2921_v33 = vmax.f32 %v2795_v25, 0.0  ;;  %v2806_v11 = vadd.f32 %v6552_v16, %v9059_v3 }
 0x315   :  { %v2797_v26 = vpop.f32.mrf.mxu0 }
 0x316   :  { %v2798_v52 = vadd.f32 %v9059_v3, %v2797_v26  ;;  %v2924_v1 = vmax.f32 %v2806_v11, 0.0 }
 0x318   :  { %v2922_v62 = vmax.f32 %v2798_v52, 0.0  ;;  %v9086_v18 = vpack.c.bf16 %v2924_v1, %v2923_v20 }
 0x31a   :  { %v9067_v12 = vpack.c.bf16 %v2922_v62, %v2921_v33 }
 0x31c   :  { %3391 = vmatmul.mubr.bf16.vlgmr.msra.gmra.mxu1 %v9067_v12  ;;  %3584 = vmatmul.mubr.bf16.vlgmr.msra.gmra.mxu0 %v9067_v12 }
 0x31d   :  { %3745 = vmatpush1.bf16.msra.mxu1 %v6737_v2  ;;  %3400 = vmatprep.mubr.bf16.mxu1 %v7667_v9 }
 0x31e   :  { %3593 = vmatprep.mubr.bf16.mxu0 %v7667_v9  ;;  %3746 = vmatprep.subr.bf16.mxu1 %v6742_v38 }
 0x31f   :  { %v6555_v42 = vpop.f32.mrf.mxu0  ;;  %6582 = vmatpush3.bf16.msra.mxu0 %v6752_v56 }
 0x320   :  { %6583 = vmatprep.subr.bf16.mxu0 %v6756_v34  ;;  %v2819_v37 = vadd.f32 %v6555_v42, %v9059_v3 }
 0x321   :  { %v2810_v4 = vpop.f32.mrf.mxu0  ;;  %3747 = vmatpush1.bf16.msra.mxu1 %v6740_v61 }
 0x322   :  { %3748 = vmatprep.subr.bf16.mxu1 %v6745_v43  ;;  %v2811_v19 = vadd.f32 %v9059_v3, %v2810_v4  ;;  %v2927_v53 = vmax.f32 %v2819_v37, 0.0 }
 0x323   :  { %v6556_v57 = vpop.f32.mrf.mxu0  ;;  %6584 = vmatpush3.bf16.msra.mxu0 %v6756_v34 }
 0x324   :  { %3401 = vmatmul.mubr.bf16.gmra.mxu1 %v9086_v18  ;;  %3594 = vmatmul.mubr.bf16.gmra.mxu0 %v9086_v18  ;;  %v2925_v15 = vmax.f32 %v2811_v19, 0.0  ;;  %v2822_v28 = vadd.f32 %v6556_v57, %v9059_v3 }
 0x325   :  { %v2813_v44 = vpop.f32.mrf.mxu0  ;;  %3410 = vmatprep.mubr.bf16.mxu1 %v7667_v9  ;;  %3603 = vmatprep.mubr.bf16.mxu0 %v7667_v9 }
 0x326   :  { %v2814_v17 = vadd.f32 %v9059_v3, %v2813_v44  ;;  %3749 = vmatpush1.bf16.msra.mxu1 %v6743_v8  ;;  %6585 = vmatprep.subr.bf16.mxu0 %v6760_v5  ;;  %v2928_v40 = vmax.f32 %v2822_v28, 0.0 }
 0x327   :  { %3750 = vmatprep.subr.bf16.mxu1 %v6748_v58  ;;  %6586 = vmatpush3.bf16.msra.mxu0 %v6760_v5 }
 0x328   :  { %v2926_v6 = vmax.f32 %v2814_v17, 0.0  ;;  %6587 = vmatprep.subr.bf16.mxu0 %v6761_v14  ;;  %v9138_v45 = vpack.c.bf16 %v2928_v40, %v2927_v53 }
 0x32a   :  { %v9113_v30 = vpack.c.bf16 %v2926_v6, %v2925_v15  ;;  %3751 = vmatpush1.bf16.msra.mxu1 %v6746_v21 }
 0x32b   :  { %3752 = vmatprep.subr.bf16.mxu1 %v6751_v23  ;;  %6588 = vmatpush3.bf16.msra.mxu0 %v6761_v14 }
 0x32c   :  { %3411 = vmatmul.mubr.bf16.gmra.mxu1 %v9113_v30  ;;  %3604 = vmatmul.mubr.bf16.gmra.mxu0 %v9113_v30 }
 0x32d   :  { %3420 = vmatprep.mubr.bf16.mxu1 %v7667_v9  ;;  %3613 = vmatprep.mubr.bf16.mxu0 %v7667_v9 }
 0x32e   :  { %3753 = vmatpush1.bf16.msra.mxu1 %v6749_v31  ;;  %6589 = vmatprep.subr.bf16.mxu0 %v6765_v36 }
 0x32f   :  { %v6559_v13 = vpop.f32.mrf.mxu0  ;;  %3754 = vmatprep.subr.bf16.mxu1 %v6755_v35  ;;  %6590 = vmatpush3.bf16.msra.mxu0 %v6765_v36 }
 0x330   :  { %6591 = vmatprep.subr.bf16.mxu0 %v6766_v10  ;;  %v2835_v55 = vadd.f32 %v6559_v13, %v9059_v3 }
 0x331   :  { %v2826_v59 = vpop.f32.mrf.mxu0 }
 0x332   :  { %3755 = vmatpush1.bf16.msra.mxu1 %v6753_v41  ;;  %v2827_v51 = vadd.f32 %v9059_v3, %v2826_v59  ;;  %v2931_v50 = vmax.f32 %v2835_v55, 0.0 }
 0x333   :  { %v6560_v63 = vpop.f32.mrf.mxu0  ;;  %3756 = vmatprep.subr.bf16.mxu1 %v6759_v49  ;;  %6592 = vmatpush3.bf16.msra.mxu0 %v6766_v10 }
 0x334   :  { %3421 = vmatmul.mubr.bf16.gmra.mxu1 %v9138_v45  ;;  %3614 = vmatmul.mubr.bf16.gmra.mxu0 %v9138_v45  ;;  %v2929_v0 = vmax.f32 %v2827_v51, 0.0  ;;  %v2838_v39 = vadd.f32 %v6560_v63, %v9059_v3 }
 0x335   :  { %v2829_v24 = vpop.f32.mrf.mxu0  ;;  %3430 = vmatprep.mubr.bf16.mxu1 %v7667_v9  ;;  %3623 = vmatprep.mubr.bf16.mxu0 %v7667_v9 }
 0x336   :  { %v2830_v22 = vadd.f32 %v9059_v3, %v2829_v24  ;;  %3757 = vmatpush1.bf16.msra.mxu1 %v6757_v47  ;;  %6593 = vmatprep.subr.bf16.mxu0 %v6767_v29  ;;  %v2932_v56 = vmax.f32 %v2838_v39, 0.0 }
 0x337   :  { %3758 = vmatprep.subr.bf16.mxu1 %v6764_v32  ;;  %6594 = vmatpush3.bf16.msra.mxu0 %v6767_v29 }
 0x338   :  { %v2930_v7 = vmax.f32 %v2830_v22, 0.0  ;;  %6595 = vmatprep.subr.bf16.mxu0 %v6768_v46  ;;  %v9169_v25 = vpack.c.bf16 %v2932_v56, %v2931_v50 }
 0x33a   :  { %v9162_v54 = vpack.c.bf16 %v2930_v7, %v2929_v0  ;;  %3759 = vmatpush1.bf16.msra.mxu1 %v6762_v48 }
 0x33b   :  { %6596 = vmatpush3.bf16.msra.mxu0 %v6768_v46 }
 0x33c   :  { %3431 = vmatmul.mubr.bf16.gmra.mxu1 %v9162_v54  ;;  %3624 = vmatmul.mubr.bf16.gmra.mxu0 %v9162_v54 }
 0x33d   :  { %3440 = vmatprep.mubr.bf16.mxu1 %v7667_v9  ;;  %3633 = vmatprep.mubr.bf16.mxu0 %v7667_v9 }
 0x33f   :  { %v6563_v60 = vpop.f32.mrf.mxu0 }
 0x340   :  { %v2851_v34 = vadd.f32 %v6563_v60, %v9059_v3 }
 0x341   :  { %v2842_v16 = vpop.f32.mrf.mxu0 }
 0x342   :  { %v2843_v52 = vadd.f32 %v9059_v3, %v2842_v16  ;;  %v2935_v43 = vmax.f32 %v2851_v34, 0.0 }
 0x343   :  { %v6564_v26 = vpop.f32.mrf.mxu0 }
 0x344   :  { %3441 = vmatmul.mubr.bf16.gmra.mxu1 %v9169_v25  ;;  %3634 = vmatmul.mubr.bf16.gmra.mxu0 %v9169_v25  ;;  %v2933_v2 = vmax.f32 %v2843_v52, 0.0  ;;  %v2854_v38 = vadd.f32 %v6564_v26, %v9059_v3 }
 0x345   :  { %v2845_v33 = vpop.f32.mrf.mxu0  ;;  %3450 = vmatprep.mubr.bf16.mxu1 %v7667_v9  ;;  %3643 = vmatprep.mubr.bf16.mxu0 %v7667_v9 }
 0x346   :  { %v2846_v62 = vadd.f32 %v9059_v3, %v2845_v33  ;;  %v2936_v61 = vmax.f32 %v2854_v38, 0.0 }
 0x348   :  { %v2934_v11 = vmax.f32 %v2846_v62, 0.0  ;;  %v9185_v20 = vpack.c.bf16 %v2936_v61, %v2935_v43 }
 0x34a   :  { %v9178_v27 = vpack.c.bf16 %v2934_v11, %v2933_v2 }
 0x34c   :  { %3451 = vmatmul.mubr.bf16.gmra.mxu1 %v9178_v27  ;;  %3644 = vmatmul.mubr.bf16.gmra.mxu0 %v9178_v27 }
 0x34d   :  { %3460 = vmatprep.mubr.bf16.mxu1 %v7667_v9  ;;  %3653 = vmatprep.mubr.bf16.mxu0 %v7667_v9 }
 0x34f   :  { %v6567_v1 = vpop.f32.mrf.mxu0 }
 0x350   :  { %v2867_v17 = vadd.f32 %v6567_v1, %v9059_v3 }
 0x351   :  { %v2858_v42 = vpop.f32.mrf.mxu0 }
 0x352   :  { %v2859_v8 = vadd.f32 %v9059_v3, %v2858_v42  ;;  %v2939_v15 = vmax.f32 %v2867_v17, 0.0 }
 0x353   :  { %v6568_v4 = vpop.f32.mrf.mxu0 }
 0x354   :  { %3461 = vmatmul.mubr.bf16.gmra.mxu1 %v9185_v20  ;;  %3654 = vmatmul.mubr.bf16.gmra.mxu0 %v9185_v20  ;;  %v2937_v58 = vmax.f32 %v2859_v8, 0.0  ;;  %v2870_v14 = vadd.f32 %v6568_v4, %v9059_v3 }
 0x355   :  { %v2861_v5 = vpop.f32.mrf.mxu0  ;;  %3470 = vmatprep.mubr.bf16.mxu1 %v7667_v9  ;;  %3663 = vmatprep.mubr.bf16.mxu0 %v7667_v9 }
 0x356   :  { %v2862_v57 = vadd.f32 %v9059_v3, %v2861_v5  ;;  %v2940_v21 = vmax.f32 %v2870_v14, 0.0 }
 0x358   :  { %v2938_v19 = vmax.f32 %v2862_v57, 0.0  ;;  %v9201_v28 = vpack.c.bf16 %v2940_v21, %v2939_v15 }
 0x35a   :  { %v9194_v44 = vpack.c.bf16 %v2938_v19, %v2937_v58 }
 0x35c   :  { %3471 = vmatmul.mubr.bf16.gmra.mxu1 %v9194_v44  ;;  %3664 = vmatmul.mubr.bf16.gmra.mxu0 %v9194_v44 }
 0x35d   :  { %3480 = vmatprep.mubr.bf16.mxu1 %v7667_v9  ;;  %3673 = vmatprep.mubr.bf16.mxu0 %v7667_v9 }
 0x35f   :  { %v6571_v23 = vpop.f32.mrf.mxu0 }
 0x360   :  { %v2883_v49 = vadd.f32 %v6571_v23, %v9059_v3 }
 0x361   :  { %v2874_v6 = vpop.f32.mrf.mxu0 }
 0x362   :  { %v2875_v36 = vadd.f32 %v9059_v3, %v2874_v6  ;;  %v2943_v47 = vmax.f32 %v2883_v49, 0.0 }
 0x363   :  { %v6572_v31 = vpop.f32.mrf.mxu0 }
 0x364   :  { %3481 = vmatmul.mubr.bf16.gmra.mxu1 %v9201_v28  ;;  %3674 = vmatmul.mubr.bf16.gmra.mxu0 %v9201_v28  ;;  %v2941_v10 = vmax.f32 %v2875_v36, 0.0  ;;  %v2886_v41 = vadd.f32 %v6572_v31, %v9059_v3 }
 0x365   :  { %v2877_v35 = vpop.f32.mrf.mxu0  ;;  %3490 = vmatprep.mubr.bf16.mxu1 %v7667_v9  ;;  %3683 = vmatprep.mubr.bf16.mxu0 %v7667_v9 }
 0x366   :  { %v2878_v37 = vadd.f32 %v9059_v3, %v2877_v35  ;;  %v2944_v53 = vmax.f32 %v2886_v41, 0.0 }
 0x368   :  { %v2942_v40 = vmax.f32 %v2878_v37, 0.0  ;;  %v9217_v63 = vpack.c.bf16 %v2944_v53, %v2943_v47 }
 0x36a   :  { %v9210_v13 = vpack.c.bf16 %v2942_v40, %v2941_v10 }
 0x36c   :  { %3491 = vmatmul.mubr.bf16.gmra.mxu1 %v9210_v13  ;;  %3684 = vmatmul.mubr.bf16.gmra.mxu0 %v9210_v13 }
 0x36d   :  { %3500 = vmatprep.mubr.bf16.mxu1 %v7667_v9  ;;  %3693 = vmatprep.mubr.bf16.mxu0 %v7667_v9 }
 0x36f   :  { %v6575_v59 = vpop.f32.mrf.mxu0 }
 0x370   :  { %v2899_v39 = vadd.f32 %v6575_v59, %v9059_v3 }
 0x371   :  { %v2890_v29 = vpop.f32.mrf.mxu0 }
 0x372   :  { %v2891_v51 = vadd.f32 %v9059_v3, %v2890_v29  ;;  %v2947_v60 = vmax.f32 %v2899_v39, 0.0 }
 0x373   :  { %v6576_v32 = vpop.f32.mrf.mxu0 }
 0x374   :  { %3501 = vmatmul.mubr.bf16.gmra.mxu1 %v9217_v63  ;;  %3694 = vmatmul.mubr.bf16.gmra.mxu0 %v9217_v63  ;;  %v2945_v22 = vmax.f32 %v2891_v51, 0.0  ;;  %v2902_v0 = vadd.f32 %v6576_v32, %v9059_v3 }
 0x375   :  { %v2893_v46 = vpop.f32.mrf.mxu0  ;;  %3510 = vmatprep.mubr.bf16.mxu1 %v7667_v9  ;;  %3703 = vmatprep.mubr.bf16.mxu0 %v7667_v9 }
 0x376   :  { %v2894_v24 = vadd.f32 %v9059_v3, %v2893_v46  ;;  %v2948_v55 = vmax.f32 %v2902_v0, 0.0 }
 0x378   :  { %v2946_v48 = vmax.f32 %v2894_v24, 0.0  ;;  %v9233_v16 = vpack.c.bf16 %v2948_v55, %v2947_v60 }
 0x37a   :  { %v9226_v7 = vpack.c.bf16 %v2946_v48, %v2945_v22 }
 0x37c   :  { %3511 = vmatmul.mubr.bf16.gmra.mxu1 %v9226_v7  ;;  %3704 = vmatmul.mubr.bf16.gmra.mxu0 %v9226_v7 }
 0x37d   :  { %3520 = vmatprep.mubr.bf16.mxu1 %v7667_v9  ;;  %3713 = vmatprep.mubr.bf16.mxu0 %v7667_v9 }
 0x37f   :  { %v6579_v56 = vpop.f32.mrf.mxu0 }
 0x380   :  { %v2915_v61 = vadd.f32 %v6579_v56, %v9059_v3 }
 0x381   :  { %v2906_v50 = vpop.f32.mrf.mxu0 }
 0x382   :  { %v2907_v52 = vadd.f32 %v9059_v3, %v2906_v50  ;;  %v2951_v43 = vmax.f32 %v2915_v61, 0.0 }
 0x383   :  { %v6580_v26 = vpop.f32.mrf.mxu0 }
 0x384   :  { %3521 = vmatmul.mubr.bf16.gmra.mxu1 %v9233_v16  ;;  %3714 = vmatmul.mubr.bf16.gmra.mxu0 %v9233_v16  ;;  %v2949_v2 = vmax.f32 %v2907_v52, 0.0  ;;  %v2918_v38 = vadd.f32 %v6580_v26, %v9059_v3 }
 0x385   :  { %v2909_v33 = vpop.f32.mrf.mxu0  ;;  %3530 = vmatprep.mubr.bf16.mxu1 %v7667_v9  ;;  %3723 = vmatprep.mubr.bf16.mxu0 %v7667_v9 }
 0x386   :  { %v2910_v62 = vadd.f32 %v9059_v3, %v2909_v33  ;;  %v2952_v1 = vmax.f32 %v2918_v38, 0.0  ;;  %v3035_v3 = vlaneseq }
 0x388   :  { %v2950_v11 = vmax.f32 %v2910_v62, 0.0  ;;  %v9249_v42 = vpack.c.bf16 %v2952_v1, %v2951_v43 }
 0x38a   :  { %v9242_v34 = vpack.c.bf16 %v2950_v11, %v2949_v2 }
 0x38c   :  { %3531 = vmatmul.mubr.bf16.gmra.mxu1 %v9242_v34  ;;  %3724 = vmatmul.mubr.bf16.gmra.mxu0 %v9242_v34 }
 0x38d   :  { %3540 = vmatprep.mubr.bf16.mxu1 %v7667_v9  ;;  %3733 = vmatprep.mubr.bf16.mxu0 %v7667_v9 }
 0x394   :  { %3541 = vmatmul.mubr.bf16.gmra.mxu1 %v9249_v42  ;;  %3734 = vmatmul.mubr.bf16.gmra.mxu0 %v9249_v42 }
 0x395   :  { %6597 = vmatprep.mubr.bf16.mxu0 %v9067_v12  ;;  %3776 = vmatprep.mubr.bf16.mxu1 %v7667_v9 }
 0x39c   :  { %3777 = vmatmul.mubr.bf16.vlgmr.msra.gmra.mxu1 %v9067_v12  ;;  %6598 = vmatmul.mubr.bf16.vlgmr.msra.gmra.mxu0 %v9086_v18  ;;  %v9283_v12 = vshrl.u32 %v3035_v3, 7 }
 0x39d   :  { %6601 = vmatprep.mubr.bf16.mxu0 %v9113_v30  ;;  %3786 = vmatprep.mubr.bf16.mxu1 %v7667_v9 }
 0x3a4   :  { %3787 = vmatmul.mubr.bf16.gmra.mxu1 %v9086_v18  ;;  %6602 = vmatmul.mubr.bf16.gmra.mxu0 %v9138_v45  ;;  %v3037_v18 = vsub.s32 0, %v9283_v12 }
 0x3a5   :  { %6605 = vmatprep.mubr.bf16.mxu0 %v9162_v54  ;;  %3796 = vmatprep.mubr.bf16.mxu1 %v7667_v9 }
 0x3ac   :  { %3797 = vmatmul.mubr.bf16.gmra.mxu1 %v9113_v30  ;;  %6606 = vmatmul.mubr.bf16.gmra.mxu0 %v9169_v25  ;;  %v3045_v30 = vsub.s32 2, %v9283_v12 }
 0x3ad   :  { %6609 = vmatprep.mubr.bf16.mxu0 %v9178_v27  ;;  %3806 = vmatprep.mubr.bf16.mxu1 %v7667_v9 }
 0x3b4   :  { %3807 = vmatmul.mubr.bf16.gmra.mxu1 %v9138_v45  ;;  %6610 = vmatmul.mubr.bf16.gmra.mxu0 %v9185_v20  ;;  %v3033_v45 = vld [vmem:[%s10639_s9] sm:$0x7f] }
 0x3b5   :  { %6613 = vmatprep.mubr.bf16.mxu0 %v9194_v44  ;;  %3816 = vmatprep.mubr.bf16.mxu1 %v7667_v9  ;;  %v9297_v4 = vrot.slane %v3033_v45, %v3045_v30 }
 0x3bc   :  { %3817 = vmatmul.mubr.bf16.gmra.mxu1 %v9162_v54  ;;  %6614 = vmatmul.mubr.bf16.gmra.mxu0 %v9201_v28  ;;  %v3041_v54 = vsub.s32 1, %v9283_v12 }
 0x3bd   :  { %6617 = vmatprep.mubr.bf16.mxu0 %v9210_v13  ;;  %3826 = vmatprep.mubr.bf16.mxu1 %v7667_v9 }
 0x3c4   :  { %3827 = vmatmul.mubr.bf16.gmra.mxu1 %v9169_v25  ;;  %6618 = vmatmul.mubr.bf16.gmra.mxu0 %v9217_v63  ;;  %v3049_v25 = vsub.s32 3, %v9283_v12 }
 0x3c5   :  { %6621 = vmatprep.mubr.bf16.mxu0 %v9226_v7  ;;  %3836 = vmatprep.mubr.bf16.mxu1 %v7667_v9 }
 0x3c6   :  { %v9301_v8 = vrot.slane %v3033_v45, %v3049_v25 }
 0x3cc   :  { %3837 = vmatmul.mubr.bf16.gmra.mxu1 %v9178_v27  ;;  %6622 = vmatmul.mubr.bf16.gmra.mxu0 %v9233_v16  ;;  %v9295_v27 = vrot.slane %v3033_v45, %v3037_v18 }
 0x3cd   :  { %6625 = vmatprep.mubr.bf16.mxu0 %v9242_v34  ;;  %3846 = vmatprep.mubr.bf16.mxu1 %v7667_v9 }
 0x3d4   :  { %3847 = vmatmul.mubr.bf16.gmra.mxu1 %v9185_v20  ;;  %6626 = vmatmul.mubr.bf16.gmra.mxu0 %v9249_v42  ;;  %v9299_v20 = vrot.slane %v3033_v45, %v3041_v54 }
 0x3d5   :  { %3856 = vmatprep.mubr.bf16.mxu1 %v7667_v9 }
 0x3dc   :  { %v3392_v5 = vpop.f32.mrf.mxu1  ;;  %v3585_v57 = vpop.f32.mrf.mxu0  ;;  %3857 = vmatmul.mubr.bf16.gmra.mxu1 %v9194_v44 }
 0x3dd   :  { %v3393_v58 = vadd.f32 %v3392_v5, %v9295_v27  ;;  %v3586_v19 = vadd.f32 %v3585_v57, %v9297_v4  ;;  %3866 = vmatprep.mubr.bf16.mxu1 %v7667_v9 }
 0x3de   :  { %v3394_v14 = vpop.f32.mrf.mxu1  ;;  %v3587_v17 = vpop.f32.mrf.mxu0 }
 0x3df   :  { %v5820_v21 = vmul.f32 -1.442695, %v3393_v58  ;;  %v5822_v23 = vmul.f32 -1.442695, %v3586_v19  ;;  %v3395_v15 = vadd.f32 %v3394_v14, %v9299_v20  ;;  %v3588_v6 = vadd.f32 %v3587_v17, %v9301_v8 }
 0x3e0   :  { %v3396_v31 = vpop.f32.mrf.mxu1  ;;  %v3589_v36 = vpop.f32.mrf.mxu0 }
 0x3e1   :  { %6769 = vpow2.f32 %v5820_v21  ;;  %v5821_v35 = vmul.f32 -1.442695, %v3395_v15  ;;  %v5823_v37 = vmul.f32 -1.442695, %v3588_v6  ;;  %v3397_v44 = vadd.f32 %v3396_v31, %v9295_v27 }
 0x3e2   :  { %6771 = vpow2.f32 %v5822_v23  ;;  %v3590_v10 = vadd.f32 %v3589_v36, %v9297_v4  ;;  %v3398_v40 = vpop.f32.mrf.mxu1  ;;  %v3591_v41 = vpop.f32.mrf.mxu0 }
 0x3e3   :  { %6773 = vpow2.f32 %v5821_v35  ;;  %v5827_v49 = vmul.f32 -1.442695, %v3397_v44  ;;  %v3399_v53 = vadd.f32 %v3398_v40, %v9299_v20  ;;  %v3592_v59 = vadd.f32 %v3591_v41, %v9301_v8 }
 0x3e4   :  { %6775 = vpow2.f32 %v5823_v37  ;;  %v5829_v47 = vmul.f32 -1.442695, %v3590_v10  ;;  %v3402_v29 = vpop.f32.mrf.mxu1  ;;  %v3595_v32 = vpop.f32.mrf.mxu0  ;;  %3867 = vmatmul.mubr.bf16.gmra.mxu1 %v9201_v28 }
 0x3e5   :  { %6777 = vpow2.f32 %v5827_v49  ;;  %v5828_v51 = vmul.f32 -1.442695, %v3399_v53  ;;  %v5830_v46 = vmul.f32 -1.442695, %v3592_v59  ;;  %v3403_v24 = vadd.f32 %v3402_v29, %v9295_v27  ;;  %3876 = vmatprep.mubr.bf16.mxu1 %v7667_v9 }
 0x3e6   :  { %6779 = vpow2.f32 %v5829_v47  ;;  %v3596_v22 = vadd.f32 %v3595_v32, %v9297_v4  ;;  %v3404_v48 = vpop.f32.mrf.mxu1  ;;  %v3597_v0 = vpop.f32.mrf.mxu0 }
 0x3e7   :  { %6781 = vpow2.f32 %v5828_v51  ;;  %v5834_v39 = vmul.f32 -1.442695, %v3403_v24  ;;  %v3405_v55 = vadd.f32 %v3404_v48, %v9299_v20  ;;  %v3598_v56 = vadd.f32 %v3597_v0, %v9301_v8 }
 0x3e8   :  { %6783 = vpow2.f32 %v5830_v46  ;;  %v5836_v28 = vmul.f32 -1.442695, %v3596_v22  ;;  %v3406_v60 = vpop.f32.mrf.mxu1  ;;  %v3599_v50 = vpop.f32.mrf.mxu0 }
 0x3e9   :  { %6785 = vpow2.f32 %v5834_v39  ;;  %v5835_v26 = vmul.f32 -1.442695, %v3405_v55  ;;  %v5837_v52 = vmul.f32 -1.442695, %v3598_v56  ;;  %v3407_v33 = vadd.f32 %v3406_v60, %v9295_v27 }
 0x3ea   :  { %6787 = vpow2.f32 %v5836_v28  ;;  %v3600_v62 = vadd.f32 %v3599_v50, %v9297_v4  ;;  %v3408_v2 = vpop.f32.mrf.mxu1  ;;  %v3601_v11 = vpop.f32.mrf.mxu0 }
 0x3eb   :  { %6789 = vpow2.f32 %v5835_v26  ;;  %v5841_v38 = vmul.f32 -1.442695, %v3407_v33  ;;  %v3409_v61 = vadd.f32 %v3408_v2, %v9299_v20  ;;  %v3602_v1 = vadd.f32 %v3601_v11, %v9301_v8 }
 0x3ec   :  { %6791 = vpow2.f32 %v5837_v52  ;;  %v5843_v43 = vmul.f32 -1.442695, %v3600_v62  ;;  %v3412_v3 = vpop.f32.mrf.mxu1  ;;  %v3605_v18 = vpop.f32.mrf.mxu0  ;;  %3877 = vmatmul.mubr.bf16.gmra.mxu1 %v9210_v13 }
 0x3ed   :  { %6793 = vpow2.f32 %v5841_v38  ;;  %v5842_v30 = vmul.f32 -1.442695, %v3409_v61  ;;  %v5844_v45 = vmul.f32 -1.442695, %v3602_v1  ;;  %3886 = vmatprep.mubr.bf16.mxu1 %v7667_v9  ;;  %v3413_v48 = vadd.f32 %v3412_v3, %v9295_v27 }
 0x3ee   :  { %v6770_v54 = vpop.eup %6769  ;;  %6795 = vpow2.f32 %v5843_v43  ;;  %v3414_v25 = vpop.f32.mrf.mxu1  ;;  %v3606_v56 = vadd.f32 %v3605_v18, %v9297_v4 }
 0x3ef   :  { %v3607_v5 = vpop.f32.mrf.mxu0  ;;  %v6772_v57 = vpop.eup %6771  ;;  %v4770_v58 = vadd.f32 1.0, %v6770_v54  ;;  %6797 = vpow2.f32 %v5842_v30  ;;  %v3415_v26 = vadd.f32 %v3414_v25, %v9299_v20  ;;  %v5848_v61 = vmul.f32 -1.442695, %v3413_v48 }
 0x3f0   :  { %v6774_v19 = vpop.eup %6773  ;;  %v4772_v14 = vadd.f32 1.0, %v6772_v57  ;;  %6799 = vpow2.f32 %v5844_v45  ;;  %v3416_v17 = vpop.f32.mrf.mxu1  ;;  %v3608_v62 = vadd.f32 %v3607_v5, %v9301_v8  ;;  %v5850_v30 = vmul.f32 -1.442695, %v3606_v56 }
 0x3f1   :  { %v6776_v21 = vpop.eup %6775  ;;  %6801 = vrcp.f32 %v4770_v58  ;;  %v4771_v23 = vadd.f32 1.0, %v6774_v19  ;;  %v3609_v13 = vpop.f32.mrf.mxu0  ;;  %v3417_v1 = vadd.f32 %v3416_v17, %v9295_v27 }
 0x3f2   :  { %v6778_v15 = vpop.eup %6777  ;;  %6803 = vrcp.f32 %v4772_v14  ;;  %v4773_v6 = vadd.f32 1.0, %v6776_v21  ;;  %v9325_v31 = vpop.f32.mrf.mxu1  ;;  %v3610_v45 = vadd.f32 %v3609_v13, %v9297_v4  ;;  %v5851_v58 = vmul.f32 -1.442695, %v3608_v62 }
 0x3f3   :  { %v6780_v36 = vpop.eup %6779  ;;  %6805 = vrcp.f32 %v4771_v23  ;;  %v4777_v35 = vadd.f32 1.0, %v6778_v15  ;;  %v3611_v49 = vpop.f32.mrf.mxu0  ;;  %v3419_v5 = vadd.f32 %v9325_v31, %v9299_v20  ;;  %v5855_v21 = vmul.f32 -1.442695, %v3417_v1 }
 0x3f4   :  { %v6782_v37 = vpop.eup %6781  ;;  %6807 = vrcp.f32 %v4773_v6  ;;  %v4779_v44 = vadd.f32 1.0, %v6780_v36  ;;  %v9327_v10 = vpop.f32.mrf.mxu1  ;;  %3887 = vmatmul.mubr.bf16.gmra.mxu1 %v9217_v63  ;;  %v3612_v19 = vadd.f32 %v3611_v49, %v9301_v8  ;;  %v5857_v6 = vmul.f32 -1.442695, %v3610_v45 }
 0x3f5   :  { %v6784_v40 = vpop.eup %6783  ;;  %6809 = vrcp.f32 %v4777_v35  ;;  %v4778_v41 = vadd.f32 1.0, %v6782_v37  ;;  %3896 = vmatprep.mubr.bf16.mxu1 %v7667_v9  ;;  %v3615_v0 = vpop.f32.mrf.mxu0  ;;  %v3423_v23 = vadd.f32 %v9327_v10, %v9295_v27  ;;  %v5856_v37 = vmul.f32 -1.442695, %v3419_v5 }
 0x3f6   :  { %v6786_v53 = vpop.eup %6785  ;;  %6811 = vrcp.f32 %v4779_v44  ;;  %v4780_v59 = vadd.f32 1.0, %v6784_v40  ;;  %v9331_v47 = vpop.f32.mrf.mxu1  ;;  %v3616_v31 = vadd.f32 %v3615_v0, %v9297_v4  ;;  %v5858_v40 = vmul.f32 -1.442695, %v3612_v19 }
 0x3f7   :  { %v6788_v29 = vpop.eup %6787  ;;  %6813 = vrcp.f32 %v4778_v41  ;;  %v4784_v32 = vadd.f32 1.0, %v6786_v53  ;;  %v3617_v43 = vpop.f32.mrf.mxu0  ;;  %v3425_v44 = vadd.f32 %v9331_v47, %v9299_v20 }
 0x3f8   :  { %v6790_v51 = vpop.eup %6789  ;;  %6815 = vrcp.f32 %v4780_v59  ;;  %v4786_v46 = vadd.f32 1.0, %v6788_v29  ;;  %v9333_v24 = vpop.f32.mrf.mxu1  ;;  %v3618_v41 = vadd.f32 %v3617_v43, %v9301_v8  ;;  %v5862_v59 = vmul.f32 -1.442695, %v3423_v23 }
 0x3f9   :  { %v6792_v63 = vpop.eup %6791  ;;  %6817 = vrcp.f32 %v4784_v32  ;;  %v4785_v22 = vadd.f32 1.0, %v6790_v51  ;;  %v3619_v13 = vpop.f32.mrf.mxu0  ;;  %v3427_v47 = vadd.f32 %v9333_v24, %v9295_v27  ;;  %v5863_v24 = vmul.f32 -1.442695, %v3425_v44 }
 0x3fa   :  { %v6794_v39 = vpop.eup %6793  ;;  %6819 = vrcp.f32 %v4786_v46  ;;  %v4787_v55 = vadd.f32 1.0, %v6792_v63  ;;  %v9337_v28 = vpop.f32.mrf.mxu1  ;;  %v3620_v51 = vadd.f32 %v3619_v13, %v9297_v4  ;;  %v5865_v0 = vmul.f32 -1.442695, %v3618_v41 }
 0x3fb   :  { %v6796_v60 = vpop.eup %6795  ;;  %6821 = vrcp.f32 %v4785_v22  ;;  %v4791_v50 = vadd.f32 1.0, %v6794_v39  ;;  %v3621_v29 = vpop.f32.mrf.mxu0  ;;  %v3429_v22 = vadd.f32 %v9337_v28, %v9299_v20 }
 0x3fc   :  { %v6798_v52 = vpop.eup %6797  ;;  %6823 = vrcp.f32 %v4787_v55  ;;  %v4793_v33 = vadd.f32 1.0, %v6796_v60  ;;  %v9341_v2 = vpop.f32.mrf.mxu1  ;;  %3897 = vmatmul.mubr.bf16.gmra.mxu1 %v9226_v7  ;;  %v5849_v7 = vmul.f32 -1.442695, %v3415_v26  ;;  %v3622_v39 = vadd.f32 %v3621_v29, %v9301_v8 }
 0x3fd   :  { %v6800_v11 = vpop.eup %6799  ;;  %6825 = vrcp.f32 %v4791_v50  ;;  %v4792_v38 = vadd.f32 1.0, %v6798_v52  ;;  %3906 = vmatprep.mubr.bf16.mxu1 %v7667_v9  ;;  %v5869_v60 = vmul.f32 -1.442695, %v3427_v47  ;;  %v9409_v50 = vpop.f32.mrf.mxu0  ;;  %v5871_v26 = vmul.f32 -1.442695, %v3620_v51 }
 0x3fe   :  { %v6802_v3 = vpop.eup %6801  ;;  %6827 = vrcp.f32 %v4793_v33  ;;  %v4794_v18 = vadd.f32 1.0, %v6800_v11  ;;  %v9347_v54 = vpop.f32.mrf.mxu1  ;;  %v5870_v62 = vmul.f32 -1.442695, %v3429_v22  ;;  %v3626_v22 = vadd.f32 %v9409_v50, %v9297_v4 }
 0x3ff   :  { %v6804_v25 = vpop.eup %6803  ;;  %5442 = vst [vmem:[%s10640_s10] sm:$0xff] %v6802_v3  ;;  %6829 = vrcp.f32 %v4792_v38  ;;  %v5872_v38 = vmul.f32 -1.442695, %v3622_v39  ;;  %v3627_v43 = vpop.f32.mrf.mxu0 }
 0x400   :  { %v6806_v57 = vpop.eup %6805  ;;  %5444 = vst [vmem:[%s10640_s10 + $0x10] sm:$0xff] %v6804_v25  ;;  %6831 = vrcp.f32 %v4794_v18  ;;  %v9358_v14 = vpop.f32.mrf.mxu1 }
 0x401   :  { %v6808_v17 = vpop.eup %6807  ;;  %5443 = vst [vmem:[%s10640_s10 + $0x8] sm:$0xff] %v6806_v57  ;;  %6833 = vpow2.f32 %v5848_v61  ;;  %v3437_v50 = vadd.f32 %v9358_v14, %v9295_v27 }
 0x402   :  { %v6810_v15 = vpop.eup %6809  ;;  %5445 = vst [vmem:[%s10640_s10 + $0x18] sm:$0xff] %v6808_v17  ;;  %6835 = vpow2.f32 %v5850_v30  ;;  %v9369_v36 = vpop.f32.mrf.mxu1 }
 0x403   :  { %v6812_v35 = vpop.eup %6811  ;;  %5449 = vst [vmem:[%s10640_s10 + $0x38] sm:$0xff] %v6810_v15  ;;  %6837 = vpow2.f32 %v5849_v7 }
 0x404   :  { %v6814_v10 = vpop.eup %6813  ;;  %5451 = vst [vmem:[%s10640_s10 + $0x48] sm:$0xff] %v6812_v35  ;;  %6839 = vpow2.f32 %v5851_v58  ;;  %v9380_v49 = vpop.f32.mrf.mxu1  ;;  %3907 = vmatmul.mubr.bf16.gmra.mxu1 %v9233_v16  ;;  %v5864_v16 = vmul.f32 -1.442695, %v3616_v31 }
 0x405   :  { %v6816_v53 = vpop.eup %6815  ;;  %5450 = vst [vmem:[%s10640_s10 + $0x40] sm:$0xff] %v6814_v10  ;;  %6841 = vpow2.f32 %v5855_v21  ;;  %3916 = vmatprep.mubr.bf16.mxu1 %v7667_v9 }
 0x406   :  { %v6818_v32 = vpop.eup %6817  ;;  %5452 = vst [vmem:[%s10640_s10 + $0x50] sm:$0xff] %v6816_v53  ;;  %6843 = vpow2.f32 %v5857_v6  ;;  %v9393_v46 = vpop.f32.mrf.mxu1 }
 0x407   :  { %v6820_v63 = vpop.eup %6819  ;;  %5456 = vst [vmem:[%s10640_s10 + $0x70] sm:$0xff] %v6818_v32  ;;  %6845 = vpow2.f32 %v5856_v37 }
 0x408   :  { %v6822_v48 = vpop.eup %6821  ;;  %5458 = vst [vmem:[%s10640_s10 + $0x80] sm:$0xff] %v6820_v63  ;;  %6847 = vpow2.f32 %v5858_v40  ;;  %v9404_v55 = vpop.f32.mrf.mxu1 }
 0x409   :  { %v6824_v56 = vpop.eup %6823  ;;  %5457 = vst [vmem:[%s10640_s10 + $0x78] sm:$0xff] %v6822_v48  ;;  %6849 = vpow2.f32 %v5862_v59 }
 0x40a   :  { %v6826_v28 = vpop.eup %6825  ;;  %5459 = vst [vmem:[%s10640_s10 + $0x88] sm:$0xff] %v6824_v56  ;;  %6851 = vpow2.f32 %v5864_v16  ;;  %v9414_v52 = vpop.f32.mrf.mxu1  ;;  %v3433_v16 = vadd.f32 %v9341_v2, %v9295_v27  ;;  %v3435_v56 = vadd.f32 %v9347_v54, %v9299_v20  ;;  %v3628_v2 = vadd.f32 %v3627_v43, %v9301_v8 }
 0x40b   :  { %v6828_v33 = vpop.eup %6827  ;;  %5463 = vst [vmem:[%s10640_s10 + $0xa8] sm:$0xff] %v6826_v28  ;;  %6853 = vpow2.f32 %v5863_v24 }
 0x40c   :  { %v6830_v11 = vpop.eup %6829  ;;  %5465 = vst [vmem:[%s10640_s10 + $0xb8] sm:$0xff] %v6828_v33  ;;  %6855 = vpow2.f32 %v5865_v0  ;;  %v9422_v61 = vpop.f32.mrf.mxu1  ;;  %3917 = vmatmul.mubr.bf16.gmra.mxu1 %v9242_v34  ;;  %v5877_v43 = vmul.f32 -1.442695, %v3435_v56 }
 0x40d   :  { %v6832_v1 = vpop.eup %6831  ;;  %5464 = vst [vmem:[%s10640_s10 + $0xb0] sm:$0xff] %v6830_v11  ;;  %6857 = vpow2.f32 %v5869_v60  ;;  %3926 = vmatprep.mubr.bf16.mxu1 %v7667_v9  ;;  %v3629_v9 = vpop.f32.mrf.mxu0  ;;  %v5876_v11 = vmul.f32 -1.442695, %v3433_v16 }
 0x40e   :  { %v6834_v3 = vpop.eup %6833  ;;  %5466 = vst [vmem:[%s10640_s10 + $0xc0] sm:$0xff] %v6832_v1  ;;  %6859 = vpow2.f32 %v5871_v26  ;;  %v9432_v18 = vpop.f32.mrf.mxu1  ;;  %v3630_v54 = vadd.f32 %v3629_v9, %v9297_v4 }
 0x40f   :  { %v6836_v30 = vpop.eup %6835  ;;  %v4798_v45 = vadd.f32 1.0, %v6834_v3  ;;  %6861 = vpow2.f32 %v5870_v62  ;;  %v3631_v37 = vpop.f32.mrf.mxu0 }
 0x410   :  { %v6838_v34 = vpop.eup %6837  ;;  %v4800_v25 = vadd.f32 1.0, %v6836_v30  ;;  %6863 = vpow2.f32 %v5872_v38  ;;  %v9434_v7 = vpop.f32.mrf.mxu1  ;;  %v5878_v30 = vmul.f32 -1.442695, %v3626_v22 }
 0x411   :  { %v6840_v5 = vpop.eup %6839  ;;  %6865 = vrcp.f32 %v4798_v45  ;;  %v4799_v57 = vadd.f32 1.0, %v6838_v34  ;;  %v3635_v51 = vpop.f32.mrf.mxu0 }
 0x412   :  { %v6842_v58 = vpop.eup %6841  ;;  %6867 = vrcp.f32 %v4800_v25  ;;  %v4801_v19 = vadd.f32 1.0, %v6840_v5  ;;  %v9436_v17 = vpop.f32.mrf.mxu1  ;;  %v3439_v25 = vadd.f32 %v9369_v36, %v9299_v20  ;;  %v5879_v5 = vmul.f32 -1.442695, %v3628_v2 }
 0x413   :  { %v6844_v21 = vpop.eup %6843  ;;  %6869 = vrcp.f32 %v4799_v57  ;;  %v4805_v23 = vadd.f32 1.0, %v6842_v58  ;;  %v3637_v38 = vpop.f32.mrf.mxu0  ;;  %v3632_v57 = vadd.f32 %v3631_v37, %v9301_v8  ;;  %v3443_v36 = vadd.f32 %v9380_v49, %v9295_v27 }
 0x414   :  { %v6846_v13 = vpop.eup %6845  ;;  %6871 = vrcp.f32 %v4801_v19  ;;  %v4807_v15 = vadd.f32 1.0, %v6844_v21  ;;  %v9438_v6 = vpop.f32.mrf.mxu1  ;;  %3927 = vmatmul.mubr.bf16.gmra.mxu1 %v9249_v42  ;;  %v5883_v19 = vmul.f32 -1.442695, %v3437_v50  ;;  %v5884_v37 = vmul.f32 -1.442695, %v3439_v25 }
 0x415   :  { %v6848_v31 = vpop.eup %6847  ;;  %6873 = vrcp.f32 %v4805_v23  ;;  %v4806_v35 = vadd.f32 1.0, %v6846_v13  ;;  %v3639_v21 = vpop.f32.mrf.mxu0  ;;  %v5885_v13 = vmul.f32 -1.442695, %v3630_v54  ;;  %v3445_v49 = vadd.f32 %v9393_v46, %v9299_v20 }
 0x416   :  { %v6850_v44 = vpop.eup %6849  ;;  %6875 = vrcp.f32 %v4807_v15  ;;  %v4808_v10 = vadd.f32 1.0, %v6848_v31  ;;  %v9441_v40 = vpop.f32.mrf.mxu1  ;;  %v3636_v15 = vadd.f32 %v3635_v51, %v9297_v4  ;;  %v3447_v46 = vadd.f32 %v9404_v55, %v9295_v27 }
 0x417   :  { %v6852_v41 = vpop.eup %6851  ;;  %6877 = vrcp.f32 %v4806_v35  ;;  %v4812_v53 = vadd.f32 1.0, %v6850_v44  ;;  %v3640_v51 = vadd.f32 %v3639_v21, %v9297_v4  ;;  %v5891_v22 = vmul.f32 -1.442695, %v3445_v49 }
 0x418   :  { %v6854_v59 = vpop.eup %6853  ;;  %6879 = vrcp.f32 %v4808_v10  ;;  %v4814_v47 = vadd.f32 1.0, %v6852_v41  ;;  %v9443_v29 = vpop.f32.mrf.mxu1  ;;  %v5886_v10 = vmul.f32 -1.442695, %v3632_v57  ;;  %v3638_v41 = vadd.f32 %v3637_v38, %v9301_v8 }
 0x419   :  { %v6856_v32 = vpop.eup %6855  ;;  %6881 = vrcp.f32 %v4812_v53  ;;  %v4813_v42 = vadd.f32 1.0, %v6854_v59  ;;  %v5892_v16 = vmul.f32 -1.442695, %v3636_v15  ;;  %v3449_v55 = vadd.f32 %v9414_v52, %v9299_v20 }
 0x41a   :  { %v6858_v63 = vpop.eup %6857  ;;  %6883 = vrcp.f32 %v4814_v47  ;;  %v4815_v24 = vadd.f32 1.0, %v6856_v32  ;;  %v9449_v48 = vpop.f32.mrf.mxu1  ;;  %v5890_v47 = vmul.f32 -1.442695, %v3443_v36  ;;  %v5897_v2 = vmul.f32 -1.442695, %v3447_v46 }
 0x41b   :  { %v6860_v0 = vpop.eup %6859  ;;  %6885 = vrcp.f32 %v4813_v42  ;;  %v4819_v39 = vadd.f32 1.0, %v6858_v63  ;;  %v3641_v32 = vpop.f32.mrf.mxu0  ;;  %v5898_v38 = vmul.f32 -1.442695, %v3449_v55 }
 0x41c   :  { %v6862_v60 = vpop.eup %6861  ;;  %6887 = vrcp.f32 %v4815_v24  ;;  %v4821_v28 = vadd.f32 1.0, %v6860_v0  ;;  %v9454_v26 = vpop.f32.mrf.mxu1  ;;  %v3642_v56 = vadd.f32 %v3641_v32, %v9301_v8 }
 0x41d   :  { %v6864_v33 = vpop.eup %6863  ;;  %6889 = vrcp.f32 %v4819_v39  ;;  %v4820_v62 = vadd.f32 1.0, %v6862_v60  ;;  %v5893_v39 = vmul.f32 -1.442695, %v3638_v41 }
 0x41e   :  { %v6866_v1 = vpop.eup %6865  ;;  %6891 = vrcp.f32 %v4821_v28  ;;  %v4822_v3 = vadd.f32 1.0, %v6864_v33  ;;  %v9459_v45 = vpop.f32.mrf.mxu1 }
 0x41f   :  { %v6868_v34 = vpop.eup %6867  ;;  %5470 = vst [vmem:[%s10640_s10 + $0xe0] sm:$0xff] %v6866_v1  ;;  %6893 = vrcp.f32 %v4820_v62  ;;  %v9519_v33 = vpop.f32.mrf.mxu0  ;;  %v5899_v62 = vmul.f32 -1.442695, %v3640_v51 }
 0x420   :  { %v6870_v14 = vpop.eup %6869  ;;  %5472 = vst [vmem:[%s10640_s10 + $0xf0] sm:$0xff] %v6868_v34  ;;  %6895 = vrcp.f32 %v4822_v3  ;;  %v9470_v9 = vpop.f32.mrf.mxu1  ;;  %v5900_v3 = vmul.f32 -1.442695, %v3642_v56 }
 0x421   :  { %v6872_v58 = vpop.eup %6871  ;;  %5471 = vst [vmem:[%s10640_s10 + $0xe8] sm:$0xff] %v6870_v14  ;;  %6897 = vpow2.f32 %v5876_v11  ;;  %v3647_v34 = vpop.f32.mrf.mxu0 }
 0x422   :  { %v6874_v23 = vpop.eup %6873  ;;  %5473 = vst [vmem:[%s10640_s10 + $0xf8] sm:$0xff] %v6872_v58  ;;  %6899 = vpow2.f32 %v5878_v30  ;;  %v9481_v31 = vpop.f32.mrf.mxu1 }
 0x423   :  { %v6876_v35 = vpop.eup %6875  ;;  %5477 = vst [vmem:[%s10640_s10 + $0x118] sm:$0xff] %v6874_v23  ;;  %6901 = vpow2.f32 %v5877_v43  ;;  %v3649_v21 = vpop.f32.mrf.mxu0 }
 0x424   :  { %v6878_v44 = vpop.eup %6877  ;;  %5479 = vst [vmem:[%s10640_s10 + $0x128] sm:$0xff] %v6876_v35  ;;  %6903 = vpow2.f32 %v5879_v5  ;;  %v9492_v53 = vpop.f32.mrf.mxu1 }
 0x425   :  { %v6880_v59 = vpop.eup %6879  ;;  %5478 = vst [vmem:[%s10640_s10 + $0x120] sm:$0xff] %v6878_v44  ;;  %6905 = vpow2.f32 %v5883_v19 }
 0x426   :  { %v6882_v42 = vpop.eup %6881  ;;  %5480 = vst [vmem:[%s10640_s10 + $0x130] sm:$0xff] %v6880_v59  ;;  %6907 = vpow2.f32 %v5885_v13  ;;  %v9503_v63 = vpop.f32.mrf.mxu1 }
 0x427   :  { %v6884_v24 = vpop.eup %6883  ;;  %5484 = vst [vmem:[%s10640_s10 + $0x150] sm:$0xff] %v6882_v42  ;;  %6909 = vpow2.f32 %v5884_v37  ;;  %v3651_v59 = vpop.f32.mrf.mxu0 }
 0x428   :  { %v6886_v0 = vpop.eup %6885  ;;  %5486 = vst [vmem:[%s10640_s10 + $0x160] sm:$0xff] %v6884_v24  ;;  %6911 = vpow2.f32 %v5886_v10  ;;  %v9514_v60 = vpop.f32.mrf.mxu1 }
 0x429   :  { %v6888_v28 = vpop.eup %6887  ;;  %5485 = vst [vmem:[%s10640_s10 + $0x158] sm:$0xff] %v6886_v0  ;;  %6913 = vpow2.f32 %v5890_v47  ;;  %v3453_v0 = vadd.f32 %v9422_v61, %v9295_v27  ;;  %v3648_v61 = vadd.f32 %v3647_v34, %v9301_v8 }
 0x42a   :  { %v6890_v52 = vpop.eup %6889  ;;  %5487 = vst [vmem:[%s10640_s10 + $0x168] sm:$0xff] %v6888_v28  ;;  %6915 = vpow2.f32 %v5892_v16  ;;  %v9524_v11 = vpop.f32.mrf.mxu1 }
 0x42b   :  { %v6892_v50 = vpop.eup %6891  ;;  %5491 = vst [vmem:[%s10640_s10 + $0x188] sm:$0xff] %v6890_v52  ;;  %6917 = vpow2.f32 %v5891_v22  ;;  %v3646_v52 = vadd.f32 %v9519_v33, %v9297_v4 }
 0x42c   :  { %v6894_v1 = vpop.eup %6893  ;;  %5493 = vst [vmem:[%s10640_s10 + $0x198] sm:$0xff] %v6892_v50  ;;  %6919 = vpow2.f32 %v5893_v39  ;;  %v9532_v30 = vpop.f32.mrf.mxu1 }
 0x42d   :  { %v6896_v54 = vpop.eup %6895  ;;  %5492 = vst [vmem:[%s10640_s10 + $0x190] sm:$0xff] %v6894_v1  ;;  %6921 = vpow2.f32 %v5897_v2  ;;  %v3655_v39 = vpop.f32.mrf.mxu0 }
 0x42e   :  { %v6898_v43 = vpop.eup %6897  ;;  %5494 = vst [vmem:[%s10640_s10 + $0x1a0] sm:$0xff] %v6896_v54  ;;  %6923 = vpow2.f32 %v5899_v62  ;;  %v9540_v25 = vpop.f32.mrf.mxu1 }
 0x42f   :  { %v6900_v14 = vpop.eup %6899  ;;  %v4826_v5 = vadd.f32 1.0, %v6898_v43  ;;  %6925 = vpow2.f32 %v5898_v38  ;;  %v3455_v38 = vadd.f32 %v9432_v18, %v9299_v20  ;;  %v3650_v18 = vadd.f32 %v3649_v21, %v9297_v4 }
 0x430   :  { %v6902_v57 = vpop.eup %6901  ;;  %v4828_v58 = vadd.f32 1.0, %v6900_v14  ;;  %6927 = vpow2.f32 %v5900_v3  ;;  %v9542_v23 = vpop.f32.mrf.mxu1  ;;  %v5904_v14 = vmul.f32 -1.442695, %v3453_v0  ;;  %v3467_v0 = vadd.f32 %v9443_v29, %v9295_v27 }
 0x431   :  { %v6904_v19 = vpop.eup %6903  ;;  %6929 = vrcp.f32 %v4826_v5  ;;  %v4827_v36 = vadd.f32 1.0, %v6902_v57  ;;  %v3457_v5 = vadd.f32 %v9434_v7, %v9295_v27  ;;  %v3657_v57 = vpop.f32.mrf.mxu0  ;;  %v5905_v34 = vmul.f32 -1.442695, %v3455_v38 }
 0x432   :  { %v6906_v13 = vpop.eup %6905  ;;  %6931 = vrcp.f32 %v4828_v58  ;;  %v4829_v15 = vadd.f32 1.0, %v6904_v19  ;;  %v9544_v47 = vpop.f32.mrf.mxu1  ;;  %v3469_v29 = vadd.f32 %v9449_v48, %v9299_v20 }
 0x433   :  { %v6908_v35 = vpop.eup %6907  ;;  %6933 = vrcp.f32 %v4827_v36  ;;  %v4833_v37 = vadd.f32 1.0, %v6906_v13  ;;  %v5906_v36 = vmul.f32 -1.442695, %v3646_v52 }
 0x434   :  { %v6910_v49 = vpop.eup %6909  ;;  %6935 = vrcp.f32 %v4829_v15  ;;  %v4835_v44 = vadd.f32 1.0, %v6908_v35  ;;  %v9548_v56 = vpop.f32.mrf.mxu1  ;;  %v3459_v15 = vadd.f32 %v9436_v17, %v9299_v20  ;;  %v5907_v35 = vmul.f32 -1.442695, %v3648_v61 }
 0x435   :  { %v6912_v10 = vpop.eup %6911  ;;  %6937 = vrcp.f32 %v4833_v37  ;;  %v4834_v41 = vadd.f32 1.0, %v6910_v49  ;;  %v3652_v37 = vadd.f32 %v3651_v59, %v9301_v8  ;;  %v5911_v49 = vmul.f32 -1.442695, %v3457_v5  ;;  %v3659_v17 = vpop.f32.mrf.mxu0 }
 0x436   :  { %v6914_v46 = vpop.eup %6913  ;;  %6939 = vrcp.f32 %v4835_v44  ;;  %v4836_v32 = vadd.f32 1.0, %v6912_v10  ;;  %v9557_v33 = vpop.f32.mrf.mxu1  ;;  %v3463_v44 = vadd.f32 %v9438_v6, %v9295_v27  ;;  %v5913_v59 = vmul.f32 -1.442695, %v3650_v18 }
 0x437   :  { %v6916_v42 = vpop.eup %6915  ;;  %6941 = vrcp.f32 %v4834_v41  ;;  %v4840_v16 = vadd.f32 1.0, %v6914_v46  ;;  %v3656_v46 = vadd.f32 %v3655_v39, %v9297_v4  ;;  %v3465_v6 = vadd.f32 %v9441_v40, %v9299_v20  ;;  %v3661_v40 = vpop.f32.mrf.mxu0 }
 0x438   :  { %v6918_v51 = vpop.eup %6917  ;;  %6943 = vrcp.f32 %v4836_v32  ;;  %v4842_v24 = vadd.f32 1.0, %v6916_v42  ;;  %v9574_v10 = vpop.f32.mrf.mxu1  ;;  %v5912_v42 = vmul.f32 -1.442695, %v3459_v15  ;;  %v3660_v52 = vadd.f32 %v3659_v17, %v9297_v4 }
 0x439   :  { %v6920_v22 = vpop.eup %6919  ;;  %6945 = vrcp.f32 %v4840_v16  ;;  %v4841_v55 = vadd.f32 1.0, %v6918_v51  ;;  %v5914_v51 = vmul.f32 -1.442695, %v3652_v37 }
 0x43a   :  { %v6922_v28 = vpop.eup %6921  ;;  %6947 = vrcp.f32 %v4842_v24  ;;  %v4843_v2 = vadd.f32 1.0, %v6920_v22  ;;  %v3658_v24 = vadd.f32 %v3657_v57, %v9301_v8  ;;  %v9594_v39 = vpop.f32.mrf.mxu1  ;;  %v5927_v5 = vmul.f32 -1.442695, %v3660_v52 }
 0x43b   :  { %v6924_v62 = vpop.eup %6923  ;;  %6949 = vrcp.f32 %v4841_v55  ;;  %v4847_v50 = vadd.f32 1.0, %v6922_v28  ;;  %v5918_v55 = vmul.f32 -1.442695, %v3463_v44 }
 0x43c   :  { %v6926_v1 = vpop.eup %6925  ;;  %6951 = vrcp.f32 %v4843_v2  ;;  %v4849_v3 = vadd.f32 1.0, %v6924_v62  ;;  %v5920_v2 = vmul.f32 -1.442695, %v3656_v46 }
 0x43d   :  { %v6928_v54 = vpop.eup %6927  ;;  %6953 = vrcp.f32 %v4847_v50  ;;  %v4848_v43 = vadd.f32 1.0, %v6926_v1  ;;  %v5919_v50 = vmul.f32 -1.442695, %v3465_v6  ;;  %v5921_v1 = vmul.f32 -1.442695, %v3658_v24 }
 0x43e   :  { %v6930_v58 = vpop.eup %6929  ;;  %6955 = vrcp.f32 %v4849_v3  ;;  %v4850_v19 = vadd.f32 1.0, %v6928_v54  ;;  %v3662_v3 = vadd.f32 %v3661_v40, %v9301_v8  ;;  %v5925_v54 = vmul.f32 -1.442695, %v3467_v0 }
 0x43f   :  { %v6932_v13 = vpop.eup %6931  ;;  %5498 = vst [vmem:[%s10640_s10 + $0x1c0] sm:$0xff] %v6930_v58  ;;  %6957 = vrcp.f32 %v4848_v43  ;;  %v9612_v43 = vpop.f32.mrf.mxu0  ;;  %v5926_v58 = vmul.f32 -1.442695, %v3469_v29 }
 0x440   :  { %v6934_v7 = vpop.eup %6933  ;;  %5500 = vst [vmem:[%s10640_s10 + $0x1d0] sm:$0xff] %v6932_v13  ;;  %6959 = vrcp.f32 %v4850_v19 }
 0x441   :  { %v6936_v21 = vpop.eup %6935  ;;  %5499 = vst [vmem:[%s10640_s10 + $0x1c8] sm:$0xff] %v6934_v7  ;;  %6961 = vpow2.f32 %v5904_v14  ;;  %v9614_v14 = vpop.f32.mrf.mxu1 }
 0x442   :  { %v6938_v41 = vpop.eup %6937  ;;  %5501 = vst [vmem:[%s10640_s10 + $0x1d8] sm:$0xff] %v6936_v21  ;;  %6963 = vpow2.f32 %v5906_v36  ;;  %v5928_v36 = vmul.f32 -1.442695, %v3662_v3  ;;  %v3667_v13 = vpop.f32.mrf.mxu0 }
 0x443   :  { %v6940_v32 = vpop.eup %6939  ;;  %5505 = vst [vmem:[%s10640_s10 + $0x1f8] sm:$0xff] %v6938_v41  ;;  %6965 = vpow2.f32 %v5905_v34  ;;  %v9628_v34 = vpop.f32.mrf.mxu1 }
 0x444   :  { %v6942_v16 = vpop.eup %6941  ;;  %5507 = vst [vmem:[%s10640_s10 + $0x208] sm:$0xff] %v6940_v32  ;;  %6967 = vpow2.f32 %v5907_v35  ;;  %v3669_v17 = vpop.f32.mrf.mxu0 }
 0x445   :  { %v6944_v22 = vpop.eup %6943  ;;  %5506 = vst [vmem:[%s10640_s10 + $0x200] sm:$0xff] %v6942_v16  ;;  %6969 = vpow2.f32 %v5911_v49  ;;  %v9633_v41 = vpop.f32.mrf.mxu1 }
 0x446   :  { %v6946_v28 = vpop.eup %6945  ;;  %5508 = vst [vmem:[%s10640_s10 + $0x210] sm:$0xff] %v6944_v22  ;;  %6971 = vpow2.f32 %v5913_v59  ;;  %v3671_v22 = vpop.f32.mrf.mxu0 }
 0x447   :  { %v6948_v62 = vpop.eup %6947  ;;  %5512 = vst [vmem:[%s10640_s10 + $0x230] sm:$0xff] %v6946_v28  ;;  %6973 = vpow2.f32 %v5912_v42 }
 0x448   :  { %v6950_v38 = vpop.eup %6949  ;;  %5514 = vst [vmem:[%s10640_s10 + $0x240] sm:$0xff] %v6948_v62  ;;  %6975 = vpow2.f32 %v5914_v51 }
 0x449   :  { %v6952_v61 = vpop.eup %6951  ;;  %5513 = vst [vmem:[%s10640_s10 + $0x238] sm:$0xff] %v6950_v38  ;;  %6977 = vpow2.f32 %v5918_v55  ;;  %v9635_v55 = vpop.f32.mrf.mxu1  ;;  %v3473_v38 = vadd.f32 %v9454_v26, %v9295_v27  ;;  %v3668_v26 = vadd.f32 %v3667_v13, %v9301_v8 }
 0x44a   :  { %v6954_v48 = vpop.eup %6953  ;;  %5515 = vst [vmem:[%s10640_s10 + $0x248] sm:$0xff] %v6952_v61  ;;  %6979 = vpow2.f32 %v5920_v2 }
 0x44b   :  { %v6956_v57 = vpop.eup %6955  ;;  %5519 = vst [vmem:[%s10640_s10 + $0x268] sm:$0xff] %v6954_v48  ;;  %6981 = vpow2.f32 %v5919_v50  ;;  %v9639_v3 = vpop.f32.mrf.mxu1  ;;  %v3666_v48 = vadd.f32 %v9612_v43, %v9297_v4 }
 0x44c   :  { %v6958_v19 = vpop.eup %6957  ;;  %5521 = vst [vmem:[%s10640_s10 + $0x278] sm:$0xff] %v6956_v57  ;;  %6983 = vpow2.f32 %v5921_v1  ;;  %v3675_v1 = vpop.f32.mrf.mxu0 }
 0x44d   :  { %v6960_v18 = vpop.eup %6959  ;;  %5520 = vst [vmem:[%s10640_s10 + $0x270] sm:$0xff] %v6958_v19  ;;  %6985 = vpow2.f32 %v5925_v54  ;;  %v9648_v43 = vpop.f32.mrf.mxu1 }
 0x44e   :  { %v6962_v15 = vpop.eup %6961  ;;  %5522 = vst [vmem:[%s10640_s10 + $0x280] sm:$0xff] %v6960_v18  ;;  %6987 = vpow2.f32 %v5927_v5 }
 0x44f   :  { %v6964_v7 = vpop.eup %6963  ;;  %v4854_v35 = vadd.f32 1.0, %v6962_v15  ;;  %6989 = vpow2.f32 %v5926_v58  ;;  %v3475_v58 = vadd.f32 %v9459_v45, %v9299_v20  ;;  %v3670_v45 = vadd.f32 %v3669_v17, %v9297_v4 }
 0x450   :  { %v6966_v37 = vpop.eup %6965  ;;  %v4856_v21 = vadd.f32 1.0, %v6964_v7  ;;  %6991 = vpow2.f32 %v5928_v36  ;;  %v5932_v7 = vmul.f32 -1.442695, %v3473_v38  ;;  %v3487_v38 = vadd.f32 %v9514_v60, %v9295_v27 }
 0x451   :  { %v6968_v49 = vpop.eup %6967  ;;  %6993 = vrcp.f32 %v4854_v35  ;;  %v4855_v44 = vadd.f32 1.0, %v6966_v37  ;;  %v3477_v35 = vadd.f32 %v9470_v9, %v9295_v27  ;;  %v3677_v37 = vpop.f32.mrf.mxu0  ;;  %v5933_v13 = vmul.f32 -1.442695, %v3475_v58 }
 0x452   :  { %v6970_v59 = vpop.eup %6969  ;;  %6995 = vrcp.f32 %v4856_v21  ;;  %v4857_v46 = vadd.f32 1.0, %v6968_v49  ;;  %v3489_v60 = vadd.f32 %v9524_v11, %v9299_v20 }
 0x453   :  { %v6972_v32 = vpop.eup %6971  ;;  %6997 = vrcp.f32 %v4855_v44  ;;  %v4861_v42 = vadd.f32 1.0, %v6970_v59  ;;  %v5934_v44 = vmul.f32 -1.442695, %v3666_v48 }
 0x454   :  { %v6974_v6 = vpop.eup %6973  ;;  %6999 = vrcp.f32 %v4857_v46  ;;  %v4863_v16 = vadd.f32 1.0, %v6972_v32  ;;  %v3479_v46 = vadd.f32 %v9481_v31, %v9299_v20  ;;  %v5935_v32 = vmul.f32 -1.442695, %v3668_v26  ;;  %v3679_v31 = vpop.f32.mrf.mxu0 }
 0x455   :  { %v6976_v51 = vpop.eup %6975  ;;  %7001 = vrcp.f32 %v4861_v42  ;;  %v4862_v24 = vadd.f32 1.0, %v6974_v6  ;;  %v3672_v42 = vadd.f32 %v3671_v22, %v9301_v8  ;;  %v5939_v6 = vmul.f32 -1.442695, %v3477_v35 }
 0x456   :  { %v6978_v0 = vpop.eup %6977  ;;  %7003 = vrcp.f32 %v4863_v16  ;;  %v4864_v40 = vadd.f32 1.0, %v6976_v51  ;;  %v3483_v16 = vadd.f32 %v9492_v53, %v9295_v27  ;;  %v9665_v51 = vpop.f32.mrf.mxu1  ;;  %v5941_v22 = vmul.f32 -1.442695, %v3670_v45 }
 0x457   :  { %v6980_v28 = vpop.eup %6979  ;;  %7005 = vrcp.f32 %v4862_v24  ;;  %v4868_v2 = vadd.f32 1.0, %v6978_v0  ;;  %v3676_v0 = vadd.f32 %v3675_v1, %v9297_v4  ;;  %v3485_v53 = vadd.f32 %v9503_v63, %v9299_v20  ;;  %v3681_v63 = vpop.f32.mrf.mxu0 }
 0x458   :  { %v6982_v52 = vpop.eup %6981  ;;  %7007 = vrcp.f32 %v4864_v40  ;;  %v4870_v62 = vadd.f32 1.0, %v6980_v28  ;;  %v5940_v28 = vmul.f32 -1.442695, %v3479_v46  ;;  %v9685_v1 = vpop.f32.mrf.mxu1  ;;  %v3680_v48 = vadd.f32 %v3679_v31, %v9297_v4 }
 0x459   :  { %v6984_v50 = vpop.eup %6983  ;;  %7009 = vrcp.f32 %v4868_v2  ;;  %v4869_v29 = vadd.f32 1.0, %v6982_v52  ;;  %v5942_v52 = vmul.f32 -1.442695, %v3672_v42 }
 0x45a   :  { %v6986_v61 = vpop.eup %6985  ;;  %7011 = vrcp.f32 %v4870_v62  ;;  %v4871_v54 = vadd.f32 1.0, %v6984_v50  ;;  %v3678_v62 = vadd.f32 %v3677_v37, %v9301_v8  ;;  %v5955_v35 = vmul.f32 -1.442695, %v3680_v48 }
 0x45b   :  { %v6988_v5 = vpop.eup %6987  ;;  %7013 = vrcp.f32 %v4869_v29  ;;  %v4875_v57 = vadd.f32 1.0, %v6986_v61  ;;  %v5946_v29 = vmul.f32 -1.442695, %v3483_v16 }
 0x45c   :  { %v6990_v19 = vpop.eup %6989  ;;  %7015 = vrcp.f32 %v4871_v54  ;;  %v4877_v36 = vadd.f32 1.0, %v6988_v5  ;;  %v5948_v54 = vmul.f32 -1.442695, %v3676_v0 }
 0x45d   :  { %v6992_v18 = vpop.eup %6991  ;;  %7017 = vrcp.f32 %v4875_v57  ;;  %v4876_v15 = vadd.f32 1.0, %v6990_v19  ;;  %v5947_v57 = vmul.f32 -1.442695, %v3485_v53  ;;  %v5949_v19 = vmul.f32 -1.442695, %v3678_v62 }
 0x45e   :  { %v6994_v21 = vpop.eup %6993  ;;  %7019 = vrcp.f32 %v4877_v36  ;;  %v4878_v49 = vadd.f32 1.0, %v6992_v18  ;;  %v3682_v36 = vadd.f32 %v3681_v63, %v9301_v8  ;;  %v5953_v18 = vmul.f32 -1.442695, %v3487_v38 }
 0x45f   :  { %v6996_v59 = vpop.eup %6995  ;;  %5526 = vst [vmem:[%s10640_s10 + $0x2a0] sm:$0xff] %v6994_v21  ;;  %7021 = vrcp.f32 %v4876_v15  ;;  %v9703_v15 = vpop.f32.mrf.mxu0  ;;  %v5954_v21 = vmul.f32 -1.442695, %v3489_v60 }
 0x460   :  { %v6998_v9 = vpop.eup %6997  ;;  %5528 = vst [vmem:[%s10640_s10 + $0x2b0] sm:$0xff] %v6996_v59  ;;  %7023 = vrcp.f32 %v4878_v49 }
 0x461   :  { %v7000_v17 = vpop.eup %6999  ;;  %5527 = vst [vmem:[%s10640_s10 + $0x2a8] sm:$0xff] %v6998_v9  ;;  %7025 = vpow2.f32 %v5932_v7  ;;  %v9705_v7 = vpop.f32.mrf.mxu1 }
 0x462   :  { %v7002_v24 = vpop.eup %7001  ;;  %5529 = vst [vmem:[%s10640_s10 + $0x2b8] sm:$0xff] %v7000_v17  ;;  %7027 = vpow2.f32 %v5934_v44  ;;  %v5956_v44 = vmul.f32 -1.442695, %v3682_v36  ;;  %v3687_v59 = vpop.f32.mrf.mxu0 }
 0x463   :  { %v7004_v40 = vpop.eup %7003  ;;  %5533 = vst [vmem:[%s10640_s10 + $0x2d8] sm:$0xff] %v7002_v24  ;;  %7029 = vpow2.f32 %v5933_v13  ;;  %v9719_v13 = vpop.f32.mrf.mxu1 }
 0x464   :  { %v7006_v2 = vpop.eup %7005  ;;  %5535 = vst [vmem:[%s10640_s10 + $0x2e8] sm:$0xff] %v7004_v40  ;;  %7031 = vpow2.f32 %v5935_v32  ;;  %v3689_v31 = vpop.f32.mrf.mxu0 }
 0x465   :  { %v7008_v50 = vpop.eup %7007  ;;  %5534 = vst [vmem:[%s10640_s10 + $0x2e0] sm:$0xff] %v7006_v2  ;;  %7033 = vpow2.f32 %v5939_v6  ;;  %v9724_v24 = vpop.f32.mrf.mxu1 }
 0x466   :  { %v7010_v61 = vpop.eup %7009  ;;  %5536 = vst [vmem:[%s10640_s10 + $0x2f0] sm:$0xff] %v7008_v50  ;;  %7035 = vpow2.f32 %v5941_v22  ;;  %v3691_v50 = vpop.f32.mrf.mxu0 }
 0x467   :  { %v7012_v5 = vpop.eup %7011  ;;  %5540 = vst [vmem:[%s10640_s10 + $0x310] sm:$0xff] %v7010_v61  ;;  %7037 = vpow2.f32 %v5940_v28 }
 0x468   :  { %v7014_v58 = vpop.eup %7013  ;;  %5542 = vst [vmem:[%s10640_s10 + $0x320] sm:$0xff] %v7012_v5  ;;  %7039 = vpow2.f32 %v5942_v52 }
 0x469   :  { %v7016_v26 = vpop.eup %7015  ;;  %5541 = vst [vmem:[%s10640_s10 + $0x318] sm:$0xff] %v7014_v58  ;;  %7041 = vpow2.f32 %v5946_v29  ;;  %v9726_v29 = vpop.f32.mrf.mxu1  ;;  %v3493_v58 = vadd.f32 %v9532_v30, %v9295_v27  ;;  %v3688_v30 = vadd.f32 %v3687_v59, %v9301_v8 }
 0x46a   :  { %v7018_v11 = vpop.eup %7017  ;;  %5543 = vst [vmem:[%s10640_s10 + $0x328] sm:$0xff] %v7016_v26  ;;  %7043 = vpow2.f32 %v5948_v54 }
 0x46b   :  { %v7020_v37 = vpop.eup %7019  ;;  %5547 = vst [vmem:[%s10640_s10 + $0x348] sm:$0xff] %v7018_v11  ;;  %7045 = vpow2.f32 %v5947_v57  ;;  %v9730_v36 = vpop.f32.mrf.mxu1  ;;  %v3686_v11 = vadd.f32 %v9703_v15, %v9297_v4 }
 0x46c   :  { %v7022_v49 = vpop.eup %7021  ;;  %5549 = vst [vmem:[%s10640_s10 + $0x358] sm:$0xff] %v7020_v37  ;;  %7047 = vpow2.f32 %v5949_v19  ;;  %v3695_v19 = vpop.f32.mrf.mxu0 }
 0x46d   :  { %v7024_v45 = vpop.eup %7023  ;;  %5548 = vst [vmem:[%s10640_s10 + $0x350] sm:$0xff] %v7022_v49  ;;  %7049 = vpow2.f32 %v5953_v18  ;;  %v9739_v15 = vpop.f32.mrf.mxu1 }
 0x46e   :  { %v7026_v46 = vpop.eup %7025  ;;  %5550 = vst [vmem:[%s10640_s10 + $0x360] sm:$0xff] %v7024_v45  ;;  %7051 = vpow2.f32 %v5955_v35 }
 0x46f   :  { %v7028_v9 = vpop.eup %7027  ;;  %v4882_v32 = vadd.f32 1.0, %v7026_v46  ;;  %7053 = vpow2.f32 %v5954_v21  ;;  %v3495_v21 = vadd.f32 %v9540_v25, %v9299_v20  ;;  %v3690_v25 = vadd.f32 %v3689_v31, %v9297_v4 }
 0x470   :  { %v7030_v42 = vpop.eup %7029  ;;  %v4884_v17 = vadd.f32 1.0, %v7028_v9  ;;  %7055 = vpow2.f32 %v5956_v44  ;;  %v5960_v9 = vmul.f32 -1.442695, %v3493_v58  ;;  %v3507_v58 = vadd.f32 %v9574_v10, %v9295_v27 }
 0x471   :  { %v7032_v6 = vpop.eup %7031  ;;  %7057 = vrcp.f32 %v4882_v32  ;;  %v4883_v16 = vadd.f32 1.0, %v7030_v42  ;;  %v3497_v32 = vadd.f32 %v9542_v23, %v9295_v27  ;;  %v3697_v42 = vpop.f32.mrf.mxu0  ;;  %v5961_v59 = vmul.f32 -1.442695, %v3495_v21 }
 0x472   :  { %v7034_v22 = vpop.eup %7033  ;;  %7059 = vrcp.f32 %v4884_v17  ;;  %v4885_v0 = vadd.f32 1.0, %v7032_v6  ;;  %v3509_v10 = vadd.f32 %v9594_v39, %v9299_v20 }
 0x473   :  { %v7036_v40 = vpop.eup %7035  ;;  %7061 = vrcp.f32 %v4883_v16  ;;  %v4889_v28 = vadd.f32 1.0, %v7034_v22  ;;  %v5962_v16 = vmul.f32 -1.442695, %v3686_v11 }
 0x474   :  { %v7038_v53 = vpop.eup %7037  ;;  %7063 = vrcp.f32 %v4885_v0  ;;  %v4891_v2 = vadd.f32 1.0, %v7036_v40  ;;  %v3499_v0 = vadd.f32 %v9544_v47, %v9299_v20  ;;  %v5963_v40 = vmul.f32 -1.442695, %v3688_v30  ;;  %v3699_v47 = vpop.f32.mrf.mxu0 }
 0x475   :  { %v7040_v52 = vpop.eup %7039  ;;  %7065 = vrcp.f32 %v4889_v28  ;;  %v4890_v62 = vadd.f32 1.0, %v7038_v53  ;;  %v3692_v28 = vadd.f32 %v3691_v50, %v9301_v8  ;;  %v5967_v53 = vmul.f32 -1.442695, %v3497_v32 }
 0x476   :  { %v7042_v38 = vpop.eup %7041  ;;  %7067 = vrcp.f32 %v4891_v2  ;;  %v4892_v63 = vadd.f32 1.0, %v7040_v52  ;;  %v3503_v2 = vadd.f32 %v9548_v56, %v9295_v27  ;;  %v9756_v52 = vpop.f32.mrf.mxu1  ;;  %v5969_v50 = vmul.f32 -1.442695, %v3690_v25 }
 0x477   :  { %v7044_v61 = vpop.eup %7043  ;;  %7069 = vrcp.f32 %v4890_v62  ;;  %v4896_v54 = vadd.f32 1.0, %v7042_v38  ;;  %v3696_v38 = vadd.f32 %v3695_v19, %v9297_v4  ;;  %v3505_v56 = vadd.f32 %v9557_v33, %v9299_v20  ;;  %v3701_v33 = vpop.f32.mrf.mxu0 }
 0x478   :  { %v7046_v48 = vpop.eup %7045  ;;  %7071 = vrcp.f32 %v4892_v63  ;;  %v4898_v5 = vadd.f32 1.0, %v7044_v61  ;;  %v5968_v61 = vmul.f32 -1.442695, %v3499_v0  ;;  %v9776_v19 = vpop.f32.mrf.mxu1  ;;  %v3700_v11 = vadd.f32 %v3699_v47, %v9297_v4 }
 0x479   :  { %v7048_v57 = vpop.eup %7047  ;;  %7073 = vrcp.f32 %v4896_v54  ;;  %v4897_v60 = vadd.f32 1.0, %v7046_v48  ;;  %v5970_v48 = vmul.f32 -1.442695, %v3692_v28 }
 0x47a   :  { %v7050_v26 = vpop.eup %7049  ;;  %7075 = vrcp.f32 %v4898_v5  ;;  %v4899_v18 = vadd.f32 1.0, %v7048_v57  ;;  %v3698_v5 = vadd.f32 %v3697_v42, %v9301_v8  ;;  %v5983_v32 = vmul.f32 -1.442695, %v3700_v11 }
 0x47b   :  { %v7052_v35 = vpop.eup %7051  ;;  %7077 = vrcp.f32 %v4897_v60  ;;  %v4903_v37 = vadd.f32 1.0, %v7050_v26  ;;  %v5974_v60 = vmul.f32 -1.442695, %v3503_v2 }
 0x47c   :  { %v7054_v49 = vpop.eup %7053  ;;  %7079 = vrcp.f32 %v4899_v18  ;;  %v4905_v44 = vadd.f32 1.0, %v7052_v35  ;;  %v5976_v18 = vmul.f32 -1.442695, %v3696_v38 }
 0x47d   :  { %v7056_v45 = vpop.eup %7055  ;;  %7081 = vrcp.f32 %v4903_v37  ;;  %v4904_v46 = vadd.f32 1.0, %v7054_v49  ;;  %v5975_v37 = vmul.f32 -1.442695, %v3505_v56  ;;  %v5977_v49 = vmul.f32 -1.442695, %v3698_v5 }
 0x47e   :  { %v7058_v17 = vpop.eup %7057  ;;  %7083 = vrcp.f32 %v4905_v44  ;;  %v4906_v6 = vadd.f32 1.0, %v7056_v45  ;;  %v3702_v44 = vadd.f32 %v3701_v33, %v9301_v8  ;;  %v5981_v45 = vmul.f32 -1.442695, %v3507_v58 }
 0x47f   :  { %v7060_v22 = vpop.eup %7059  ;;  %5554 = vst [vmem:[%s10640_s10 + $0x380] sm:$0xff] %v7058_v17  ;;  %7085 = vrcp.f32 %v4904_v46  ;;  %v9794_v46 = vpop.f32.mrf.mxu0  ;;  %v5982_v17 = vmul.f32 -1.442695, %v3509_v10 }
 0x480   :  { %v7062_v23 = vpop.eup %7061  ;;  %5556 = vst [vmem:[%s10640_s10 + $0x390] sm:$0xff] %v7060_v22  ;;  %7087 = vrcp.f32 %v4906_v6 }
 0x481   :  { %v7064_v31 = vpop.eup %7063  ;;  %5555 = vst [vmem:[%s10640_s10 + $0x388] sm:$0xff] %v7062_v23  ;;  %7089 = vpow2.f32 %v5960_v9  ;;  %v9796_v9 = vpop.f32.mrf.mxu1 }
 0x482   :  { %v7066_v62 = vpop.eup %7065  ;;  %5557 = vst [vmem:[%s10640_s10 + $0x398] sm:$0xff] %v7064_v31  ;;  %7091 = vpow2.f32 %v5962_v16  ;;  %v5984_v16 = vmul.f32 -1.442695, %v3702_v44  ;;  %v3707_v22 = vpop.f32.mrf.mxu0 }
 0x483   :  { %v7068_v63 = vpop.eup %7067  ;;  %5561 = vst [vmem:[%s10640_s10 + $0x3b8] sm:$0xff] %v7066_v62  ;;  %7093 = vpow2.f32 %v5961_v59  ;;  %v9810_v59 = vpop.f32.mrf.mxu1 }
 0x484   :  { %v7070_v54 = vpop.eup %7069  ;;  %5563 = vst [vmem:[%s10640_s10 + $0x3c8] sm:$0xff] %v7068_v63  ;;  %7095 = vpow2.f32 %v5963_v40  ;;  %v3709_v47 = vpop.f32.mrf.mxu0 }
 0x485   :  { %v7072_v57 = vpop.eup %7071  ;;  %5562 = vst [vmem:[%s10640_s10 + $0x3c0] sm:$0xff] %v7070_v54  ;;  %7097 = vpow2.f32 %v5967_v53  ;;  %v9815_v62 = vpop.f32.mrf.mxu1 }
 0x486   :  { %v7074_v26 = vpop.eup %7073  ;;  %5564 = vst [vmem:[%s10640_s10 + $0x3d0] sm:$0xff] %v7072_v57  ;;  %7099 = vpow2.f32 %v5969_v50  ;;  %v3711_v57 = vpop.f32.mrf.mxu0 }
 0x487   :  { %v7076_v35 = vpop.eup %7075  ;;  %5568 = vst [vmem:[%s10640_s10 + $0x3f0] sm:$0xff] %v7074_v26  ;;  %7101 = vpow2.f32 %v5968_v61 }
 0x488   :  { %v7078_v21 = vpop.eup %7077  ;;  %5570 = vst [vmem:[%s10640_s10 + $0x400] sm:$0xff] %v7076_v35  ;;  %7103 = vpow2.f32 %v5970_v48 }
 0x489   :  { %v7080_v30 = vpop.eup %7079  ;;  %5569 = vst [vmem:[%s10640_s10 + $0x3f8] sm:$0xff] %v7078_v21  ;;  %7105 = vpow2.f32 %v5974_v60  ;;  %v9817_v60 = vpop.f32.mrf.mxu1  ;;  %v3513_v21 = vadd.f32 %v9614_v14, %v9295_v27  ;;  %v3708_v14 = vadd.f32 %v3707_v22, %v9301_v8 }
 0x48a   :  { %v7082_v39 = vpop.eup %7081  ;;  %5571 = vst [vmem:[%s10640_s10 + $0x408] sm:$0xff] %v7080_v30  ;;  %7107 = vpow2.f32 %v5976_v18 }
 0x48b   :  { %v7084_v42 = vpop.eup %7083  ;;  %5575 = vst [vmem:[%s10640_s10 + $0x428] sm:$0xff] %v7082_v39  ;;  %7109 = vpow2.f32 %v5975_v37  ;;  %v9821_v44 = vpop.f32.mrf.mxu1  ;;  %v3706_v39 = vadd.f32 %v9794_v46, %v9297_v4 }
 0x48c   :  { %v7086_v6 = vpop.eup %7085  ;;  %5577 = vst [vmem:[%s10640_s10 + $0x438] sm:$0xff] %v7084_v42  ;;  %7111 = vpow2.f32 %v5977_v49  ;;  %v3715_v49 = vpop.f32.mrf.mxu0 }
 0x48d   :  { %v7088_v25 = vpop.eup %7087  ;;  %5576 = vst [vmem:[%s10640_s10 + $0x430] sm:$0xff] %v7086_v6  ;;  %7113 = vpow2.f32 %v5981_v45  ;;  %v9830_v46 = vpop.f32.mrf.mxu1 }
 0x48e   :  { %v7090_v0 = vpop.eup %7089  ;;  %5578 = vst [vmem:[%s10640_s10 + $0x440] sm:$0xff] %v7088_v25  ;;  %7115 = vpow2.f32 %v5983_v32 }
 0x48f   :  { %v7092_v23 = vpop.eup %7091  ;;  %v4910_v40 = vadd.f32 1.0, %v7090_v0  ;;  %7117 = vpow2.f32 %v5982_v17  ;;  %v3515_v17 = vadd.f32 %v9628_v34, %v9299_v20  ;;  %v3710_v34 = vadd.f32 %v3709_v47, %v9297_v4 }
 0x490   :  { %v7094_v28 = vpop.eup %7093  ;;  %v4912_v31 = vadd.f32 1.0, %v7092_v23  ;;  %7119 = vpow2.f32 %v5984_v16  ;;  %v5988_v23 = vmul.f32 -1.442695, %v3513_v21  ;;  %v3527_v21 = vadd.f32 %v9665_v51, %v9295_v27 }
 0x491   :  { %v7096_v53 = vpop.eup %7095  ;;  %7121 = vrcp.f32 %v4910_v40  ;;  %v4911_v2 = vadd.f32 1.0, %v7094_v28  ;;  %v3517_v40 = vadd.f32 %v9633_v41, %v9295_v27  ;;  %v3717_v28 = vpop.f32.mrf.mxu0  ;;  %v5989_v22 = vmul.f32 -1.442695, %v3515_v17 }
 0x492   :  { %v7098_v50 = vpop.eup %7097  ;;  %7123 = vrcp.f32 %v4912_v31  ;;  %v4913_v38 = vadd.f32 1.0, %v7096_v53  ;;  %v3529_v51 = vadd.f32 %v9685_v1, %v9299_v20 }
 0x493   :  { %v7100_v63 = vpop.eup %7099  ;;  %7125 = vrcp.f32 %v4911_v2  ;;  %v4917_v61 = vadd.f32 1.0, %v7098_v50  ;;  %v5990_v2 = vmul.f32 -1.442695, %v3706_v39 }
 0x494   :  { %v7102_v56 = vpop.eup %7101  ;;  %7127 = vrcp.f32 %v4913_v38  ;;  %v4919_v54 = vadd.f32 1.0, %v7100_v63  ;;  %v3519_v38 = vadd.f32 %v9635_v55, %v9299_v20  ;;  %v5991_v63 = vmul.f32 -1.442695, %v3708_v14  ;;  %v3719_v55 = vpop.f32.mrf.mxu0 }
 0x495   :  { %v7104_v48 = vpop.eup %7103  ;;  %7129 = vrcp.f32 %v4917_v61  ;;  %v4918_v5 = vadd.f32 1.0, %v7102_v56  ;;  %v3712_v61 = vadd.f32 %v3711_v57, %v9301_v8  ;;  %v5995_v56 = vmul.f32 -1.442695, %v3517_v40 }
 0x496   :  { %v7106_v58 = vpop.eup %7105  ;;  %7131 = vrcp.f32 %v4919_v54  ;;  %v4920_v33 = vadd.f32 1.0, %v7104_v48  ;;  %v3523_v54 = vadd.f32 %v9639_v3, %v9295_v27  ;;  %v9847_v48 = vpop.f32.mrf.mxu1  ;;  %v5997_v57 = vmul.f32 -1.442695, %v3710_v34 }
 0x497   :  { %v7108_v26 = vpop.eup %7107  ;;  %7133 = vrcp.f32 %v4918_v5  ;;  %v4924_v18 = vadd.f32 1.0, %v7106_v58  ;;  %v3716_v58 = vadd.f32 %v3715_v49, %v9297_v4  ;;  %v3525_v3 = vadd.f32 %v9648_v43, %v9299_v20  ;;  %v3721_v43 = vpop.f32.mrf.mxu0 }
 0x498   :  { %v7110_v11 = vpop.eup %7109  ;;  %7135 = vrcp.f32 %v4920_v33  ;;  %v4926_v35 = vadd.f32 1.0, %v7108_v26  ;;  %v5996_v26 = vmul.f32 -1.442695, %v3519_v38  ;;  %v9867_v49 = vpop.f32.mrf.mxu1  ;;  %v3720_v39 = vadd.f32 %v3719_v55, %v9297_v4 }
 0x499   :  { %v7112_v37 = vpop.eup %7111  ;;  %7137 = vrcp.f32 %v4924_v18  ;;  %v4925_v10 = vadd.f32 1.0, %v7110_v11  ;;  %v5998_v11 = vmul.f32 -1.442695, %v3712_v61 }
 0x49a   :  { %v7114_v30 = vpop.eup %7113  ;;  %7139 = vrcp.f32 %v4926_v35  ;;  %v4927_v45 = vadd.f32 1.0, %v7112_v37  ;;  %v3718_v35 = vadd.f32 %v3717_v28, %v9301_v8  ;;  %v6011_v40 = vmul.f32 -1.442695, %v3720_v39 }
 0x49b   :  { %v7116_v32 = vpop.eup %7115  ;;  %7141 = vrcp.f32 %v4925_v10  ;;  %v4931_v42 = vadd.f32 1.0, %v7114_v30  ;;  %v6002_v10 = vmul.f32 -1.442695, %v3523_v54 }
 0x49c   :  { %v7118_v6 = vpop.eup %7117  ;;  %7143 = vrcp.f32 %v4927_v45  ;;  %v4933_v16 = vadd.f32 1.0, %v7116_v32  ;;  %v6004_v45 = vmul.f32 -1.442695, %v3716_v58 }
 0x49d   :  { %v7120_v25 = vpop.eup %7119  ;;  %7145 = vrcp.f32 %v4931_v42  ;;  %v4932_v0 = vadd.f32 1.0, %v7118_v6  ;;  %v6003_v42 = vmul.f32 -1.442695, %v3525_v3  ;;  %v6005_v6 = vmul.f32 -1.442695, %v3718_v35 }
 0x49e   :  { %v7122_v31 = vpop.eup %7121  ;;  %7147 = vrcp.f32 %v4933_v16  ;;  %v4934_v53 = vadd.f32 1.0, %v7120_v25  ;;  %v3722_v16 = vadd.f32 %v3721_v43, %v9301_v8  ;;  %v6009_v25 = vmul.f32 -1.442695, %v3527_v21 }
 0x49f   :  { %v7124_v50 = vpop.eup %7123  ;;  %5582 = vst [vmem:[%s10640_s10 + $0x460] sm:$0xff] %v7122_v31  ;;  %7149 = vrcp.f32 %v4932_v0  ;;  %v9885_v0 = vpop.f32.mrf.mxu0  ;;  %v6010_v31 = vmul.f32 -1.442695, %v3529_v51 }
 0x4a0   :  { %v7126_v41 = vpop.eup %7125  ;;  %5584 = vst [vmem:[%s10640_s10 + $0x470] sm:$0xff] %v7124_v50  ;;  %7151 = vrcp.f32 %v4934_v53 }
 0x4a1   :  { %v7128_v47 = vpop.eup %7127  ;;  %5583 = vst [vmem:[%s10640_s10 + $0x468] sm:$0xff] %v7126_v41  ;;  %7153 = vpow2.f32 %v5988_v23  ;;  %v9887_v23 = vpop.f32.mrf.mxu1 }
 0x4a2   :  { %v7130_v5 = vpop.eup %7129  ;;  %5585 = vst [vmem:[%s10640_s10 + $0x478] sm:$0xff] %v7128_v47  ;;  %7155 = vpow2.f32 %v5990_v2  ;;  %v6012_v2 = vmul.f32 -1.442695, %v3722_v16  ;;  %v3727_v50 = vpop.f32.mrf.mxu0 }
 0x4a3   :  { %v7132_v33 = vpop.eup %7131  ;;  %5589 = vst [vmem:[%s10640_s10 + $0x498] sm:$0xff] %v7130_v5  ;;  %7157 = vpow2.f32 %v5989_v22  ;;  %v9901_v22 = vpop.f32.mrf.mxu1 }
 0x4a4   :  { %v7134_v18 = vpop.eup %7133  ;;  %5591 = vst [vmem:[%s10640_s10 + $0x4a8] sm:$0xff] %v7132_v33  ;;  %7159 = vpow2.f32 %v5991_v63  ;;  %v3729_v55 = vpop.f32.mrf.mxu0 }
 0x4a5   :  { %v7136_v37 = vpop.eup %7135  ;;  %5590 = vst [vmem:[%s10640_s10 + $0x4a0] sm:$0xff] %v7134_v18  ;;  %7161 = vpow2.f32 %v5995_v56  ;;  %v9906_v5 = vpop.f32.mrf.mxu1 }
 0x4a6   :  { %v7138_v30 = vpop.eup %7137  ;;  %5592 = vst [vmem:[%s10640_s10 + $0x4b0] sm:$0xff] %v7136_v37  ;;  %7163 = vpow2.f32 %v5997_v57  ;;  %v3731_v37 = vpop.f32.mrf.mxu0 }
 0x4a7   :  { %v7140_v32 = vpop.eup %7139  ;;  %5596 = vst [vmem:[%s10640_s10 + $0x4d0] sm:$0xff] %v7138_v30  ;;  %7165 = vpow2.f32 %v5996_v26 }
 0x4a8   :  { %v7142_v17 = vpop.eup %7141  ;;  %5598 = vst [vmem:[%s10640_s10 + $0x4e0] sm:$0xff] %v7140_v32  ;;  %7167 = vpow2.f32 %v5998_v11 }
 0x4a9   :  { %v7144_v14 = vpop.eup %7143  ;;  %5597 = vst [vmem:[%s10640_s10 + $0x4d8] sm:$0xff] %v7142_v17  ;;  %7169 = vpow2.f32 %v6002_v10  ;;  %v9908_v10 = vpop.f32.mrf.mxu1  ;;  %v3533_v17 = vadd.f32 %v9705_v7, %v9295_v27  ;;  %v3728_v7 = vadd.f32 %v3727_v50, %v9301_v8 }
 0x4aa   :  { %v7146_v1 = vpop.eup %7145  ;;  %5599 = vst [vmem:[%s10640_s10 + $0x4e8] sm:$0xff] %v7144_v14  ;;  %7171 = vpow2.f32 %v6004_v45 }
 0x4ab   :  { %v7148_v28 = vpop.eup %7147  ;;  %5603 = vst [vmem:[%s10640_s10 + $0x508] sm:$0xff] %v7146_v1  ;;  %7173 = vpow2.f32 %v6003_v42  ;;  %v9912_v16 = vpop.f32.mrf.mxu1  ;;  %v3726_v1 = vadd.f32 %v9885_v0, %v9297_v4 }
 0x4ac   :  { %v7150_v53 = vpop.eup %7149  ;;  %5605 = vst [vmem:[%s10640_s10 + $0x518] sm:$0xff] %v7148_v28  ;;  %7175 = vpow2.f32 %v6005_v6  ;;  %v3735_v6 = vpop.f32.mrf.mxu0 }
 0x4ad   :  { %v7152_v34 = vpop.eup %7151  ;;  %5604 = vst [vmem:[%s10640_s10 + $0x510] sm:$0xff] %v7150_v53  ;;  %7177 = vpow2.f32 %v6009_v25  ;;  %v9921_v0 = vpop.f32.mrf.mxu1 }
 0x4ae   :  { %v7154_v38 = vpop.eup %7153  ;;  %5606 = vst [vmem:[%s10640_s10 + $0x520] sm:$0xff] %v7152_v34  ;;  %7179 = vpow2.f32 %v6011_v40 }
 0x4af   :  { %v7156_v41 = vpop.eup %7155  ;;  %v4938_v63 = vadd.f32 1.0, %v7154_v38  ;;  %7181 = vpow2.f32 %v6010_v31  ;;  %v3535_v31 = vadd.f32 %v9719_v13, %v9299_v20  ;;  %v3730_v13 = vadd.f32 %v3729_v55, %v9297_v4 }
 0x4b0   :  { %v7158_v61 = vpop.eup %7157  ;;  %v4940_v47 = vadd.f32 1.0, %v7156_v41  ;;  %7183 = vpow2.f32 %v6012_v2  ;;  %v6016_v41 = vmul.f32 -1.442695, %v3533_v17  ;;  %v3547_v17 = vadd.f32 %v9756_v52, %v9295_v27 }
 0x4b1   :  { %v7160_v56 = vpop.eup %7159  ;;  %7185 = vrcp.f32 %v4938_v63  ;;  %v4939_v54 = vadd.f32 1.0, %v7158_v61  ;;  %v3537_v63 = vadd.f32 %v9724_v24, %v9295_v27  ;;  %v3737_v61 = vpop.f32.mrf.mxu0  ;;  %v6017_v50 = vmul.f32 -1.442695, %v3535_v31 }
 0x4b2   :  { %v7162_v57 = vpop.eup %7161  ;;  %7187 = vrcp.f32 %v4940_v47  ;;  %v4941_v58 = vadd.f32 1.0, %v7160_v56 }
 0x4b3   :  { %v7164_v33 = vpop.eup %7163  ;;  %7189 = vrcp.f32 %v4939_v54  ;;  %v4945_v26 = vadd.f32 1.0, %v7162_v57  ;;  %v6018_v54 = vmul.f32 -1.442695, %v3726_v1 }
 0x4b4   :  { %v7166_v3 = vpop.eup %7165  ;;  %7191 = vrcp.f32 %v4941_v58  ;;  %v4947_v18 = vadd.f32 1.0, %v7164_v33  ;;  %v3539_v58 = vadd.f32 %v9726_v29, %v9299_v20  ;;  %v6019_v33 = vmul.f32 -1.442695, %v3728_v7  ;;  %v3739_v29 = vpop.f32.mrf.mxu0 }
 0x4b5   :  { %v7168_v11 = vpop.eup %7167  ;;  %7193 = vrcp.f32 %v4945_v26  ;;  %v4946_v35 = vadd.f32 1.0, %v7166_v3  ;;  %v3732_v26 = vadd.f32 %v3731_v37, %v9301_v8  ;;  %v6023_v3 = vmul.f32 -1.442695, %v3537_v63 }
 0x4b6   :  { %v7170_v21 = vpop.eup %7169  ;;  %7195 = vrcp.f32 %v4947_v18  ;;  %v4948_v43 = vadd.f32 1.0, %v7168_v11  ;;  %v3543_v18 = vadd.f32 %v9730_v36, %v9295_v27  ;;  %v9938_v11 = vpop.f32.mrf.mxu1  ;;  %v6025_v37 = vmul.f32 -1.442695, %v3730_v13 }
 0x4b7   :  { %v7172_v30 = vpop.eup %7171  ;;  %7197 = vrcp.f32 %v4946_v35  ;;  %v4952_v45 = vadd.f32 1.0, %v7170_v21  ;;  %v3736_v21 = vadd.f32 %v3735_v6, %v9297_v4  ;;  %v3545_v36 = vadd.f32 %v9739_v15, %v9299_v20  ;;  %v3741_v15 = vpop.f32.mrf.mxu0 }
 0x4b8   :  { %v7174_v39 = vpop.eup %7173  ;;  %7199 = vrcp.f32 %v4948_v43  ;;  %v4954_v32 = vadd.f32 1.0, %v7172_v30  ;;  %v6024_v30 = vmul.f32 -1.442695, %v3539_v58  ;;  %v9958_v6 = vpop.f32.mrf.mxu1  ;;  %v3740_v1 = vadd.f32 %v3739_v29, %v9297_v4 }
 0x4b9   :  { %v7176_v42 = vpop.eup %7175  ;;  %7201 = vrcp.f32 %v4952_v45  ;;  %v4953_v51 = vadd.f32 1.0, %v7174_v39  ;;  %v6026_v39 = vmul.f32 -1.442695, %v3732_v26  ;;  %v3549_v27 = vadd.f32 %v9776_v19, %v9299_v20  ;;  %v9976_v7 = vpop.f32.mrf.mxu0 }
 0x4ba   :  { %v7178_v14 = vpop.eup %7177  ;;  %7203 = vrcp.f32 %v4954_v32  ;;  %v4955_v25 = vadd.f32 1.0, %v7176_v42  ;;  %v3738_v32 = vadd.f32 %v3737_v61, %v9301_v8  ;;  %v6039_v19 = vmul.f32 -1.442695, %v3740_v1 }
 0x4bb   :  { %v7180_v40 = vpop.eup %7179  ;;  %7205 = vrcp.f32 %v4953_v51  ;;  %v4959_v28 = vadd.f32 1.0, %v7178_v14  ;;  %v6030_v51 = vmul.f32 -1.442695, %v3543_v18  ;;  %v3053_v26 = vsub.s32 4, %v9283_v12 }
 0x4bc   :  { %v7182_v53 = vpop.eup %7181  ;;  %7207 = vrcp.f32 %v4955_v25  ;;  %v4961_v2 = vadd.f32 1.0, %v7180_v40  ;;  %v6032_v25 = vmul.f32 -1.442695, %v3736_v21  ;;  %v6033_v31 = vmul.f32 -1.442695, %v3738_v32 }
 0x4bd   :  { %v7184_v34 = vpop.eup %7183  ;;  %7209 = vrcp.f32 %v4959_v28  ;;  %v4960_v38 = vadd.f32 1.0, %v7182_v53  ;;  %v6031_v28 = vmul.f32 -1.442695, %v3545_v36  ;;  %v3742_v53 = vadd.f32 %v3741_v15, %v9301_v8  ;;  %v7666_v32 = vld [vmem:[%s10639_s9] sm:$0x7f] }
 0x4be   :  { %v7186_v47 = vpop.eup %7185  ;;  %7211 = vrcp.f32 %v4961_v2  ;;  %v4962_v56 = vadd.f32 1.0, %v7184_v34  ;;  %v6037_v2 = vmul.f32 -1.442695, %v3547_v17  ;;  %v9978_v34 = vpop.f32.mrf.mxu1  ;;  %v6038_v8 = vmul.f32 -1.442695, %v3549_v27 }
 0x4bf   :  { %v7188_v57 = vpop.eup %7187  ;;  %5610 = vst [vmem:[%s10640_s10 + $0x540] sm:$0xff] %v7186_v47  ;;  %7213 = vrcp.f32 %v4960_v38  ;;  %v6040_v63 = vmul.f32 -1.442695, %v3742_v53  ;;  %v9992_v47 = vpop.f32.mrf.mxu0 }
 0x4c0   :  { %v7190_v24 = vpop.eup %7189  ;;  %5612 = vst [vmem:[%s10640_s10 + $0x550] sm:$0xff] %v7188_v57  ;;  %7215 = vrcp.f32 %v4962_v56  ;;  %v9994_v56 = vpop.f32.mrf.mxu1 }
 0x4c1   :  { %v7192_v55 = vpop.eup %7191  ;;  %5611 = vst [vmem:[%s10640_s10 + $0x548] sm:$0xff] %v7190_v24  ;;  %7217 = vpow2.f32 %v6016_v41 }
 0x4c2   :  { %v7194_v35 = vpop.eup %7193  ;;  %5613 = vst [vmem:[%s10640_s10 + $0x558] sm:$0xff] %v7192_v55  ;;  %7219 = vpow2.f32 %v6018_v54  ;;  %v6600_v55 = vpop.f32.mrf.mxu0 }
 0x4c3   :  { %v7196_v43 = vpop.eup %7195  ;;  %5617 = vst [vmem:[%s10640_s10 + $0x578] sm:$0xff] %v7194_v35  ;;  %7221 = vpow2.f32 %v6017_v50  ;;  %v3061_v35 = vsub.s32 6, %v9283_v12 }
 0x4c4   :  { %v7198_v45 = vpop.eup %7197  ;;  %5619 = vst [vmem:[%s10640_s10 + $0x588] sm:$0xff] %v7196_v43  ;;  %7223 = vpow2.f32 %v6019_v33  ;;  %v3057_v43 = vsub.s32 5, %v9283_v12 }
 0x4c5   :  { %v7200_v42 = vpop.eup %7199  ;;  %5618 = vst [vmem:[%s10640_s10 + $0x580] sm:$0xff] %v7198_v45  ;;  %7225 = vpow2.f32 %v6023_v3  ;;  %v10000_v3 = vpop.f32.mrf.mxu1 }
 0x4c6   :  { %v7202_v14 = vpop.eup %7201  ;;  %5620 = vst [vmem:[%s10640_s10 + $0x590] sm:$0xff] %v7200_v42  ;;  %7227 = vpow2.f32 %v6025_v37  ;;  %v10007_v42 = vrot.slane %v7666_v32, %v3053_v26 }
 0x4c7   :  { %v7204_v40 = vpop.eup %7203  ;;  %5624 = vst [vmem:[%s10640_s10 + $0x5b0] sm:$0xff] %v7202_v14  ;;  %7229 = vpow2.f32 %v6024_v30  ;;  %v10009_v17 = vpop.f32.mrf.mxu1 }
 0x4c8   :  { %v7206_v52 = vpop.eup %7205  ;;  %5626 = vst [vmem:[%s10640_s10 + $0x5c0] sm:$0xff] %v7204_v40  ;;  %7231 = vpow2.f32 %v6026_v39  ;;  %v10013_v40 = vrot.slane %v7666_v32, %v3057_v43  ;;  %v3779_v53 = vadd.f32 %v9796_v9, %v10007_v42 }
 0x4c9   :  { %v7208_v4 = vpop.eup %7207  ;;  %5625 = vst [vmem:[%s10640_s10 + $0x5b8] sm:$0xff] %v7206_v52  ;;  %7233 = vpow2.f32 %v6030_v51  ;;  %v3974_v51 = vpop.f32.mrf.mxu0 }
 0x4ca   :  { %v7210_v20 = vpop.eup %7209  ;;  %5627 = vst [vmem:[%s10640_s10 + $0x5c8] sm:$0xff] %v7208_v4  ;;  %7235 = vpow2.f32 %v6032_v25  ;;  %v10011_v25 = vrot.slane %v7666_v32, %v3061_v35  ;;  %v3785_v35 = vadd.f32 %v9817_v60, %v10013_v40 }
 0x4cb   :  { %v7212_v38 = vpop.eup %7211  ;;  %5631 = vst [vmem:[%s10640_s10 + $0x5e8] sm:$0xff] %v7210_v20  ;;  %7237 = vpow2.f32 %v6031_v28  ;;  %v6603_v4 = vpop.f32.mrf.mxu0 }
 0x4cc   :  { %v7214_v41 = vpop.eup %7213  ;;  %5633 = vst [vmem:[%s10640_s10 + $0x5f8] sm:$0xff] %v7212_v38  ;;  %7239 = vpow2.f32 %v6033_v31  ;;  %v3980_v38 = vadd.f32 %v9976_v7, %v10011_v25  ;;  %v3972_v9 = vadd.f32 %v9992_v47, %v10011_v25  ;;  %v3996_v32 = vadd.f32 %v6603_v4, %v10011_v25 }
 0x4cd   :  { %v7216_v61 = vpop.eup %7215  ;;  %5632 = vst [vmem:[%s10640_s10 + $0x5f0] sm:$0xff] %v7214_v41  ;;  %7241 = vpow2.f32 %v6037_v2  ;;  %v10017_v2 = vpop.f32.mrf.mxu1 }
 0x4ce   :  { %v7218_v54 = vpop.eup %7217  ;;  %5634 = vst [vmem:[%s10640_s10 + $0x600] sm:$0xff] %v7216_v61  ;;  %7243 = vpow2.f32 %v6039_v19  ;;  %v3987_v7 = vpop.f32.mrf.mxu0  ;;  %v5868_v4 = vmul.f32 -1.442695, %v3996_v32 }
 0x4cf   :  { %v7220_v13 = vpop.eup %7219  ;;  %v4966_v57 = vadd.f32 1.0, %v7218_v54  ;;  %7245 = vpow2.f32 %v6038_v8 }
 0x4d0   :  { %v7222_v50 = vpop.eup %7221  ;;  %v4968_v58 = vadd.f32 1.0, %v7220_v13  ;;  %7247 = vpow2.f32 %v6040_v63  ;;  %v3781_v63 = vadd.f32 %v9810_v59, %v10013_v40  ;;  %v5840_v59 = vmul.f32 -1.442695, %v3980_v38  ;;  %v6604_v60 = vpop.f32.mrf.mxu0 }
 0x4d1   :  { %v7224_v24 = vpop.eup %7223  ;;  %7249 = vrcp.f32 %v4966_v57  ;;  %v4967_v33 = vadd.f32 1.0, %v7222_v50  ;;  %v5824_v50 = vmul.f32 -1.442695, %v3779_v53 }
 0x4d2   :  { %v7226_v18 = vpop.eup %7225  ;;  %7251 = vrcp.f32 %v4968_v58  ;;  %v4969_v29 = vadd.f32 1.0, %v7224_v24  ;;  %v3783_v58 = vadd.f32 %v9815_v62, %v10007_v42  ;;  %v10027_v24 = vpop.f32.mrf.mxu1  ;;  %v5825_v47 = vmul.f32 -1.442695, %v3781_v63 }
 0x4d3   :  { %v7228_v37 = vpop.eup %7227  ;;  %7253 = vrcp.f32 %v4967_v33  ;;  %v4973_v21 = vadd.f32 1.0, %v7226_v18  ;;  %v3983_v18 = vadd.f32 %v6600_v55, %v10011_v25 }
 0x4d4   :  { %v7230_v30 = vpop.eup %7229  ;;  %7255 = vrcp.f32 %v4969_v29  ;;  %v4975_v36 = vadd.f32 1.0, %v7228_v37  ;;  %v5826_v37 = vmul.f32 -1.442695, %v3972_v9  ;;  %v5831_v43 = vmul.f32 -1.442695, %v3783_v58 }
 0x4d5   :  { %v7232_v45 = vpop.eup %7231  ;;  %7257 = vrcp.f32 %v4973_v21  ;;  %v4974_v39 = vadd.f32 1.0, %v7230_v30  ;;  %v3975_v21 = vadd.f32 %v3974_v51, %v10011_v25  ;;  %v3789_v30 = vadd.f32 %v9821_v44, %v10007_v42 }
 0x4d6   :  { %v7234_v15 = vpop.eup %7233  ;;  %7259 = vrcp.f32 %v4975_v36  ;;  %v4976_v14 = vadd.f32 1.0, %v7232_v45  ;;  %v10044_v36 = vpop.f32.mrf.mxu1  ;;  %v3791_v44 = vadd.f32 %v9830_v46, %v10013_v40 }
 0x4d7   :  { %v7236_v12 = vpop.eup %7235  ;;  %7261 = vrcp.f32 %v4974_v39  ;;  %v4980_v1 = vadd.f32 1.0, %v7234_v15  ;;  %v5847_v39 = vmul.f32 -1.442695, %v3983_v18  ;;  %v5832_v15 = vmul.f32 -1.442695, %v3785_v35  ;;  %v3990_v46 = vpop.f32.mrf.mxu0 }
 0x4d8   :  { %v7238_v28 = vpop.eup %7237  ;;  %7263 = vrcp.f32 %v4976_v14  ;;  %v4982_v27 = vadd.f32 1.0, %v7236_v12  ;;  %v5833_v12 = vmul.f32 -1.442695, %v3975_v21  ;;  %v5839_v38 = vmul.f32 -1.442695, %v3791_v44 }
 0x4d9   :  { %v7240_v52 = vpop.eup %7239  ;;  %7265 = vrcp.f32 %v4980_v1  ;;  %v4981_v31 = vadd.f32 1.0, %v7238_v28  ;;  %v3988_v1 = vadd.f32 %v3987_v7, %v10011_v25  ;;  %v3991_v63 = vadd.f32 %v3990_v46, %v10011_v25  ;;  %v10082_v9 = vpop.f32.mrf.mxu0 }
 0x4da   :  { %v7242_v20 = vpop.eup %7241  ;;  %7267 = vrcp.f32 %v4982_v27  ;;  %v4983_v19 = vadd.f32 1.0, %v7240_v52  ;;  %v5838_v27 = vmul.f32 -1.442695, %v3789_v30  ;;  %v3793_v52 = vadd.f32 %v9847_v48, %v10007_v42 }
 0x4db   :  { %v7244_v8 = vpop.eup %7243  ;;  %7269 = vrcp.f32 %v4981_v31  ;;  %v4987_v41 = vadd.f32 1.0, %v7242_v20  ;;  %v10064_v31 = vpop.f32.mrf.mxu1  ;;  %v3999_v20 = vadd.f32 %v6604_v60, %v10011_v25  ;;  %v3795_v48 = vadd.f32 %v9867_v49, %v10013_v40 }
 0x4dc   :  { %v7246_v61 = vpop.eup %7245  ;;  %7271 = vrcp.f32 %v4983_v19  ;;  %v4989_v54 = vadd.f32 1.0, %v7244_v8 }
 0x4dd   :  { %v7248_v13 = vpop.eup %7247  ;;  %7273 = vrcp.f32 %v4987_v41  ;;  %v4988_v57 = vadd.f32 1.0, %v7246_v61  ;;  %v5854_v41 = vmul.f32 -1.442695, %v3988_v1  ;;  %v5846_v58 = vmul.f32 -1.442695, %v3795_v48 }
 0x4de   :  { %v7250_v33 = vpop.eup %7249  ;;  %7275 = vrcp.f32 %v4989_v54  ;;  %v4990_v26 = vadd.f32 1.0, %v7248_v13  ;;  %v5845_v54 = vmul.f32 -1.442695, %v3793_v52  ;;  %v10084_v13 = vpop.f32.mrf.mxu1 }
 0x4df   :  { %v7252_v29 = vpop.eup %7251  ;;  %5638 = vst [vmem:[%s10640_s10 + $0x620] sm:$0xff] %v7250_v33  ;;  %7277 = vrcp.f32 %v4988_v57  ;;  %v5875_v57 = vmul.f32 -1.442695, %v3999_v20  ;;  %v5861_v33 = vmul.f32 -1.442695, %v3991_v63 }
 0x4e0   :  { %v7254_v62 = vpop.eup %7253  ;;  %5640 = vst [vmem:[%s10640_s10 + $0x630] sm:$0xff] %v7252_v29  ;;  %7279 = vrcp.f32 %v4990_v26  ;;  %v10098_v18 = vpop.f32.mrf.mxu1 }
 0x4e1   :  { %v7256_v55 = vpop.eup %7255  ;;  %5639 = vst [vmem:[%s10640_s10 + $0x628] sm:$0xff] %v7254_v62  ;;  %7281 = vpow2.f32 %v5824_v50 }
 0x4e2   :  { %v7258_v45 = vpop.eup %7257  ;;  %5641 = vst [vmem:[%s10640_s10 + $0x638] sm:$0xff] %v7256_v55  ;;  %7283 = vpow2.f32 %v5840_v59  ;;  %v4003_v59 = vpop.f32.mrf.mxu0 }
 0x4e3   :  { %v7260_v51 = vpop.eup %7259  ;;  %5645 = vst [vmem:[%s10640_s10 + $0x658] sm:$0xff] %v7258_v45  ;;  %7285 = vpow2.f32 %v5825_v47  ;;  %v10103_v30 = vpop.f32.mrf.mxu1 }
 0x4e4   :  { %v7262_v14 = vpop.eup %7261  ;;  %5647 = vst [vmem:[%s10640_s10 + $0x668] sm:$0xff] %v7260_v51  ;;  %7287 = vpow2.f32 %v5826_v37 }
 0x4e5   :  { %v7264_v28 = vpop.eup %7263  ;;  %5646 = vst [vmem:[%s10640_s10 + $0x660] sm:$0xff] %v7262_v14  ;;  %7289 = vpow2.f32 %v5831_v43  ;;  %v6608_v43 = vpop.f32.mrf.mxu0 }
 0x4e6   :  { %v7266_v53 = vpop.eup %7265  ;;  %5648 = vst [vmem:[%s10640_s10 + $0x670] sm:$0xff] %v7264_v28  ;;  %7291 = vpow2.f32 %v5847_v39  ;;  %v10105_v1 = vpop.f32.mrf.mxu1 }
 0x4e7   :  { %v7268_v19 = vpop.eup %7267  ;;  %5652 = vst [vmem:[%s10640_s10 + $0x690] sm:$0xff] %v7266_v53  ;;  %7293 = vpow2.f32 %v5832_v15 }
 0x4e8   :  { %v7270_v8 = vpop.eup %7269  ;;  %5654 = vst [vmem:[%s10640_s10 + $0x6a0] sm:$0xff] %v7268_v19  ;;  %7295 = vpow2.f32 %v5833_v12  ;;  %v4006_v12 = vpop.f32.mrf.mxu0 }
 0x4e9   :  { %v7272_v61 = vpop.eup %7271  ;;  %5653 = vst [vmem:[%s10640_s10 + $0x698] sm:$0xff] %v7270_v8  ;;  %7297 = vpow2.f32 %v5838_v27  ;;  %v10109_v8 = vpop.f32.mrf.mxu1 }
 0x4ea   :  { %v7274_v49 = vpop.eup %7273  ;;  %5655 = vst [vmem:[%s10640_s10 + $0x6a8] sm:$0xff] %v7272_v61  ;;  %7299 = vpow2.f32 %v5868_v4  ;;  %v6611_v48 = vpop.f32.mrf.mxu0  ;;  %v4012_v61 = vadd.f32 %v10082_v9, %v10011_v25 }
 0x4eb   :  { %v7276_v50 = vpop.eup %7275  ;;  %5659 = vst [vmem:[%s10640_s10 + $0x6c8] sm:$0xff] %v7274_v49  ;;  %7301 = vpow2.f32 %v5839_v38  ;;  %v3799_v38 = vadd.f32 %v9887_v23, %v10007_v42  ;;  %v4004_v23 = vadd.f32 %v4003_v59, %v10011_v25  ;;  %v10118_v9 = vpop.f32.mrf.mxu1 }
 0x4ec   :  { %v7278_v7 = vpop.eup %7277  ;;  %5661 = vst [vmem:[%s10640_s10 + $0x6d8] sm:$0xff] %v7276_v50  ;;  %7303 = vpow2.f32 %v5854_v41 }
 0x4ed   :  { %v7280_v26 = vpop.eup %7279  ;;  %5660 = vst [vmem:[%s10640_s10 + $0x6d0] sm:$0xff] %v7278_v7  ;;  %7305 = vpow2.f32 %v5845_v54 }
 0x4ee   :  { %v7282_v29 = vpop.eup %7281  ;;  %5662 = vst [vmem:[%s10640_s10 + $0x6e0] sm:$0xff] %v7280_v26  ;;  %7307 = vpow2.f32 %v5875_v57  ;;  %v3801_v57 = vadd.f32 %v9901_v22, %v10013_v40  ;;  %v5852_v26 = vmul.f32 -1.442695, %v3799_v38  ;;  %v4015_v22 = vadd.f32 %v6608_v43, %v10011_v25 }
 0x4ef   :  { %v7284_v47 = vpop.eup %7283  ;;  %v4774_v35 = vadd.f32 1.0, %v7282_v29  ;;  %7309 = vpow2.f32 %v5846_v58  ;;  %v3803_v29 = vadd.f32 %v9906_v5, %v10007_v42  ;;  %v4007_v43 = vadd.f32 %v4006_v12, %v10011_v25 }
 0x4f0   :  { %v7286_v62 = vpop.eup %7285  ;;  %v4790_v37 = vadd.f32 1.0, %v7284_v47  ;;  %7311 = vpow2.f32 %v5861_v33  ;;  %v4019_v47 = vpop.f32.mrf.mxu0  ;;  %v5853_v59 = vmul.f32 -1.442695, %v3801_v57 }
 0x4f1   :  { %v7288_v21 = vpop.eup %7287  ;;  %7313 = vrcp.f32 %v4774_v35  ;;  %v4775_v55 = vadd.f32 1.0, %v7286_v62 }
 0x4f2   :  { %v7290_v60 = vpop.eup %7289  ;;  %7315 = vrcp.f32 %v4790_v37  ;;  %v4776_v45 = vadd.f32 1.0, %v7288_v21  ;;  %v5896_v37 = vmul.f32 -1.442695, %v4012_v61  ;;  %v3815_v61 = vadd.f32 %v9958_v6, %v10013_v40 }
 0x4f3   :  { %v7292_v39 = vpop.eup %7291  ;;  %7317 = vrcp.f32 %v4775_v55  ;;  %v4781_v32 = vadd.f32 1.0, %v7290_v60  ;;  %v3805_v55 = vadd.f32 %v9908_v10, %v10013_v40  ;;  %v5882_v60 = vmul.f32 -1.442695, %v4004_v23 }
 0x4f4   :  { %v7294_v51 = vpop.eup %7293  ;;  %7319 = vrcp.f32 %v4776_v45  ;;  %v4797_v15 = vadd.f32 1.0, %v7292_v39  ;;  %v5859_v39 = vmul.f32 -1.442695, %v3803_v29  ;;  %v3809_v10 = vadd.f32 %v9912_v16, %v10007_v42 }
 0x4f5   :  { %v7296_v44 = vpop.eup %7295  ;;  %7321 = vrcp.f32 %v4781_v32  ;;  %v4782_v14 = vadd.f32 1.0, %v7294_v51  ;;  %v6612_v32 = vpop.f32.mrf.mxu0  ;;  %v5860_v16 = vmul.f32 -1.442695, %v3805_v55  ;;  %v5874_v29 = vmul.f32 -1.442695, %v3815_v61 }
 0x4f6   :  { %v7298_v28 = vpop.eup %7297  ;;  %7323 = vrcp.f32 %v4797_v15  ;;  %v4783_v27 = vadd.f32 1.0, %v7296_v44  ;;  %v10136_v51 = vpop.f32.mrf.mxu1  ;;  %v5903_v44 = vmul.f32 -1.442695, %v4015_v22 }
 0x4f7   :  { %v7300_v52 = vpop.eup %7299  ;;  %7325 = vrcp.f32 %v4782_v14  ;;  %v4788_v46 = vadd.f32 1.0, %v7298_v28  ;;  %v4028_v14 = vadd.f32 %v6611_v48, %v10011_v25  ;;  %v3811_v28 = vadd.f32 %v9921_v0, %v10013_v40 }
 0x4f8   :  { %v7302_v53 = vpop.eup %7301  ;;  %7327 = vrcp.f32 %v4783_v27  ;;  %v4818_v4 = vadd.f32 1.0, %v7300_v52  ;;  %v5889_v52 = vmul.f32 -1.442695, %v4007_v43  ;;  %v3813_v0 = vadd.f32 %v9938_v11, %v10007_v42 }
 0x4f9   :  { %v7304_v20 = vpop.eup %7303  ;;  %7329 = vrcp.f32 %v4788_v46  ;;  %v4789_v19 = vadd.f32 1.0, %v7302_v53  ;;  %v4020_v46 = vadd.f32 %v4019_v47, %v10011_v25  ;;  %v5924_v48 = vmul.f32 -1.442695, %v4028_v14 }
 0x4fa   :  { %v7306_v41 = vpop.eup %7305  ;;  %7331 = vrcp.f32 %v4818_v4  ;;  %v4804_v63 = vadd.f32 1.0, %v7304_v20  ;;  %v5866_v4 = vmul.f32 -1.442695, %v3809_v10  ;;  %v4022_v20 = vpop.f32.mrf.mxu0  ;;  %v5867_v11 = vmul.f32 -1.442695, %v3811_v28 }
 0x4fb   :  { %v7308_v54 = vpop.eup %7307  ;;  %7333 = vrcp.f32 %v4789_v19  ;;  %v4795_v49 = vadd.f32 1.0, %v7306_v41  ;;  %v10158_v19 = vpop.f32.mrf.mxu1  ;;  %v4031_v41 = vadd.f32 %v6612_v32, %v10011_v25  ;;  %v4023_v57 = vadd.f32 %v4022_v20, %v10011_v25 }
 0x4fc   :  { %v7310_v50 = vpop.eup %7309  ;;  %7335 = vrcp.f32 %v4804_v63  ;;  %v4825_v58 = vadd.f32 1.0, %v7308_v54  ;;  %v10178_v23 = vpop.f32.mrf.mxu0 }
 0x4fd   :  { %v7312_v7 = vpop.eup %7311  ;;  %7337 = vrcp.f32 %v4795_v49  ;;  %v4796_v33 = vadd.f32 1.0, %v7310_v50  ;;  %v5910_v49 = vmul.f32 -1.442695, %v4020_v46  ;;  %v10180_v6 = vpop.f32.mrf.mxu1 }
 0x4fe   :  { %v7314_v35 = vpop.eup %7313  ;;  %7339 = vrcp.f32 %v4825_v58  ;;  %v4811_v62 = vadd.f32 1.0, %v7312_v7  ;;  %v5873_v58 = vmul.f32 -1.442695, %v3813_v0 }
 0x4ff   :  { %v7316_v21 = vpop.eup %7315  ;;  %5446 = vst [vmem:[%s10640_s10 + $0x20] sm:$0xff] %v7314_v35  ;;  %7341 = vrcp.f32 %v4796_v33  ;;  %v5931_v33 = vmul.f32 -1.442695, %v4031_v41  ;;  %v5917_v35 = vmul.f32 -1.442695, %v4023_v57  ;;  %v10196_v22 = vpop.f32.mrf.mxu1 }
 0x500   :  { %v7318_v5 = vpop.eup %7317  ;;  %5462 = vst.msk [vmem:[%s10640_s10 + $0xa0] sm:$0xff] %vm1699_vm0, %v7316_v21  ;;  %7343 = vrcp.f32 %v4811_v62 }
 0x501   :  { %v7320_v45 = vpop.eup %7319  ;;  %5447 = vst [vmem:[%s10640_s10 + $0x28] sm:$0xff] %v7318_v5  ;;  %7345 = vpow2.f32 %v5852_v26  ;;  %v10202_v10 = vpop.f32.mrf.mxu1 }
 0x502   :  { %v7322_v15 = vpop.eup %7321  ;;  %5448 = vst.msk [vmem:[%s10640_s10 + $0x30] sm:$0xff] %vm1699_vm0, %v7320_v45  ;;  %7347 = vpow2.f32 %v5896_v37  ;;  %v4035_v37 = vpop.f32.mrf.mxu0 }
 0x503   :  { %v7324_v12 = vpop.eup %7323  ;;  %5453 = vst [vmem:[%s10640_s10 + $0x58] sm:$0xff] %v7322_v15  ;;  %7349 = vpow2.f32 %v5853_v59  ;;  %v10204_v46 = vpop.f32.mrf.mxu1 }
 0x504   :  { %v7326_v27 = vpop.eup %7325  ;;  %5469 = vst.msk [vmem:[%s10640_s10 + $0xd8] sm:$0xff] %vm1699_vm0, %v7324_v12  ;;  %7351 = vpow2.f32 %v5882_v60 }
 0x505   :  { %v7328_v53 = vpop.eup %7327  ;;  %5454 = vst [vmem:[%s10640_s10 + $0x60] sm:$0xff] %v7326_v27  ;;  %7353 = vpow2.f32 %v5859_v39  ;;  %v6616_v39 = vpop.f32.mrf.mxu0 }
 0x506   :  { %v7330_v38 = vpop.eup %7329  ;;  %5455 = vst.msk [vmem:[%s10640_s10 + $0x68] sm:$0xff] %vm1699_vm0, %v7328_v53  ;;  %7355 = vpow2.f32 %v5903_v44 }
 0x507   :  { %v7332_v63 = vpop.eup %7331  ;;  %5460 = vst [vmem:[%s10640_s10 + $0x90] sm:$0xff] %v7330_v38  ;;  %7357 = vpow2.f32 %v5860_v16 }
 0x508   :  { %v7334_v54 = vpop.eup %7333  ;;  %5490 = vst.msk [vmem:[%s10640_s10 + $0x180] sm:$0xff] %vm1699_vm0, %v7332_v63  ;;  %7359 = vpow2.f32 %v5889_v52  ;;  %v4038_v52 = vpop.f32.mrf.mxu0 }
 0x509   :  { %v7336_v50 = vpop.eup %7335  ;;  %5461 = vst [vmem:[%s10640_s10 + $0x98] sm:$0xff] %v7334_v54  ;;  %7361 = vpow2.f32 %v5866_v4  ;;  %v10208_v54 = vpop.f32.mrf.mxu1 }
 0x50a   :  { %v7338_v7 = vpop.eup %7337  ;;  %5476 = vst.msk [vmem:[%s10640_s10 + $0x110] sm:$0xff] %vm1699_vm0, %v7336_v50  ;;  %7363 = vpow2.f32 %v5924_v48  ;;  %v6619_v61 = vpop.f32.mrf.mxu0  ;;  %v4044_v50 = vadd.f32 %v10178_v23, %v10011_v25 }
 0x50b   :  { %v7340_v26 = vpop.eup %7339  ;;  %5467 = vst [vmem:[%s10640_s10 + $0xc8] sm:$0xff] %v7338_v7  ;;  %7365 = vpow2.f32 %v5867_v11  ;;  %v3819_v11 = vadd.f32 %v9978_v34, %v10007_v42  ;;  %v4036_v34 = vadd.f32 %v4035_v37, %v10011_v25  ;;  %v10217_v23 = vpop.f32.mrf.mxu1 }
 0x50c   :  { %v7342_v47 = vpop.eup %7341  ;;  %5497 = vst.msk [vmem:[%s10640_s10 + $0x1b8] sm:$0xff] %vm1699_vm0, %v7340_v26  ;;  %7367 = vpow2.f32 %v5910_v49 }
 0x50d   :  { %v7344_v62 = vpop.eup %7343  ;;  %5468 = vst [vmem:[%s10640_s10 + $0xd0] sm:$0xff] %v7342_v47  ;;  %7369 = vpow2.f32 %v5873_v58 }
 0x50e   :  { %v7346_v21 = vpop.eup %7345  ;;  %5483 = vst.msk [vmem:[%s10640_s10 + $0x148] sm:$0xff] %vm1699_vm0, %v7344_v62  ;;  %7371 = vpow2.f32 %v5931_v33  ;;  %v3821_v33 = vadd.f32 %v9994_v56, %v10013_v40  ;;  %v5880_v62 = vmul.f32 -1.442695, %v3819_v11  ;;  %v4047_v56 = vadd.f32 %v6616_v39, %v10011_v25 }
 0x50f   :  { %v7348_v59 = vpop.eup %7347  ;;  %v4802_v55 = vadd.f32 1.0, %v7346_v21  ;;  %7373 = vpow2.f32 %v5874_v29  ;;  %v3823_v21 = vadd.f32 %v10000_v3, %v10007_v42  ;;  %v4039_v39 = vadd.f32 %v4038_v52, %v10011_v25 }
 0x510   :  { %v7350_v5 = vpop.eup %7349  ;;  %v4846_v60 = vadd.f32 1.0, %v7348_v59  ;;  %7375 = vpow2.f32 %v5917_v35  ;;  %v4051_v59 = vpop.f32.mrf.mxu0  ;;  %v5881_v37 = vmul.f32 -1.442695, %v3821_v33 }
 0x511   :  { %v7352_v43 = vpop.eup %7351  ;;  %7377 = vrcp.f32 %v4802_v55  ;;  %v4803_v45 = vadd.f32 1.0, %v7350_v5 }
 0x512   :  { %v7354_v32 = vpop.eup %7353  ;;  %7379 = vrcp.f32 %v4846_v60  ;;  %v4832_v15 = vadd.f32 1.0, %v7352_v43  ;;  %v5952_v60 = vmul.f32 -1.442695, %v4044_v50  ;;  %v3835_v50 = vadd.f32 %v10064_v31, %v10013_v40 }
 0x513   :  { %v7356_v44 = vpop.eup %7355  ;;  %7381 = vrcp.f32 %v4803_v45  ;;  %v4809_v14 = vadd.f32 1.0, %v7354_v32  ;;  %v3825_v45 = vadd.f32 %v10009_v17, %v10013_v40  ;;  %v5938_v32 = vmul.f32 -1.442695, %v4036_v34 }
 0x514   :  { %v7358_v12 = vpop.eup %7357  ;;  %7383 = vrcp.f32 %v4832_v15  ;;  %v4853_v16 = vadd.f32 1.0, %v7356_v44  ;;  %v5887_v44 = vmul.f32 -1.442695, %v3823_v21  ;;  %v3829_v17 = vadd.f32 %v10017_v2, %v10007_v42 }
 0x515   :  { %v7360_v28 = vpop.eup %7359  ;;  %7385 = vrcp.f32 %v4809_v14  ;;  %v4810_v27 = vadd.f32 1.0, %v7358_v12  ;;  %v6620_v14 = vpop.f32.mrf.mxu0  ;;  %v5888_v2 = vmul.f32 -1.442695, %v3825_v45  ;;  %v5902_v21 = vmul.f32 -1.442695, %v3835_v50 }
 0x516   :  { %v7362_v53 = vpop.eup %7361  ;;  %7387 = vrcp.f32 %v4853_v16  ;;  %v4839_v4 = vadd.f32 1.0, %v7360_v28  ;;  %v10235_v12 = vpop.f32.mrf.mxu1  ;;  %v5959_v28 = vmul.f32 -1.442695, %v4047_v56 }
 0x517   :  { %v7364_v0 = vpop.eup %7363  ;;  %7389 = vrcp.f32 %v4810_v27  ;;  %v4816_v20 = vadd.f32 1.0, %v7362_v53  ;;  %v4060_v27 = vadd.f32 %v6619_v61, %v10011_v25  ;;  %v3831_v53 = vadd.f32 %v10027_v24, %v10013_v40 }
 0x518   :  { %v7366_v38 = vpop.eup %7365  ;;  %7391 = vrcp.f32 %v4839_v4  ;;  %v4874_v48 = vadd.f32 1.0, %v7364_v0  ;;  %v5945_v0 = vmul.f32 -1.442695, %v4039_v39  ;;  %v3833_v24 = vadd.f32 %v10044_v36, %v10007_v42 }
 0x519   :  { %v7368_v41 = vpop.eup %7367  ;;  %7393 = vrcp.f32 %v4816_v20  ;;  %v4817_v63 = vadd.f32 1.0, %v7366_v38  ;;  %v4052_v20 = vadd.f32 %v4051_v59, %v10011_v25  ;;  %v5980_v61 = vmul.f32 -1.442695, %v4060_v27 }
 0x51a   :  { %v7370_v49 = vpop.eup %7369  ;;  %7395 = vrcp.f32 %v4874_v48  ;;  %v4860_v57 = vadd.f32 1.0, %v7368_v41  ;;  %v5894_v48 = vmul.f32 -1.442695, %v3829_v17  ;;  %v4054_v41 = vpop.f32.mrf.mxu0  ;;  %v5895_v36 = vmul.f32 -1.442695, %v3831_v53 }
 0x51b   :  { %v7372_v58 = vpop.eup %7371  ;;  %7397 = vrcp.f32 %v4817_v63  ;;  %v4823_v7 = vadd.f32 1.0, %v7370_v49  ;;  %v10257_v63 = vpop.f32.mrf.mxu1  ;;  %v4063_v49 = vadd.f32 %v6620_v14, %v10011_v25  ;;  %v4055_v33 = vadd.f32 %v4054_v41, %v10011_v25 }
 0x51c   :  { %v7374_v26 = vpop.eup %7373  ;;  %7399 = vrcp.f32 %v4860_v57  ;;  %v4881_v29 = vadd.f32 1.0, %v7372_v58  ;;  %v10277_v34 = vpop.f32.mrf.mxu0 }
 0x51d   :  { %v7376_v47 = vpop.eup %7375  ;;  %7401 = vrcp.f32 %v4823_v7  ;;  %v4824_v35 = vadd.f32 1.0, %v7374_v26  ;;  %v5966_v7 = vmul.f32 -1.442695, %v4052_v20  ;;  %v10279_v31 = vpop.f32.mrf.mxu1 }
 0x51e   :  { %v7378_v55 = vpop.eup %7377  ;;  %7403 = vrcp.f32 %v4881_v29  ;;  %v4867_v5 = vadd.f32 1.0, %v7376_v47  ;;  %v5901_v29 = vmul.f32 -1.442695, %v3833_v24 }
 0x51f   :  { %v7380_v43 = vpop.eup %7379  ;;  %5474 = vst [vmem:[%s10640_s10 + $0x100] sm:$0xff] %v7378_v55  ;;  %7405 = vrcp.f32 %v4824_v35  ;;  %v5987_v35 = vmul.f32 -1.442695, %v4063_v49  ;;  %v5973_v55 = vmul.f32 -1.442695, %v4055_v33  ;;  %v10295_v56 = vpop.f32.mrf.mxu1 }
 0x520   :  { %v7382_v3 = vpop.eup %7381  ;;  %5518 = vst.msk [vmem:[%s10640_s10 + $0x260] sm:$0xff] %vm1699_vm0, %v7380_v43  ;;  %7407 = vrcp.f32 %v4867_v5 }
 0x521   :  { %v7384_v15 = vpop.eup %7383  ;;  %5475 = vst [vmem:[%s10640_s10 + $0x108] sm:$0xff] %v7382_v3  ;;  %7409 = vpow2.f32 %v5880_v62  ;;  %v10301_v17 = vpop.f32.mrf.mxu1 }
 0x522   :  { %v7386_v16 = vpop.eup %7385  ;;  %5504 = vst.msk [vmem:[%s10640_s10 + $0x1f0] sm:$0xff] %vm1699_vm0, %v7384_v15  ;;  %7411 = vpow2.f32 %v5952_v60  ;;  %v4067_v60 = vpop.f32.mrf.mxu0 }
 0x523   :  { %v7388_v52 = vpop.eup %7387  ;;  %5481 = vst [vmem:[%s10640_s10 + $0x138] sm:$0xff] %v7386_v16  ;;  %7413 = vpow2.f32 %v5881_v37  ;;  %v10303_v20 = vpop.f32.mrf.mxu1 }
 0x524   :  { %v7390_v4 = vpop.eup %7389  ;;  %5525 = vst.msk [vmem:[%s10640_s10 + $0x298] sm:$0xff] %vm1699_vm0, %v7388_v52  ;;  %7415 = vpow2.f32 %v5938_v32 }
 0x525   :  { %v7392_v38 = vpop.eup %7391  ;;  %5482 = vst [vmem:[%s10640_s10 + $0x140] sm:$0xff] %v7390_v4  ;;  %7417 = vpow2.f32 %v5887_v44  ;;  %v6624_v44 = vpop.f32.mrf.mxu0 }
 0x526   :  { %v7394_v11 = vpop.eup %7393  ;;  %5511 = vst.msk [vmem:[%s10640_s10 + $0x228] sm:$0xff] %vm1699_vm0, %v7392_v38  ;;  %7419 = vpow2.f32 %v5959_v28 }
 0x527   :  { %v7396_v57 = vpop.eup %7395  ;;  %5488 = vst [vmem:[%s10640_s10 + $0x170] sm:$0xff] %v7394_v11  ;;  %7421 = vpow2.f32 %v5888_v2 }
 0x528   :  { %v7398_v58 = vpop.eup %7397  ;;  %5546 = vst.msk [vmem:[%s10640_s10 + $0x340] sm:$0xff] %vm1699_vm0, %v7396_v57  ;;  %7423 = vpow2.f32 %v5945_v0  ;;  %v4070_v0 = vpop.f32.mrf.mxu0 }
 0x529   :  { %v7400_v26 = vpop.eup %7399  ;;  %5489 = vst [vmem:[%s10640_s10 + $0x178] sm:$0xff] %v7398_v58  ;;  %7425 = vpow2.f32 %v5894_v48  ;;  %v10307_v58 = vpop.f32.mrf.mxu1 }
 0x52a   :  { %v7402_v47 = vpop.eup %7401  ;;  %5532 = vst.msk [vmem:[%s10640_s10 + $0x2d0] sm:$0xff] %vm1699_vm0, %v7400_v26  ;;  %7427 = vpow2.f32 %v5980_v61  ;;  %v6627_v50 = vpop.f32.mrf.mxu0  ;;  %v4076_v26 = vadd.f32 %v10277_v34, %v10011_v25 }
 0x52b   :  { %v7404_v62 = vpop.eup %7403  ;;  %5495 = vst [vmem:[%s10640_s10 + $0x1a8] sm:$0xff] %v7402_v47  ;;  %7429 = vpow2.f32 %v5895_v36  ;;  %v3839_v36 = vadd.f32 %v10084_v13, %v10007_v42  ;;  %v4068_v13 = vadd.f32 %v4067_v60, %v10011_v25  ;;  %v10316_v34 = vpop.f32.mrf.mxu1 }
 0x52c   :  { %v7406_v59 = vpop.eup %7405  ;;  %5553 = vst.msk [vmem:[%s10640_s10 + $0x378] sm:$0xff] %vm1699_vm0, %v7404_v62  ;;  %7431 = vpow2.f32 %v5966_v7 }
 0x52d   :  { %v7408_v5 = vpop.eup %7407  ;;  %5496 = vst [vmem:[%s10640_s10 + $0x1b0] sm:$0xff] %v7406_v59  ;;  %7433 = vpow2.f32 %v5901_v29 }
 0x52e   :  { %v7410_v43 = vpop.eup %7409  ;;  %5539 = vst.msk [vmem:[%s10640_s10 + $0x308] sm:$0xff] %vm1699_vm0, %v7408_v5  ;;  %7435 = vpow2.f32 %v5987_v35  ;;  %v3841_v35 = vadd.f32 %v10098_v18, %v10013_v40  ;;  %v5908_v5 = vmul.f32 -1.442695, %v3839_v36  ;;  %v4079_v18 = vadd.f32 %v6624_v44, %v10011_v25 }
 0x52f   :  { %v7412_v37 = vpop.eup %7411  ;;  %v4830_v45 = vadd.f32 1.0, %v7410_v43  ;;  %7437 = vpow2.f32 %v5902_v21  ;;  %v3843_v43 = vadd.f32 %v10103_v30, %v10007_v42  ;;  %v4071_v44 = vadd.f32 %v4070_v0, %v10011_v25 }
 0x530   :  { %v7414_v3 = vpop.eup %7413  ;;  %v4902_v32 = vadd.f32 1.0, %v7412_v37  ;;  %7439 = vpow2.f32 %v5973_v55  ;;  %v4083_v37 = vpop.f32.mrf.mxu0  ;;  %v5909_v60 = vmul.f32 -1.442695, %v3841_v35 }
 0x531   :  { %v7416_v39 = vpop.eup %7415  ;;  %7441 = vrcp.f32 %v4830_v45  ;;  %v4831_v15 = vadd.f32 1.0, %v7414_v3 }
 0x532   :  { %v7418_v14 = vpop.eup %7417  ;;  %7443 = vrcp.f32 %v4902_v32  ;;  %v4888_v16 = vadd.f32 1.0, %v7416_v39  ;;  %v6008_v32 = vmul.f32 -1.442695, %v4076_v26  ;;  %v3855_v26 = vadd.f32 %v10158_v19, %v10013_v40 }
 0x533   :  { %v7420_v28 = vpop.eup %7419  ;;  %7445 = vrcp.f32 %v4831_v15  ;;  %v4837_v27 = vadd.f32 1.0, %v7418_v14  ;;  %v3845_v15 = vadd.f32 %v10105_v1, %v10013_v40  ;;  %v5994_v14 = vmul.f32 -1.442695, %v4068_v13 }
 0x534   :  { %v7422_v52 = vpop.eup %7421  ;;  %7447 = vrcp.f32 %v4888_v16  ;;  %v4909_v2 = vadd.f32 1.0, %v7420_v28  ;;  %v5915_v28 = vmul.f32 -1.442695, %v3843_v43  ;;  %v3849_v1 = vadd.f32 %v10109_v8, %v10007_v42 }
 0x535   :  { %v7424_v53 = vpop.eup %7423  ;;  %7449 = vrcp.f32 %v4837_v27  ;;  %v4838_v4 = vadd.f32 1.0, %v7422_v52  ;;  %v6628_v27 = vpop.f32.mrf.mxu0  ;;  %v5916_v8 = vmul.f32 -1.442695, %v3845_v15 }
 0x536   :  { %v7426_v38 = vpop.eup %7425  ;;  %7451 = vrcp.f32 %v4909_v2  ;;  %v4895_v48 = vadd.f32 1.0, %v7424_v53  ;;  %v10334_v52 = vpop.f32.mrf.mxu1  ;;  %v6015_v53 = vmul.f32 -1.442695, %v4079_v18 }
 0x537   :  { %v7428_v24 = vpop.eup %7427  ;;  %7453 = vrcp.f32 %v4838_v4  ;;  %v4844_v41 = vadd.f32 1.0, %v7426_v38  ;;  %v4092_v4 = vadd.f32 %v6627_v50, %v10011_v25  ;;  %v3851_v38 = vadd.f32 %v10118_v9, %v10013_v40 }
 0x538   :  { %v7430_v11 = vpop.eup %7429  ;;  %7455 = vrcp.f32 %v4895_v48  ;;  %v4930_v61 = vadd.f32 1.0, %v7428_v24  ;;  %v6001_v24 = vmul.f32 -1.442695, %v4071_v44  ;;  %v3853_v9 = vadd.f32 %v10136_v51, %v10007_v42 }
 0x539   :  { %v7432_v49 = vpop.eup %7431  ;;  %7457 = vrcp.f32 %v4844_v41  ;;  %v4845_v57 = vadd.f32 1.0, %v7430_v11  ;;  %v4084_v41 = vadd.f32 %v4083_v37, %v10011_v25  ;;  %v6036_v50 = vmul.f32 -1.442695, %v4092_v4 }
 0x53a   :  { %v7434_v7 = vpop.eup %7433  ;;  %7459 = vrcp.f32 %v4930_v61  ;;  %v4916_v33 = vadd.f32 1.0, %v7432_v49  ;;  %v5922_v61 = vmul.f32 -1.442695, %v3849_v1  ;;  %v4086_v49 = vpop.f32.mrf.mxu0  ;;  %v5923_v51 = vmul.f32 -1.442695, %v3851_v38 }
 0x53b   :  { %v7436_v29 = vpop.eup %7435  ;;  %7461 = vrcp.f32 %v4845_v57  ;;  %v4851_v47 = vadd.f32 1.0, %v7434_v7  ;;  %v10356_v57 = vpop.f32.mrf.mxu1  ;;  %v4095_v7 = vadd.f32 %v6628_v27, %v10011_v25  ;;  %v4087_v35 = vadd.f32 %v4086_v49, %v10011_v25 }
 0x53c   :  { %v7438_v62 = vpop.eup %7437  ;;  %7463 = vrcp.f32 %v4916_v33  ;;  %v4937_v21 = vadd.f32 1.0, %v7436_v29  ;;  %v5930_v25 = vmul.f32 -1.442695, %v3855_v26  ;;  %v3859_v49 = vadd.f32 %v10180_v6, %v10007_v42 }
 0x53d   :  { %v7440_v59 = vpop.eup %7439  ;;  %7465 = vrcp.f32 %v4851_v47  ;;  %v4852_v55 = vadd.f32 1.0, %v7438_v62  ;;  %v6022_v47 = vmul.f32 -1.442695, %v4084_v41  ;;  %v10376_v13 = vpop.f32.mrf.mxu1  ;;  %v6029_v43 = vmul.f32 -1.442695, %v4087_v35 }
 0x53e   :  { %v7442_v45 = vpop.eup %7441  ;;  %7467 = vrcp.f32 %v4937_v21  ;;  %v4923_v3 = vadd.f32 1.0, %v7440_v59  ;;  %v5929_v21 = vmul.f32 -1.442695, %v3853_v9  ;;  %v6043_v59 = vmul.f32 -1.442695, %v4095_v7 }
 0x53f   :  { %v7444_v39 = vpop.eup %7443  ;;  %5502 = vst [vmem:[%s10640_s10 + $0x1e0] sm:$0xff] %v7442_v45  ;;  %7469 = vrcp.f32 %v4852_v55  ;;  %v10392_v45 = vpop.f32.mrf.mxu1  ;;  %v3865_v6 = vadd.f32 %v10204_v46, %v10013_v40 }
 0x540   :  { %v7446_v30 = vpop.eup %7445  ;;  %5574 = vst.msk [vmem:[%s10640_s10 + $0x420] sm:$0xff] %vm1699_vm0, %v7444_v39  ;;  %7471 = vrcp.f32 %v4923_v3 }
 0x541   :  { %v7448_v16 = vpop.eup %7447  ;;  %5503 = vst [vmem:[%s10640_s10 + $0x1e8] sm:$0xff] %v7446_v30  ;;  %7473 = vpow2.f32 %v5908_v5 }
 0x542   :  { %v7450_v2 = vpop.eup %7449  ;;  %5560 = vst.msk [vmem:[%s10640_s10 + $0x3b0] sm:$0xff] %vm1699_vm0, %v7448_v16  ;;  %7475 = vpow2.f32 %v6008_v32 }
 0x543   :  { %v7452_v0 = vpop.eup %7451  ;;  %5509 = vst [vmem:[%s10640_s10 + $0x218] sm:$0xff] %v7450_v2  ;;  %7477 = vpow2.f32 %v5909_v60 }
 0x544   :  { %v7454_v48 = vpop.eup %7453  ;;  %5581 = vst.msk [vmem:[%s10640_s10 + $0x458] sm:$0xff] %vm1699_vm0, %v7452_v0  ;;  %7479 = vpow2.f32 %v5994_v14  ;;  %v10398_v14 = vpop.f32.mrf.mxu1 }
 0x545   :  { %v7456_v11 = vpop.eup %7455  ;;  %5510 = vst [vmem:[%s10640_s10 + $0x220] sm:$0xff] %v7454_v48  ;;  %7481 = vpow2.f32 %v5915_v28 }
 0x546   :  { %v7458_v36 = vpop.eup %7457  ;;  %5567 = vst.msk [vmem:[%s10640_s10 + $0x3e8] sm:$0xff] %vm1699_vm0, %v7456_v11  ;;  %7483 = vpow2.f32 %v6015_v53  ;;  %v10400_v0 = vpop.f32.mrf.mxu1 }
 0x547   :  { %v7460_v33 = vpop.eup %7459  ;;  %5516 = vst [vmem:[%s10640_s10 + $0x250] sm:$0xff] %v7458_v36  ;;  %7485 = vpow2.f32 %v5916_v8 }
 0x548   :  { %v7462_v29 = vpop.eup %7461  ;;  %5602 = vst.msk [vmem:[%s10640_s10 + $0x500] sm:$0xff] %vm1699_vm0, %v7460_v33  ;;  %7487 = vpow2.f32 %v6001_v24  ;;  %v10404_v36 = vpop.f32.mrf.mxu1  ;;  %v3861_v33 = vadd.f32 %v10196_v22, %v10013_v40 }
 0x549   :  { %v7464_v62 = vpop.eup %7463  ;;  %5517 = vst [vmem:[%s10640_s10 + $0x258] sm:$0xff] %v7462_v29  ;;  %7489 = vpow2.f32 %v5922_v61  ;;  %v3863_v29 = vadd.f32 %v10202_v10, %v10007_v42  ;;  %v3871_v10 = vadd.f32 %v10217_v23, %v10013_v40  ;;  %v3875_v23 = vadd.f32 %v10257_v63, %v10013_v40 }
 0x54a   :  { %v7466_v19 = vpop.eup %7465  ;;  %5588 = vst.msk [vmem:[%s10640_s10 + $0x490] sm:$0xff] %vm1699_vm0, %v7464_v62  ;;  %7491 = vpow2.f32 %v6036_v50  ;;  %v10414_v22 = vpop.f32.mrf.mxu1 }
 0x54b   :  { %v7468_v55 = vpop.eup %7467  ;;  %5523 = vst [vmem:[%s10640_s10 + $0x288] sm:$0xff] %v7466_v19  ;;  %7493 = vpow2.f32 %v5923_v51  ;;  %v5936_v19 = vmul.f32 -1.442695, %v3859_v49  ;;  %v5943_v46 = vmul.f32 -1.442695, %v3863_v29 }
 0x54c   :  { %v7470_v5 = vpop.eup %7469  ;;  %5609 = vst.msk [vmem:[%s10640_s10 + $0x538] sm:$0xff] %vm1699_vm0, %v7468_v55  ;;  %7495 = vpow2.f32 %v6022_v47  ;;  %v5951_v63 = vmul.f32 -1.442695, %v3871_v10 }
 0x54d   :  { %v7472_v37 = vpop.eup %7471  ;;  %5524 = vst [vmem:[%s10640_s10 + $0x290] sm:$0xff] %v7470_v5  ;;  %7497 = vpow2.f32 %v5929_v21  ;;  %v5937_v5 = vmul.f32 -1.442695, %v3861_v33 }
 0x54e   :  { %v7474_v3 = vpop.eup %7473  ;;  %5595 = vst.msk [vmem:[%s10640_s10 + $0x4c8] sm:$0xff] %vm1699_vm0, %v7472_v37  ;;  %7499 = vpow2.f32 %v6043_v59  ;;  %v3869_v59 = vadd.f32 %v10208_v54, %v10007_v42  ;;  %v3873_v37 = vadd.f32 %v10235_v12, %v10007_v42  ;;  %v3879_v12 = vadd.f32 %v10279_v31, %v10007_v42 }
 0x54f   :  { %v7476_v32 = vpop.eup %7475  ;;  %v4858_v18 = vadd.f32 1.0, %v7474_v3  ;;  %7501 = vpow2.f32 %v5930_v25  ;;  %v5944_v3 = vmul.f32 -1.442695, %v3865_v6 }
 0x550   :  { %v7478_v39 = vpop.eup %7477  ;;  %v4958_v60 = vadd.f32 1.0, %v7476_v32  ;;  %7503 = vpow2.f32 %v6029_v43  ;;  %v5957_v31 = vmul.f32 -1.442695, %v3873_v37 }
 0x551   :  { %v7480_v15 = vpop.eup %7479  ;;  %7505 = vrcp.f32 %v4858_v18  ;;  %v4859_v30 = vadd.f32 1.0, %v7478_v39  ;;  %v5950_v18 = vmul.f32 -1.442695, %v3869_v59  ;;  %v10434_v39 = vpop.f32.mrf.mxu1 }
 0x552   :  { %v7482_v44 = vpop.eup %7481  ;;  %7507 = vrcp.f32 %v4958_v60  ;;  %v4944_v16 = vadd.f32 1.0, %v7480_v15  ;;  %v3881_v15 = vadd.f32 %v10295_v56, %v10013_v40  ;;  %v3885_v56 = vadd.f32 %v10303_v20, %v10013_v40 }
 0x553   :  { %v7484_v28 = vpop.eup %7483  ;;  %7509 = vrcp.f32 %v4859_v30  ;;  %v4865_v1 = vadd.f32 1.0, %v7482_v44  ;;  %v3883_v44 = vadd.f32 %v10301_v17, %v10007_v42  ;;  %v3889_v17 = vadd.f32 %v10307_v58, %v10007_v42 }
 0x554   :  { %v7486_v27 = vpop.eup %7485  ;;  %7511 = vrcp.f32 %v4944_v16  ;;  %v4965_v2 = vadd.f32 1.0, %v7484_v28  ;;  %v5958_v28 = vmul.f32 -1.442695, %v3875_v23  ;;  %v5965_v20 = vmul.f32 -1.442695, %v3881_v15 }
 0x555   :  { %v7488_v53 = vpop.eup %7487  ;;  %7513 = vrcp.f32 %v4865_v1  ;;  %v4866_v4 = vadd.f32 1.0, %v7486_v27  ;;  %v5964_v27 = vmul.f32 -1.442695, %v3879_v12  ;;  %v5971_v58 = vmul.f32 -1.442695, %v3883_v44 }
 0x556   :  { %v7490_v8 = vpop.eup %7489  ;;  %7515 = vrcp.f32 %v4965_v2  ;;  %v4951_v38 = vadd.f32 1.0, %v7488_v53  ;;  %v10458_v2 = vpop.f32.mrf.mxu1 }
 0x557   :  { %v7492_v48 = vpop.eup %7491  ;;  %7517 = vrcp.f32 %v4866_v4  ;;  %v4872_v24 = vadd.f32 1.0, %v7490_v8  ;;  %v3891_v4 = vadd.f32 %v10316_v34, %v10013_v40  ;;  %v3895_v34 = vadd.f32 %v10356_v57, %v10013_v40 }
 0x558   :  { %v7494_v41 = vpop.eup %7493  ;;  %7519 = vrcp.f32 %v4951_v38  ;;  %v4986_v11 = vadd.f32 1.0, %v7492_v48  ;;  %v3893_v38 = vadd.f32 %v10334_v52, %v10007_v42 }
 0x559   :  { %v7496_v61 = vpop.eup %7495  ;;  %7521 = vrcp.f32 %v4872_v24  ;;  %v4873_v9 = vadd.f32 1.0, %v7494_v41  ;;  %v5972_v24 = vmul.f32 -1.442695, %v3885_v56 }
 0x55a   :  { %v7498_v50 = vpop.eup %7497  ;;  %7523 = vrcp.f32 %v4986_v11  ;;  %v4972_v7 = vadd.f32 1.0, %v7496_v61  ;;  %v5978_v11 = vmul.f32 -1.442695, %v3889_v17  ;;  %v10480_v61 = vpop.f32.mrf.mxu1  ;;  %v5985_v57 = vmul.f32 -1.442695, %v3893_v38 }
 0x55b   :  { %v7500_v51 = vpop.eup %7499  ;;  %7525 = vrcp.f32 %v4873_v9  ;;  %v4879_v26 = vadd.f32 1.0, %v7498_v50  ;;  %v5979_v9 = vmul.f32 -1.442695, %v3891_v4 }
 0x55c   :  { %v7502_v47 = vpop.eup %7501  ;;  %7527 = vrcp.f32 %v4972_v7  ;;  %v4993_v35 = vadd.f32 1.0, %v7500_v51  ;;  %v5986_v7 = vmul.f32 -1.442695, %v3895_v34  ;;  %v10496_v51 = vpop.f32.mrf.mxu1 }
 0x55d   :  { %v7504_v62 = vpop.eup %7503  ;;  %7529 = vrcp.f32 %v4879_v26  ;;  %v4880_v21 = vadd.f32 1.0, %v7502_v47 }
 0x55e   :  { %v7506_v55 = vpop.eup %7505  ;;  %7531 = vrcp.f32 %v4993_v35  ;;  %v4979_v25 = vadd.f32 1.0, %v7504_v62 }
 0x55f   :  { %v7508_v43 = vpop.eup %7507  ;;  %5530 = vst [vmem:[%s10640_s10 + $0x2c0] sm:$0xff] %v7506_v55  ;;  %7533 = vrcp.f32 %v4880_v21 }
 0x560   :  { %v7510_v54 = vpop.eup %7509  ;;  %5630 = vst.msk [vmem:[%s10640_s10 + $0x5e0] sm:$0xff] %vm1699_vm0, %v7508_v43  ;;  %7535 = vrcp.f32 %v4979_v25 }
 0x561   :  { %v7512_v32 = vpop.eup %7511  ;;  %5531 = vst [vmem:[%s10640_s10 + $0x2c8] sm:$0xff] %v7510_v54  ;;  %7537 = vpow2.f32 %v5936_v19  ;;  %v10502_v19 = vpop.f32.mrf.mxu1 }
 0x562   :  { %v7514_v60 = vpop.eup %7513  ;;  %5616 = vst.msk [vmem:[%s10640_s10 + $0x570] sm:$0xff] %vm1699_vm0, %v7512_v32  ;;  %7539 = vpow2.f32 %v5937_v5 }
 0x563   :  { %v7516_v30 = vpop.eup %7515  ;;  %5537 = vst [vmem:[%s10640_s10 + $0x2f8] sm:$0xff] %v7514_v60  ;;  %7541 = vpow2.f32 %v5943_v46  ;;  %v10504_v54 = vpop.f32.mrf.mxu1 }
 0x564   :  { %v7518_v16 = vpop.eup %7517  ;;  %5637 = vst.msk [vmem:[%s10640_s10 + $0x618] sm:$0xff] %vm1699_vm0, %v7516_v30  ;;  %7543 = vpow2.f32 %v5944_v3  ;;  %v3899_v30 = vadd.f32 %v10376_v13, %v10007_v42 }
 0x565   :  { %v7520_v1 = vpop.eup %7519  ;;  %5538 = vst [vmem:[%s10640_s10 + $0x300] sm:$0xff] %v7518_v16  ;;  %7545 = vpow2.f32 %v5950_v18 }
 0x566   :  { %v7522_v53 = vpop.eup %7521  ;;  %5623 = vst.msk [vmem:[%s10640_s10 + $0x5a8] sm:$0xff] %vm1699_vm0, %v7520_v1  ;;  %7547 = vpow2.f32 %v5951_v63 }
 0x567   :  { %v7524_v8 = vpop.eup %7523  ;;  %5544 = vst [vmem:[%s10640_s10 + $0x330] sm:$0xff] %v7522_v53  ;;  %7549 = vpow2.f32 %v5957_v31  ;;  %v3928_v31 = vpop.f32.mrf.mxu1 }
 0x568   :  { %v7526_v48 = vpop.eup %7525  ;;  %5658 = vst.msk [vmem:[%s10640_s10 + $0x6c0] sm:$0xff] %vm1699_vm0, %v7524_v8  ;;  %7551 = vpow2.f32 %v5958_v28  ;;  %v3901_v28 = vadd.f32 %v10392_v45, %v10013_v40  ;;  %v5992_v8 = vmul.f32 -1.442695, %v3899_v30 }
 0x569   :  { %v7528_v41 = vpop.eup %7527  ;;  %5545 = vst [vmem:[%s10640_s10 + $0x338] sm:$0xff] %v7526_v48  ;;  %7553 = vpow2.f32 %v5964_v27  ;;  %v3903_v27 = vadd.f32 %v10398_v14, %v10007_v42  ;;  %v3930_v45 = vpop.f32.mrf.mxu1  ;;  %v3911_v14 = vadd.f32 %v10414_v22, %v10013_v40  ;;  %v3915_v22 = vadd.f32 %v10458_v2, %v10013_v40 }
 0x56a   :  { %v7530_v52 = vpop.eup %7529  ;;  %5644 = vst.msk [vmem:[%s10640_s10 + $0x650] sm:$0xff] %vm1699_vm0, %v7528_v41  ;;  %7555 = vpow2.f32 %v5965_v20  ;;  %v3905_v20 = vadd.f32 %v10400_v0, %v10013_v40  ;;  %v3913_v41 = vadd.f32 %v10434_v39, %v10007_v42  ;;  %v3919_v39 = vadd.f32 %v10480_v61, %v10007_v42 }
 0x56b   :  { %v7532_v49 = vpop.eup %7531  ;;  %5551 = vst [vmem:[%s10640_s10 + $0x368] sm:$0xff] %v7530_v52  ;;  %7557 = vpow2.f32 %v5971_v58  ;;  %v3909_v58 = vadd.f32 %v10404_v36, %v10007_v42  ;;  %v5999_v0 = vmul.f32 -1.442695, %v3903_v27  ;;  %v3921_v2 = vadd.f32 %v10496_v51, %v10013_v40 }
 0x56c   :  { %v7534_v50 = vpop.eup %7533  ;;  %5665 = vst.msk [vmem:[%s10640_s10 + $0x6f8] sm:$0xff] %vm1699_vm0, %v7532_v49  ;;  %7559 = vpow2.f32 %v5972_v24  ;;  %v5993_v24 = vmul.f32 -1.442695, %v3901_v28  ;;  %v6000_v36 = vmul.f32 -1.442695, %v3905_v20  ;;  %v3932_v49 = vpop.f32.mrf.mxu1  ;;  %v3923_v61 = vadd.f32 %v10502_v19, %v10007_v42 }
 0x56d   :  { %v7536_v33 = vpop.eup %7535  ;;  %5552 = vst [vmem:[%s10640_s10 + $0x370] sm:$0xff] %v7534_v50  ;;  %7561 = vpow2.f32 %v5978_v11  ;;  %v6007_v50 = vmul.f32 -1.442695, %v3911_v14  ;;  %v3925_v51 = vadd.f32 %v10504_v54, %v10013_v40  ;;  %v6021_v19 = vmul.f32 -1.442695, %v3921_v2 }
 0x56e   :  { %v7538_v26 = vpop.eup %7537  ;;  %5651 = vst.msk [vmem:[%s10640_s10 + $0x688] sm:$0xff] %vm1699_vm0, %v7536_v33  ;;  %7563 = vpow2.f32 %v5979_v9  ;;  %v6006_v9 = vmul.f32 -1.442695, %v3909_v58  ;;  %v6013_v33 = vmul.f32 -1.442695, %v3913_v41 }
 0x56f   :  { %v7540_v29 = vpop.eup %7539  ;;  %v4886_v47 = vadd.f32 1.0, %v7538_v26  ;;  %7565 = vpow2.f32 %v5985_v57 }
 0x570   :  { %v7542_v35 = vpop.eup %7541  ;;  %v4887_v6 = vadd.f32 1.0, %v7540_v29  ;;  %7567 = vpow2.f32 %v5986_v7  ;;  %v6014_v29 = vmul.f32 -1.442695, %v3915_v22 }
 0x571   :  { %v7544_v62 = vpop.eup %7543  ;;  %7569 = vrcp.f32 %v4886_v47  ;;  %v4893_v21 = vadd.f32 1.0, %v7542_v35  ;;  %v6020_v35 = vmul.f32 -1.442695, %v3919_v39 }
 0x572   :  { %v7546_v59 = vpop.eup %7545  ;;  %7571 = vrcp.f32 %v4887_v6  ;;  %v4894_v55 = vadd.f32 1.0, %v7544_v62  ;;  %v3929_v6 = vadd.f32 %v3928_v31, %v10007_v42  ;;  %v3934_v62 = vpop.f32.mrf.mxu1 }
 0x573   :  { %v7548_v25 = vpop.eup %7547  ;;  %7573 = vrcp.f32 %v4893_v21  ;;  %v4900_v5 = vadd.f32 1.0, %v7546_v59  ;;  %v3931_v59 = vadd.f32 %v3930_v45, %v10013_v40 }
 0x574   :  { %v7550_v10 = vpop.eup %7549  ;;  %7575 = vrcp.f32 %v4894_v55  ;;  %v4901_v43 = vadd.f32 1.0, %v7548_v25  ;;  %v6027_v25 = vmul.f32 -1.442695, %v3923_v61  ;;  %v6034_v54 = vmul.f32 -1.442695, %v3929_v6 }
 0x575   :  { %v7552_v46 = vpop.eup %7551  ;;  %7577 = vrcp.f32 %v4900_v5  ;;  %v4907_v37 = vadd.f32 1.0, %v7550_v10  ;;  %v3933_v5 = vadd.f32 %v3932_v49, %v10007_v42  ;;  %v6035_v42 = vmul.f32 -1.442695, %v3931_v59 }
 0x576   :  { %v7554_v3 = vpop.eup %7553  ;;  %7579 = vrcp.f32 %v4901_v43  ;;  %v4908_v23 = vadd.f32 1.0, %v7552_v46  ;;  %v6028_v43 = vmul.f32 -1.442695, %v3925_v51  ;;  %v3935_v46 = vadd.f32 %v3934_v62, %v10013_v40 }
 0x577   :  { %v7556_v32 = vpop.eup %7555  ;;  %7581 = vrcp.f32 %v4907_v37  ;;  %v4914_v18 = vadd.f32 1.0, %v7554_v3  ;;  %v6041_v40 = vmul.f32 -1.442695, %v3933_v5 }
 0x578   :  { %v7558_v12 = vpop.eup %7557  ;;  %7583 = vrcp.f32 %v4908_v23  ;;  %v4915_v60 = vadd.f32 1.0, %v7556_v32 }
 0x579   :  { %v7560_v63 = vpop.eup %7559  ;;  %7585 = vrcp.f32 %v4914_v18  ;;  %v4921_v15 = vadd.f32 1.0, %v7558_v12  ;;  %v6042_v18 = vmul.f32 -1.442695, %v3935_v46 }
 0x57a   :  { %v7562_v44 = vpop.eup %7561  ;;  %7587 = vrcp.f32 %v4915_v60  ;;  %v4922_v16 = vadd.f32 1.0, %v7560_v63 }
 0x57b   :  { %v7564_v56 = vpop.eup %7563  ;;  %7589 = vrcp.f32 %v4921_v15  ;;  %v4928_v1 = vadd.f32 1.0, %v7562_v44 }
 0x57c   :  { %v7566_v17 = vpop.eup %7565  ;;  %7591 = vrcp.f32 %v4922_v16  ;;  %v4929_v53 = vadd.f32 1.0, %v7564_v56 }
 0x57d   :  { %v7568_v13 = vpop.eup %7567  ;;  %7593 = vrcp.f32 %v4928_v1  ;;  %v4935_v4 = vadd.f32 1.0, %v7566_v17 }
 0x57e   :  { %v7570_v38 = vpop.eup %7569  ;;  %7595 = vrcp.f32 %v4929_v53  ;;  %v4936_v48 = vadd.f32 1.0, %v7568_v13 }
 0x57f   :  { %v7572_v34 = vpop.eup %7571  ;;  %5558 = vst [vmem:[%s10640_s10 + $0x3a0] sm:$0xff] %v7570_v38  ;;  %7597 = vrcp.f32 %v4935_v4 }
 0x580   :  { %v7574_v11 = vpop.eup %7573  ;;  %5559 = vst [vmem:[%s10640_s10 + $0x3a8] sm:$0xff] %v7572_v34  ;;  %7599 = vrcp.f32 %v4936_v48 }
 0x581   :  { %v7576_v52 = vpop.eup %7575  ;;  %5565 = vst [vmem:[%s10640_s10 + $0x3d8] sm:$0xff] %v7574_v11  ;;  %7601 = vpow2.f32 %v5992_v8 }
 0x582   :  { %v7578_v57 = vpop.eup %7577  ;;  %5566 = vst [vmem:[%s10640_s10 + $0x3e0] sm:$0xff] %v7576_v52  ;;  %7603 = vpow2.f32 %v5993_v24 }
 0x583   :  { %v7580_v7 = vpop.eup %7579  ;;  %5572 = vst [vmem:[%s10640_s10 + $0x410] sm:$0xff] %v7578_v57  ;;  %7605 = vpow2.f32 %v5999_v0 }
 0x584   :  { %v7582_v26 = vpop.eup %7581  ;;  %5573 = vst [vmem:[%s10640_s10 + $0x418] sm:$0xff] %v7580_v7  ;;  %7607 = vpow2.f32 %v6000_v36 }
 0x585   :  { %v7584_v47 = vpop.eup %7583  ;;  %5579 = vst [vmem:[%s10640_s10 + $0x448] sm:$0xff] %v7582_v26  ;;  %7609 = vpow2.f32 %v6006_v9 }
 0x586   :  { %v7586_v21 = vpop.eup %7585  ;;  %5580 = vst [vmem:[%s10640_s10 + $0x450] sm:$0xff] %v7584_v47  ;;  %7611 = vpow2.f32 %v6007_v50 }
 0x587   :  { %v7588_v55 = vpop.eup %7587  ;;  %5586 = vst [vmem:[%s10640_s10 + $0x480] sm:$0xff] %v7586_v21  ;;  %7613 = vpow2.f32 %v6013_v33 }
 0x588   :  { %v7590_v10 = vpop.eup %7589  ;;  %5587 = vst [vmem:[%s10640_s10 + $0x488] sm:$0xff] %v7588_v55  ;;  %7615 = vpow2.f32 %v6014_v29 }
 0x589   :  { %v7592_v37 = vpop.eup %7591  ;;  %5593 = vst [vmem:[%s10640_s10 + $0x4b8] sm:$0xff] %v7590_v10  ;;  %7617 = vpow2.f32 %v6020_v35 }
 0x58a   :  { %v7594_v3 = vpop.eup %7593  ;;  %5594 = vst [vmem:[%s10640_s10 + $0x4c0] sm:$0xff] %v7592_v37  ;;  %7619 = vpow2.f32 %v6021_v19 }
 0x58b   :  { %v7596_v23 = vpop.eup %7595  ;;  %5600 = vst [vmem:[%s10640_s10 + $0x4f0] sm:$0xff] %v7594_v3  ;;  %7621 = vpow2.f32 %v6027_v25 }
 0x58c   :  { %v7598_v32 = vpop.eup %7597  ;;  %5601 = vst [vmem:[%s10640_s10 + $0x4f8] sm:$0xff] %v7596_v23  ;;  %7623 = vpow2.f32 %v6028_v43 }
 0x58d   :  { %v7600_v12 = vpop.eup %7599  ;;  %5607 = vst [vmem:[%s10640_s10 + $0x528] sm:$0xff] %v7598_v32  ;;  %7625 = vpow2.f32 %v6034_v54 }
 0x58e   :  { %v7602_v60 = vpop.eup %7601  ;;  %5608 = vst [vmem:[%s10640_s10 + $0x530] sm:$0xff] %v7600_v12  ;;  %7627 = vpow2.f32 %v6035_v42 }
 0x58f   :  { %v7604_v63 = vpop.eup %7603  ;;  %v4942_v15 = vadd.f32 1.0, %v7602_v60  ;;  %7629 = vpow2.f32 %v6041_v40 }
 0x590   :  { %v7606_v30 = vpop.eup %7605  ;;  %v4943_v31 = vadd.f32 1.0, %v7604_v63  ;;  %7631 = vpow2.f32 %v6042_v18 }
 0x591   :  { %v7608_v44 = vpop.eup %7607  ;;  %7633 = vrcp.f32 %v4942_v15  ;;  %v4949_v16 = vadd.f32 1.0, %v7606_v30 }
 0x592   :  { %v7610_v28 = vpop.eup %7609  ;;  %7635 = vrcp.f32 %v4943_v31  ;;  %v4950_v56 = vadd.f32 1.0, %v7608_v44 }
 0x593   :  { %v7612_v1 = vpop.eup %7611  ;;  %7637 = vrcp.f32 %v4949_v16  ;;  %v4956_v27 = vadd.f32 1.0, %v7610_v28 }
 0x594   :  { %v7614_v17 = vpop.eup %7613  ;;  %7639 = vrcp.f32 %v4950_v56  ;;  %v4957_v53 = vadd.f32 1.0, %v7612_v1 }
 0x595   :  { %v7616_v20 = vpop.eup %7615  ;;  %7641 = vrcp.f32 %v4956_v27  ;;  %v4963_v13 = vadd.f32 1.0, %v7614_v17 }
 0x596   :  { %v7618_v4 = vpop.eup %7617  ;;  %7643 = vrcp.f32 %v4957_v53  ;;  %v4964_v8 = vadd.f32 1.0, %v7616_v20 }
 0x597   :  { %v7620_v58 = vpop.eup %7619  ;;  %7645 = vrcp.f32 %v4963_v13  ;;  %v4970_v45 = vadd.f32 1.0, %v7618_v4 }
 0x598   :  { %v7622_v38 = vpop.eup %7621  ;;  %7647 = vrcp.f32 %v4964_v8  ;;  %v4971_v48 = vadd.f32 1.0, %v7620_v58 }
 0x599   :  { %v7624_v24 = vpop.eup %7623  ;;  %7649 = vrcp.f32 %v4970_v45  ;;  %v4977_v14 = vadd.f32 1.0, %v7622_v38 }
 0x59a   :  { %v7626_v34 = vpop.eup %7625  ;;  %7651 = vrcp.f32 %v4971_v48  ;;  %v4978_v0 = vadd.f32 1.0, %v7624_v24 }
 0x59b   :  { %v7628_v41 = vpop.eup %7627  ;;  %7653 = vrcp.f32 %v4977_v14  ;;  %v4984_v11 = vadd.f32 1.0, %v7626_v34 }
 0x59c   :  { %v7630_v36 = vpop.eup %7629  ;;  %7655 = vrcp.f32 %v4978_v0  ;;  %v4985_v22 = vadd.f32 1.0, %v7628_v41 }
 0x59d   :  { %v7632_v52 = vpop.eup %7631  ;;  %7657 = vrcp.f32 %v4984_v11  ;;  %v4991_v9 = vadd.f32 1.0, %v7630_v36 }
 0x59e   :  { %v7634_v39 = vpop.eup %7633  ;;  %7659 = vrcp.f32 %v4985_v22  ;;  %v4992_v49 = vadd.f32 1.0, %v7632_v52 }
 0x59f   :  { %v7636_v57 = vpop.eup %7635  ;;  %5614 = vst [vmem:[%s10640_s10 + $0x560] sm:$0xff] %v7634_v39  ;;  %7661 = vrcp.f32 %v4991_v9 }
 0x5a0   :  { %v7638_v50 = vpop.eup %7637  ;;  %5615 = vst [vmem:[%s10640_s10 + $0x568] sm:$0xff] %v7636_v57  ;;  %7663 = vrcp.f32 %v4992_v49 }
 0x5a1   :  { %v7640_v2 = vpop.eup %7639  ;;  %5621 = vst [vmem:[%s10640_s10 + $0x598] sm:$0xff] %v7638_v50 }
 0x5a2   :  { %v7642_v7 = vpop.eup %7641  ;;  %5622 = vst [vmem:[%s10640_s10 + $0x5a0] sm:$0xff] %v7640_v2 }
 0x5a3   :  { %v7644_v33 = vpop.eup %7643  ;;  %5628 = vst [vmem:[%s10640_s10 + $0x5d0] sm:$0xff] %v7642_v7 }
 0x5a4   :  { %v7646_v61 = vpop.eup %7645  ;;  %5629 = vst [vmem:[%s10640_s10 + $0x5d8] sm:$0xff] %v7644_v33 }
 0x5a5   :  { %v7648_v26 = vpop.eup %7647  ;;  %5635 = vst [vmem:[%s10640_s10 + $0x608] sm:$0xff] %v7646_v61 }
 0x5a6   :  { %v7650_v29 = vpop.eup %7649  ;;  %5636 = vst [vmem:[%s10640_s10 + $0x610] sm:$0xff] %v7648_v26 }
 0x5a7   :  { %v7652_v51 = vpop.eup %7651  ;;  %5642 = vst [vmem:[%s10640_s10 + $0x640] sm:$0xff] %v7650_v29 }
 0x5a8   :  { %v7654_v47 = vpop.eup %7653  ;;  %5643 = vst [vmem:[%s10640_s10 + $0x648] sm:$0xff] %v7652_v51 }
 0x5a9   :  { %v7656_v35 = vpop.eup %7655  ;;  %5649 = vst [vmem:[%s10640_s10 + $0x678] sm:$0xff] %v7654_v47 }
 0x5aa   :  { %v7658_v6 = vpop.eup %7657  ;;  %5650 = vst [vmem:[%s10640_s10 + $0x680] sm:$0xff] %v7656_v35 }
 0x5ab   :  { %v7660_v62 = vpop.eup %7659  ;;  %5656 = vst [vmem:[%s10640_s10 + $0x6b0] sm:$0xff] %v7658_v6 }
 0x5ac   :  { %v7662_v21 = vpop.eup %7661  ;;  %5657 = vst [vmem:[%s10640_s10 + $0x6b8] sm:$0xff] %v7660_v62 }
 0x5ad   :  { %v7664_v19 = vpop.eup %7663  ;;  %5663 = vst [vmem:[%s10640_s10 + $0x6e8] sm:$0xff] %v7662_v21 }
 0x5ae   :  { %5664 = vst [vmem:[%s10640_s10 + $0x6f0] sm:$0xff] %v7664_v19 }

</bundles_post_ra>
